<compile_context>
chip_gen: v7x
topology: tpu7x:2x2x1
jax: 0.10.0
libtpu: 0.0.40
codegen_flags: <defaults>
</compile_context>

<pallas_src>
import functools

import jax
import jax.numpy as jnp
from jax import lax
from jax.experimental import pallas as pl
from jax.experimental.pallas import tpu as pltpu

EPS = 1e-3      # matches nn.BatchNorm2d(eps=0.001)
LANE = 128
SUB = 8


def _round_up(x, m):
    return (x + m - 1) // m * m


# ------------------------------ fused kernel ------------------------------- #

def _bottleneck_kernel(x_ref, w1_ref, s1_ref, h1_ref,
                       w2_ref, s2_ref, h2_ref,
                       w3_ref, s3_ref, h3_ref,
                       o_ref, o1s_ref, *, W, row_chunk):
    # x_ref : (1, H, Wp, Cin_p)  image, W-padded (1 left, Wp-W-1 right), NHWC
    # w1    : (Cin_p, C1p)
    # w2    : (3, 3*C1p, C2p)    kh-indexed; kw folded into the contraction dim
    # w3    : (C2p, C4p)
    # s*/h* : (1, C*p)           folded BN scale / shift (+conv bias)
    # o_ref : (1, H, Wp, C4p)
    # o1s   : (H+2, Wp, 3*C1p)   VMEM scratch: kw-shifted conv1 output with
    #                            zero halo rows, concatenated on the lane dim
    _, H, Wp, Cin_p = x_ref.shape
    C1p = w1_ref.shape[1]
    K2 = w2_ref.shape[1]                      # 3 * C1p
    C2p = w2_ref.shape[2]
    C4p = w3_ref.shape[1]

    # ---- stage 1: 1x1 conv + BN + ReLU over the whole padded-width image ----
    x_flat = x_ref[0].reshape(H * Wp, Cin_p)            # free reshape (Wp%8==0)
    y1 = jnp.dot(x_flat, w1_ref[...], preferred_element_type=jnp.float32)
    y1 = jnp.maximum(y1 * s1_ref[...] + h1_ref[...], 0.0)
    y1 = y1.reshape(H, Wp, C1p)

    # SamePad2d pads the *conv1 output* with zeros: zero the padded columns
    # (they currently hold relu(shift1) garbage from the zero-padded x cols).
    col = lax.broadcasted_iota(jnp.int32, (H, Wp, C1p), 1)
    y1 = jnp.where((col >= 1) & (col <= W), y1, 0.0)

    # Three column-shifted taps, concatenated along lanes:
    #   y1_cat[h, c, kw*C1p + ci] == o1_padded[h+1, c + kw - 1, ci]
    # so every (chunk, kh) pair needs exactly one MXU matmul with K = 3*C1p.
    zcol = jnp.zeros((H, 1, C1p), jnp.float32)
    y1_cat = jnp.concatenate(
        [jnp.concatenate([zcol, y1[:, :Wp - 1, :]], axis=1),   # kw = 0
         y1,                                                   # kw = 1
         jnp.concatenate([y1[:, 1:, :], zcol], axis=1)],       # kw = 2
        axis=-1)                                               # (H, Wp, 3*C1p)

    zrow = jnp.zeros((1, Wp, K2), jnp.float32)
    o1s_ref[0:1] = zrow                       # top halo row (SamePad zero)
    o1s_ref[H + 1:H + 2] = zrow               # bottom halo row (SamePad zero)
    o1s_ref[1:H + 1] = y1_cat

    s2 = s2_ref[...]
    h2 = h2_ref[...]
    s3 = s3_ref[...]
    h3 = h3_ref[...]
    w3 = w3_ref[...]

    # ---- stages 2+3, fused, in row chunks (bounded f32 accumulator) ---------
    r0 = 0
    while r0 < H:                             # static Python loop (unrolled)
        rows = min(row_chunk, H - r0)
        L = rows * Wp
        acc = jnp.zeros((L, C2p), jnp.float32)
        for kh in range(3):                   # 3 clean MXU matmuls per chunk
            tap = o1s_ref[r0 + kh:r0 + kh + rows].reshape(L, K2)
            acc = acc + jnp.dot(tap, w2_ref[kh],
                                preferred_element_type=jnp.float32)
        o2 = jnp.maximum(acc * s2 + h2, 0.0)                      # bn2 + relu
        y3 = jnp.dot(o2, w3, preferred_element_type=jnp.float32)  # conv3 1x1
        res = x_ref[0, r0:r0 + rows].reshape(L, C4p)              # identity
        out = jnp.maximum(y3 * s3 + h3 + res, 0.0)                # bn3+add+relu
        o_ref[0, r0:r0 + rows] = out.reshape(rows, Wp, C4p).astype(o_ref.dtype)
        r0 += rows


# ------------------------------ call wrapper -------------------------------- #

def bottleneck_forward(x_nchw, p):
    """Full Bottleneck forward; input/output in NCHW like the PyTorch module."""
    N, Cin, H, W = x_nchw.shape
    w1, w2, w3 = p["w1"], p["w2"], p["w3"]
    Cin_p, C1p = w1.shape
    K2, C2p = w2.shape[1], w2.shape[2]
    C4p = w3.shape[1]
    assert Cin_p == C4p, "identity residual requires inplanes == 4*planes"

    Wp = _round_up(W + 2, SUB)                  # padded width (halo + 8-align)
    # Chunk rows so each conv2/conv3 matmul has a few hundred LHS rows while
    # the f32 accumulator stays small for large images.
    row_chunk = min(H, max(8, 512 // Wp))

    # NCHW -> NHWC, fused with W halo padding and channel padding to 128.
    x = jnp.transpose(x_nchw, (0, 2, 3, 1))
    x = jnp.pad(x, ((0, 0), (0, 0), (1, Wp - W - 1), (0, Cin_p - Cin)))

    kernel = functools.partial(_bottleneck_kernel, W=W, row_chunk=row_chunk)
    out = pl.pallas_call(
        kernel,
        out_shape=jax.ShapeDtypeStruct((N, H, Wp, C4p), x_nchw.dtype),
        grid=(N,),
        in_specs=[
            pl.BlockSpec((1, H, Wp, Cin_p), lambda n: (n, 0, 0, 0)),
            pl.BlockSpec((Cin_p, C1p), lambda n: (0, 0)),
            pl.BlockSpec((1, C1p), lambda n: (0, 0)),
            pl.BlockSpec((1, C1p), lambda n: (0, 0)),
            pl.BlockSpec((3, K2, C2p), lambda n: (0, 0, 0)),
            pl.BlockSpec((1, C2p), lambda n: (0, 0)),
            pl.BlockSpec((1, C2p), lambda n: (0, 0)),
            pl.BlockSpec((C2p, C4p), lambda n: (0, 0)),
            pl.BlockSpec((1, C4p), lambda n: (0, 0)),
            pl.BlockSpec((1, C4p), lambda n: (0, 0)),
        ],
        out_specs=pl.BlockSpec((1, H, Wp, C4p), lambda n: (n, 0, 0, 0)),
        scratch_shapes=[pltpu.VMEM((H + 2, Wp, K2), jnp.float32)],
        compiler_params=pltpu.CompilerParams(
            dimension_semantics=("parallel",),      # megacore over batch (v7x)
            vmem_limit_bytes=32 * 1024 * 1024,      # ample, safe on all chips
        ),
    )(x, w1, p["scale1"], p["shift1"],
      w2, p["scale2"], p["shift2"],
      w3, p["scale3"], p["shift3"])

    # Drop halo columns / channel padding, back to NCHW.
    out = out[:, :, 1:W + 1, :Cin]
    return jnp.transpose(out, (0, 3, 1, 2))


# --------------------------- parameters / reference ------------------------- #

def make_params(key, inplanes, planes):
    expansion = 4
    outplanes = planes * expansion
    ks = jax.random.split(key, 18)
    rnd = lambda k, s, sc=0.1: jax.random.normal(k, s, jnp.float32) * sc

    # torch-layout conv weights (OIHW) + biases
    w1 = rnd(ks[0], (planes, inplanes, 1, 1)); b1 = rnd(ks[1], (planes,))
    w2 = rnd(ks[2], (planes, planes, 3, 3));   b2 = rnd(ks[3], (planes,))
    w3 = rnd(ks[4], (outplanes, planes, 1, 1)); b3 = rnd(ks[5], (outplanes,))

    def bn(kg, kb, km, kv, c):
        gamma = 1.0 + rnd(kg, (c,))
        beta = rnd(kb, (c,))
        mean = rnd(km, (c,))
        var = jnp.abs(rnd(kv, (c,))) + 0.5
        return gamma, beta, mean, var

    bn1 = bn(ks[6], ks[7], ks[8], ks[9], planes)
    bn2 = bn(ks[10], ks[11], ks[12], ks[13], planes)
    bn3 = bn(ks[14], ks[15], ks[16], ks[17], outplanes)

    # lane-padded (multiple-of-128) kernel-side params
    Cin_p = _round_up(inplanes, LANE)
    C1p = _round_up(planes, LANE)
    C4p = _round_up(outplanes, LANE)

    w1_k = jnp.zeros((Cin_p, C1p), jnp.float32).at[:inplanes, :planes].set(
        w1[:, :, 0, 0].T)
    # conv2: (kh, kw, ci, co), kw folded into the contraction (row) dim.
    w2_hwio = jnp.transpose(w2, (2, 3, 1, 0))               # (3, 3, ci, co)
    w2_k = jnp.zeros((3, 3 * C1p, C1p), jnp.float32)
    for kw in range(3):
        w2_k = w2_k.at[:, kw * C1p:kw * C1p + planes, :planes].set(
            w2_hwio[:, kw])
    w3_k = jnp.zeros((C1p, C4p), jnp.float32).at[:planes, :outplanes].set(
        w3[:, :, 0, 0].T)

    def fold_pad(bias, bn_params, cp):
        gamma, beta, mean, var = bn_params
        scale = gamma / jnp.sqrt(var + EPS)
        shift = (bias - mean) * scale + beta
        c = scale.shape[0]
        sp = jnp.zeros((1, cp), jnp.float32).at[0, :c].set(scale)
        hp = jnp.zeros((1, cp), jnp.float32).at[0, :c].set(shift)
        return sp, hp

    s1, sh1 = fold_pad(b1, bn1, C1p)
    s2, sh2 = fold_pad(b2, bn2, C1p)
    s3, sh3 = fold_pad(b3, bn3, C4p)

    kernel_params = {
        "w1": w1_k, "w2": w2_k, "w3": w3_k,
        "scale1": s1, "shift1": sh1,
        "scale2": s2, "shift2": sh2,
        "scale3": s3, "shift3": sh3,
    }
    torch_params = dict(w1=w1, b1=b1, w2=w2, b2=b2, w3=w3, b3=b3,
                        bn1=bn1, bn2=bn2, bn3=bn3)
    return kernel_params, torch_params


def reference_forward(x, tp):
    """Pure-JAX (XLA) reference mirroring the PyTorch forward (inference BN)."""
    def conv(x, w, b):
        y = lax.conv_general_dilated(x, w, (1, 1), "VALID",
                                     dimension_numbers=("NCHW", "OIHW", "NCHW"))
        return y + b[None, :, None, None]

    def bn(z, params):
        g, b, m, v = params
        return (g[None, :, None, None] * (z - m[None, :, None, None])
                / jnp.sqrt(v[None, :, None, None] + EPS) + b[None, :, None, None])

    relu = lambda z: jnp.maximum(z, 0.0)
    residual = x
    o = relu(bn(conv(x, tp["w1"], tp["b1"]), tp["bn1"]))
    o = jnp.pad(o, ((0, 0), (0, 0), (1, 1), (1, 1)))        # SamePad2d(3, 1)
    o = relu(bn(conv(o, tp["w2"], tp["b2"]), tp["bn2"]))
    o = bn(conv(o, tp["w3"], tp["b3"]), tp["bn3"])
    return relu(o + residual)


# ----------------------------------- main ----------------------------------- #

if __name__ == "__main__":
    key = jax.random.PRNGKey(0)
    k_x, k_p = jax.random.split(key)

    N, inplanes, H, W = 2, 16, 16, 16        # inplanes == planes * expansion
    planes = 4

    x = jax.random.normal(k_x, (N, inplanes, H, W), jnp.float32)
    kernel_params, torch_params = make_params(k_p, inplanes, planes)

    out = jax.block_until_ready(bottleneck_forward(x, kernel_params))
    ref = jax.block_until_ready(reference_forward(x, torch_params))

    assert out.shape == (N, inplanes, H, W), out.shape
    assert jnp.allclose(out, ref, rtol=2e-3, atol=2e-3), (
        float(jnp.max(jnp.abs(out - ref))))
    print("KERNEL_OK")
</pallas_src>

<mosaic_0001>
module attributes {stable_mosaic.version = 11 : i64} {
  func.func @_bottleneck_kernel(%arg0: i32, %arg1: memref<1x16x24x128xf32, #tpu.memory_space<vmem>>, %arg2: memref<128x128xf32, #tpu.memory_space<vmem>>, %arg3: memref<1x128xf32, #tpu.memory_space<vmem>>, %arg4: memref<1x128xf32, #tpu.memory_space<vmem>>, %arg5: memref<3x384x128xf32, #tpu.memory_space<vmem>>, %arg6: memref<1x128xf32, #tpu.memory_space<vmem>>, %arg7: memref<1x128xf32, #tpu.memory_space<vmem>>, %arg8: memref<128x128xf32, #tpu.memory_space<vmem>>, %arg9: memref<1x128xf32, #tpu.memory_space<vmem>>, %arg10: memref<1x128xf32, #tpu.memory_space<vmem>>, %arg11: memref<1x16x24x128xf32, #tpu.memory_space<vmem>>, %arg12: memref<18x24x384xf32, #tpu.memory_space<vmem>>) attributes {dimension_semantics = [#tpu.dimension_semantics<parallel>], iteration_bounds = array<i64: 2>, scalar_prefetch = 0 : i64, scratch_operands = 1 : i64, tpu.core_type = #tpu.core_type<tc>, window_params = [{transform_indices = @transform_0, window_bounds = array<i64: 1, 16, 24, 128>}, {pipeline_mode = #tpu.pipeline_mode<synchronous>, transform_indices = @transform_1, window_bounds = array<i64: 128, 128>}, {pipeline_mode = #tpu.pipeline_mode<synchronous>, transform_indices = @transform_2, window_bounds = array<i64: 1, 128>}, {pipeline_mode = #tpu.pipeline_mode<synchronous>, transform_indices = @transform_3, window_bounds = array<i64: 1, 128>}, {pipeline_mode = #tpu.pipeline_mode<synchronous>, transform_indices = @transform_4, window_bounds = array<i64: 3, 384, 128>}, {pipeline_mode = #tpu.pipeline_mode<synchronous>, transform_indices = @transform_5, window_bounds = array<i64: 1, 128>}, {pipeline_mode = #tpu.pipeline_mode<synchronous>, transform_indices = @transform_6, window_bounds = array<i64: 1, 128>}, {pipeline_mode = #tpu.pipeline_mode<synchronous>, transform_indices = @transform_7, window_bounds = array<i64: 128, 128>}, {pipeline_mode = #tpu.pipeline_mode<synchronous>, transform_indices = @transform_8, window_bounds = array<i64: 1, 128>}, {pipeline_mode = #tpu.pipeline_mode<synchronous>, transform_indices = @transform_9, window_bounds = array<i64: 1, 128>}, {transform_indices = @transform_10, window_bounds = array<i64: 1, 16, 24, 128>}]} {
    %c0 = arith.constant 0 : index
    %c0_0 = arith.constant 0 : index
    %c0_1 = arith.constant 0 : index
    %c0_2 = arith.constant 0 : index
    %0 = vector.load %arg1[%c0, %c0_0, %c0_1, %c0_2] : memref<1x16x24x128xf32, #tpu.memory_space<vmem>>, vector<1x16x24x128xf32>
    %1 = vector.shape_cast %0 : vector<1x16x24x128xf32> to vector<16x24x128xf32>
    %2 = vector.shape_cast %1 : vector<16x24x128xf32> to vector<384x128xf32>
    %c0_3 = arith.constant 0 : index
    %c0_4 = arith.constant 0 : index
    %3 = vector.load %arg2[%c0_3, %c0_4] : memref<128x128xf32, #tpu.memory_space<vmem>>, vector<128x128xf32>
    %cst = arith.constant dense<0.000000e+00> : vector<384x128xf32>
    %4 = tpu.matmul %2, %3, %cst {dimension_numbers = #tpu.dot_dimension_numbers<[1], [0], [0], [1], [0, 0, 1, 1], [], []>} : vector<384x128xf32>, vector<128x128xf32>, vector<384x128xf32> -> vector<384x128xf32>
    %c0_5 = arith.constant 0 : index
    %c0_6 = arith.constant 0 : index
    %5 = vector.load %arg3[%c0_5, %c0_6] : memref<1x128xf32, #tpu.memory_space<vmem>>, vector<1x128xf32>
    %6 = vector.broadcast %5 : vector<1x128xf32> to vector<384x128xf32>
    %7 = arith.mulf %4, %6 : vector<384x128xf32>
    %c0_7 = arith.constant 0 : index
    %c0_8 = arith.constant 0 : index
    %8 = vector.load %arg4[%c0_7, %c0_8] : memref<1x128xf32, #tpu.memory_space<vmem>>, vector<1x128xf32>
    %9 = vector.broadcast %8 : vector<1x128xf32> to vector<384x128xf32>
    %10 = arith.addf %7, %9 : vector<384x128xf32>
    %cst_9 = arith.constant 0.000000e+00 : f32
    %11 = vector.broadcast %cst_9 : f32 to vector<384x128xf32>
    %12 = arith.maximumf %10, %11 : vector<384x128xf32>
    %13 = vector.shape_cast %12 : vector<384x128xf32> to vector<16x24x128xf32>
    %14 = tpu.iota {dimensions = array<i32: 1>} : vector<16x24x128xi32>
    %c1_i32 = arith.constant 1 : i32
    %15 = vector.broadcast %c1_i32 : i32 to vector<16x24x128xi32>
    %16 = arith.cmpi sge, %14, %15 : vector<16x24x128xi32>
    %c16_i32 = arith.constant 16 : i32
    %17 = vector.broadcast %c16_i32 : i32 to vector<16x24x128xi32>
    %18 = arith.cmpi sle, %14, %17 : vector<16x24x128xi32>
    %19 = arith.andi %16, %18 : vector<16x24x128xi1>
    %cst_10 = arith.constant 0.000000e+00 : f32
    %20 = vector.broadcast %cst_10 : f32 to vector<16x24x128xf32>
    %21 = arith.select %19, %13, %20 : vector<16x24x128xi1>, vector<16x24x128xf32>
    %cst_11 = arith.constant 0.000000e+00 : f32
    %22 = vector.broadcast %cst_11 : f32 to vector<16x1x128xf32>
    %23 = vector.extract_strided_slice %21 {offsets = [0, 0, 0], sizes = [16, 23, 128], strides = [1, 1, 1]} : vector<16x24x128xf32> to vector<16x23x128xf32>
    %24 = tpu.concatenate %22, %23 in 1 : vector<16x1x128xf32>, vector<16x23x128xf32> -> vector<16x24x128xf32>
    %25 = vector.extract_strided_slice %21 {offsets = [0, 1, 0], sizes = [16, 23, 128], strides = [1, 1, 1]} : vector<16x24x128xf32> to vector<16x23x128xf32>
    %26 = tpu.concatenate %25, %22 in 1 : vector<16x23x128xf32>, vector<16x1x128xf32> -> vector<16x24x128xf32>
    %27 = tpu.concatenate %24, %21, %26 in 2 : vector<16x24x128xf32>, vector<16x24x128xf32>, vector<16x24x128xf32> -> vector<16x24x384xf32>
    %cst_12 = arith.constant 0.000000e+00 : f32
    %28 = vector.broadcast %cst_12 : f32 to vector<1x24x384xf32>
    %c0_13 = arith.constant 0 : index
    %c0_14 = arith.constant 0 : index
    %c0_15 = arith.constant 0 : index
    %29 = vector.load %arg12[%c0_13, %c0_14, %c0_15] : memref<18x24x384xf32, #tpu.memory_space<vmem>>, vector<1x24x384xf32>
    tpu.vector_store %arg12[%c0_13, %c0_14, %c0_15], %28 {strides = array<i32>} : memref<18x24x384xf32, #tpu.memory_space<vmem>>, vector<1x24x384xf32>,
    %c17 = arith.constant 17 : index
    %c0_16 = arith.constant 0 : index
    %c0_17 = arith.constant 0 : index
    %30 = vector.load %arg12[%c17, %c0_16, %c0_17] : memref<18x24x384xf32, #tpu.memory_space<vmem>>, vector<1x24x384xf32>
    tpu.vector_store %arg12[%c17, %c0_16, %c0_17], %28 {strides = array<i32>} : memref<18x24x384xf32, #tpu.memory_space<vmem>>, vector<1x24x384xf32>,
    %c1 = arith.constant 1 : index
    %c0_18 = arith.constant 0 : index
    %c0_19 = arith.constant 0 : index
    %31 = vector.load %arg12[%c1, %c0_18, %c0_19] : memref<18x24x384xf32, #tpu.memory_space<vmem>>, vector<16x24x384xf32>
    tpu.vector_store %arg12[%c1, %c0_18, %c0_19], %27 {strides = array<i32>} : memref<18x24x384xf32, #tpu.memory_space<vmem>>, vector<16x24x384xf32>,
    %c0_20 = arith.constant 0 : index
    %c0_21 = arith.constant 0 : index
    %32 = vector.load %arg6[%c0_20, %c0_21] : memref<1x128xf32, #tpu.memory_space<vmem>>, vector<1x128xf32>
    %c0_22 = arith.constant 0 : index
    %c0_23 = arith.constant 0 : index
    %33 = vector.load %arg7[%c0_22, %c0_23] : memref<1x128xf32, #tpu.memory_space<vmem>>, vector<1x128xf32>
    %c0_24 = arith.constant 0 : index
    %c0_25 = arith.constant 0 : index
    %34 = vector.load %arg9[%c0_24, %c0_25] : memref<1x128xf32, #tpu.memory_space<vmem>>, vector<1x128xf32>
    %c0_26 = arith.constant 0 : index
    %c0_27 = arith.constant 0 : index
    %35 = vector.load %arg10[%c0_26, %c0_27] : memref<1x128xf32, #tpu.memory_space<vmem>>, vector<1x128xf32>
    %c0_28 = arith.constant 0 : index
    %c0_29 = arith.constant 0 : index
    %36 = vector.load %arg8[%c0_28, %c0_29] : memref<128x128xf32, #tpu.memory_space<vmem>>, vector<128x128xf32>
    %cst_30 = arith.constant 0.000000e+00 : f32
    %37 = vector.broadcast %cst_30 : f32 to vector<384x128xf32>
    %c0_31 = arith.constant 0 : index
    %c0_32 = arith.constant 0 : index
    %c0_33 = arith.constant 0 : index
    %38 = vector.load %arg12[%c0_31, %c0_32, %c0_33] : memref<18x24x384xf32, #tpu.memory_space<vmem>>, vector<16x24x384xf32>
    %39 = vector.shape_cast %38 : vector<16x24x384xf32> to vector<384x384xf32>
    %c0_34 = arith.constant 0 : index
    %c0_35 = arith.constant 0 : index
    %c0_36 = arith.constant 0 : index
    %40 = vector.load %arg5[%c0_34, %c0_35, %c0_36] : memref<3x384x128xf32, #tpu.memory_space<vmem>>, vector<1x384x128xf32>
    %41 = vector.shape_cast %40 : vector<1x384x128xf32> to vector<384x128xf32>
    %cst_37 = arith.constant dense<0.000000e+00> : vector<384x128xf32>
    %42 = tpu.matmul %39, %41, %cst_37 {dimension_numbers = #tpu.dot_dimension_numbers<[1], [0], [0], [1], [0, 0, 1, 1], [], []>} : vector<384x384xf32>, vector<384x128xf32>, vector<384x128xf32> -> vector<384x128xf32>
    %43 = arith.addf %37, %42 : vector<384x128xf32>
    %c1_38 = arith.constant 1 : index
    %c0_39 = arith.constant 0 : index
    %c0_40 = arith.constant 0 : index
    %44 = vector.load %arg12[%c1_38, %c0_39, %c0_40] : memref<18x24x384xf32, #tpu.memory_space<vmem>>, vector<16x24x384xf32>
    %45 = vector.shape_cast %44 : vector<16x24x384xf32> to vector<384x384xf32>
    %c1_41 = arith.constant 1 : index
    %c0_42 = arith.constant 0 : index
    %c0_43 = arith.constant 0 : index
    %46 = vector.load %arg5[%c1_41, %c0_42, %c0_43] : memref<3x384x128xf32, #tpu.memory_space<vmem>>, vector<1x384x128xf32>
    %47 = vector.shape_cast %46 : vector<1x384x128xf32> to vector<384x128xf32>
    %cst_44 = arith.constant dense<0.000000e+00> : vector<384x128xf32>
    %48 = tpu.matmul %45, %47, %cst_44 {dimension_numbers = #tpu.dot_dimension_numbers<[1], [0], [0], [1], [0, 0, 1, 1], [], []>} : vector<384x384xf32>, vector<384x128xf32>, vector<384x128xf32> -> vector<384x128xf32>
    %49 = arith.addf %43, %48 : vector<384x128xf32>
    %c2 = arith.constant 2 : index
    %c0_45 = arith.constant 0 : index
    %c0_46 = arith.constant 0 : index
    %50 = vector.load %arg12[%c2, %c0_45, %c0_46] : memref<18x24x384xf32, #tpu.memory_space<vmem>>, vector<16x24x384xf32>
    %51 = vector.shape_cast %50 : vector<16x24x384xf32> to vector<384x384xf32>
    %c2_47 = arith.constant 2 : index
    %c0_48 = arith.constant 0 : index
    %c0_49 = arith.constant 0 : index
    %52 = vector.load %arg5[%c2_47, %c0_48, %c0_49] : memref<3x384x128xf32, #tpu.memory_space<vmem>>, vector<1x384x128xf32>
    %53 = vector.shape_cast %52 : vector<1x384x128xf32> to vector<384x128xf32>
    %cst_50 = arith.constant dense<0.000000e+00> : vector<384x128xf32>
    %54 = tpu.matmul %51, %53, %cst_50 {dimension_numbers = #tpu.dot_dimension_numbers<[1], [0], [0], [1], [0, 0, 1, 1], [], []>} : vector<384x384xf32>, vector<384x128xf32>, vector<384x128xf32> -> vector<384x128xf32>
    %55 = arith.addf %49, %54 : vector<384x128xf32>
    %56 = vector.broadcast %32 : vector<1x128xf32> to vector<384x128xf32>
    %57 = arith.mulf %55, %56 : vector<384x128xf32>
    %58 = vector.broadcast %33 : vector<1x128xf32> to vector<384x128xf32>
    %59 = arith.addf %57, %58 : vector<384x128xf32>
    %cst_51 = arith.constant 0.000000e+00 : f32
    %60 = vector.broadcast %cst_51 : f32 to vector<384x128xf32>
    %61 = arith.maximumf %59, %60 : vector<384x128xf32>
    %cst_52 = arith.constant dense<0.000000e+00> : vector<384x128xf32>
    %62 = tpu.matmul %61, %36, %cst_52 {dimension_numbers = #tpu.dot_dimension_numbers<[1], [0], [0], [1], [0, 0, 1, 1], [], []>} : vector<384x128xf32>, vector<128x128xf32>, vector<384x128xf32> -> vector<384x128xf32>
    %c0_53 = arith.constant 0 : index
    %c0_54 = arith.constant 0 : index
    %c0_55 = arith.constant 0 : index
    %c0_56 = arith.constant 0 : index
    %63 = vector.load %arg1[%c0_53, %c0_54, %c0_55, %c0_56] : memref<1x16x24x128xf32, #tpu.memory_space<vmem>>, vector<1x16x24x128xf32>
    %64 = vector.shape_cast %63 : vector<1x16x24x128xf32> to vector<16x24x128xf32>
    %65 = vector.shape_cast %64 : vector<16x24x128xf32> to vector<384x128xf32>
    %66 = vector.broadcast %34 : vector<1x128xf32> to vector<384x128xf32>
    %67 = arith.mulf %62, %66 : vector<384x128xf32>
    %68 = vector.broadcast %35 : vector<1x128xf32> to vector<384x128xf32>
    %69 = arith.addf %67, %68 : vector<384x128xf32>
    %70 = arith.addf %69, %65 : vector<384x128xf32>
    %cst_57 = arith.constant 0.000000e+00 : f32
    %71 = vector.broadcast %cst_57 : f32 to vector<384x128xf32>
    %72 = arith.maximumf %70, %71 : vector<384x128xf32>
    %73 = vector.shape_cast %72 : vector<384x128xf32> to vector<16x24x128xf32>
    %c0_58 = arith.constant 0 : index
    %c0_59 = arith.constant 0 : index
    %c0_60 = arith.constant 0 : index
    %c0_61 = arith.constant 0 : index
    %74 = vector.load %arg11[%c0_58, %c0_59, %c0_60, %c0_61] : memref<1x16x24x128xf32, #tpu.memory_space<vmem>>, vector<1x16x24x128xf32>
    %75 = vector.shape_cast %74 : vector<1x16x24x128xf32> to vector<16x24x128xf32>
    %76 = vector.shape_cast %73 : vector<16x24x128xf32> to vector<1x16x24x128xf32>
    tpu.vector_store %arg11[%c0_58, %c0_59, %c0_60, %c0_61], %76 {strides = array<i32>} : memref<1x16x24x128xf32, #tpu.memory_space<vmem>>, vector<1x16x24x128xf32>,
    return
  }
  func.func @transform_0(%arg0: i32) -> (i32, i32, i32, i32) {
    %c0_i32 = arith.constant 0 : i32
    %c0_i32_0 = arith.constant 0 : i32
    %c0_i32_1 = arith.constant 0 : i32
    %c0_i32_2 = arith.constant 0 : i32
    return %arg0, %c0_i32, %c0_i32_0, %c0_i32_1 : i32, i32, i32, i32
  }
  func.func @transform_1(%arg0: i32) -> (i32, i32) {
    %c0_i32 = arith.constant 0 : i32
    %c0_i32_0 = arith.constant 0 : i32
    %c0_i32_1 = arith.constant 0 : i32
    return %c0_i32, %c0_i32_0 : i32, i32
  }
  func.func @transform_2(%arg0: i32) -> (i32, i32) {
    %c0_i32 = arith.constant 0 : i32
    %c0_i32_0 = arith.constant 0 : i32
    %c0_i32_1 = arith.constant 0 : i32
    return %c0_i32, %c0_i32_0 : i32, i32
  }
  func.func @transform_3(%arg0: i32) -> (i32, i32) {
    %c0_i32 = arith.constant 0 : i32
    %c0_i32_0 = arith.constant 0 : i32
    %c0_i32_1 = arith.constant 0 : i32
    return %c0_i32, %c0_i32_0 : i32, i32
  }
  func.func @transform_4(%arg0: i32) -> (i32, i32, i32) {
    %c0_i32 = arith.constant 0 : i32
    %c0_i32_0 = arith.constant 0 : i32
    %c0_i32_1 = arith.constant 0 : i32
    %c0_i32_2 = arith.constant 0 : i32
    return %c0_i32, %c0_i32_0, %c0_i32_1 : i32, i32, i32
  }
  func.func @transform_5(%arg0: i32) -> (i32, i32) {
    %c0_i32 = arith.constant 0 : i32
    %c0_i32_0 = arith.constant 0 : i32
    %c0_i32_1 = arith.constant 0 : i32
    return %c0_i32, %c0_i32_0 : i32, i32
  }
  func.func @transform_6(%arg0: i32) -> (i32, i32) {
    %c0_i32 = arith.constant 0 : i32
    %c0_i32_0 = arith.constant 0 : i32
    %c0_i32_1 = arith.constant 0 : i32
    return %c0_i32, %c0_i32_0 : i32, i32
  }
  func.func @transform_7(%arg0: i32) -> (i32, i32) {
    %c0_i32 = arith.constant 0 : i32
    %c0_i32_0 = arith.constant 0 : i32
    %c0_i32_1 = arith.constant 0 : i32
    return %c0_i32, %c0_i32_0 : i32, i32
  }
  func.func @transform_8(%arg0: i32) -> (i32, i32) {
    %c0_i32 = arith.constant 0 : i32
    %c0_i32_0 = arith.constant 0 : i32
    %c0_i32_1 = arith.constant 0 : i32
    return %c0_i32, %c0_i32_0 : i32, i32
  }
  func.func @transform_9(%arg0: i32) -> (i32, i32) {
    %c0_i32 = arith.constant 0 : i32
    %c0_i32_0 = arith.constant 0 : i32
    %c0_i32_1 = arith.constant 0 : i32
    return %c0_i32, %c0_i32_0 : i32, i32
  }
  func.func @transform_10(%arg0: i32) -> (i32, i32, i32, i32) {
    %c0_i32 = arith.constant 0 : i32
    %c0_i32_0 = arith.constant 0 : i32
    %c0_i32_1 = arith.constant 0 : i32
    %c0_i32_2 = arith.constant 0 : i32
    return %arg0, %c0_i32, %c0_i32_0, %c0_i32_1 : i32, i32, i32, i32
  }
}

</mosaic_0001>

<bundles_post_ra>
// kernel: tpu_custom_call.1
= control target key start
LH: loop header
LB: loop body
LE: loop exit
PB: predicated region body
PF: predicated region fallthrough
CT: control target
= control target key end

     0   :  { %s9561_s0 = inlined_call_operand.hbm [shape: f32[2,16,24,128], index: 0, kind: input, shape index: {}]   ;;  %s9562_s1 = inlined_call_operand.hbm [shape: f32[128,128], index: 1, kind: input, shape index: {}]   ;;  %s9563_s2 = inlined_call_operand.vmem [shape: f32[1,128], index: 2, kind: input, shape index: {}]   ;;  %s9564_s3 = inlined_call_operand.vmem [shape: f32[1,128], index: 3, kind: input, shape index: {}]   ;;  %s9565_s4 = inlined_call_operand.hbm [shape: f32[3,384,128], index: 4, kind: input, shape index: {}]   ;;  %s9566_s5 = inlined_call_operand.vmem [shape: f32[1,128], index: 5, kind: input, shape index: {}]   ;;  %s9567_s6 = inlined_call_operand.vmem [shape: f32[1,128], index: 6, kind: input, shape index: {}]   ;;  %s9568_s7 = inlined_call_operand.hbm [shape: f32[128,128], index: 7, kind: input, shape index: {}]   ;;  %s9569_s8 = inlined_call_operand.vmem [shape: f32[1,128], index: 8, kind: input, shape index: {}]   ;;  %s9570_s9 = inlined_call_operand.vmem [shape: f32[1,128], index: 9, kind: input, shape index: {}]   ;;  %s9571_s10 = inlined_call_operand.hbm [shape: f32[2,16,24,128], index: 10, kind: output, shape index: {}]  }
   0x1   :  { %9812 = sst [smem:[#allocation155_spill]] %s9570_s9 }
   0x2   :  { %9813 = sst [smem:[#allocation156_spill]] %s9571_s10 }
   0x3   :  { %15 = vsyncpa [#allocation4], 0 }
   0x4   :  { %17 = vsyncpa [#allocation4 + $0x1], 0 }
   0x5   :  { %18 = vsyncpa [#allocation7], 0 }
   0x6   :  { %19 = vsyncpa [#allocation10], 0 }
   0x7   :  { %20 = vsyncpa [#allocation5], 0 }
   0x8   :  { %22 = vsyncpa [#allocation5 + $0x1], 0  ;;  %s6621_s13 = smov 0   ;;  %s6623_s14 = smov 0  }
   0x9   :  { %s6625_s15 = smov 0   ;;  %s6627_s16 = smov 0  }
   0xa LB: > { %9814 = sst [smem:[#allocation16_spill]] %s6541_s13  ;;  %s6642_s17 = sadd.s32 4294967295, %s6553_s16   ;;  %s6553_s16 = sphi %s6627_s16, %s10238_s16   ;;  %s6549_s15 = sphi %s6625_s15, %s10237_s15   ;;  %s6545_s14 = sphi %s6623_s14, %s10236_s14   ;;  %s6541_s13 = sphi %s6621_s13, %s10235_s13  }
   0xb   : > { %s4866_s18 = sadd.s32 4294967294, %s6553_s16   ;;  %p48_p0 = scmp.ne.s32.totalorder %s6545_s14, %s6541_s13 }
   0xc   : > { %p9572_p1 = scmp.eq.s32.totalorder %s6642_s17, 0  ;;  %p267_p3 = scmp.eq.s32.totalorder %s4866_s18, 1 }
   0xd   : > { %p4867_p5 = scmp.ge.s32.totalorder %s6553_s16, 1  ;;  %p274_p7 = scmp.lt.s32.totalorder %s6553_s16, 3 }
   0xe   : > { %p6651_p4 = por %p9572_p1, %p48_p0  ;;  %p6656_p6 = por %p267_p3, %p48_p0 }
   0xf   : > { %p6661_p8 = pnand %p4867_p5, %p274_p7  ;;  %s6555_s22 = smov [#allocation6]  }
  0x10   : > { %s9815_s19 = scalar_select %p6651_p4, 1, 0 }
  0x11   : > { %s9816_s20 = scalar_select %p6656_p6, 1, 0 }
  0x12   : > { %s9818_s21 = scalar_select %p6661_p8, 1, 0 }
  0x13   : > { %9817 = sst [smem:[#allocation17_spill]] %s9816_s20  ;;  %s286_s23 = sshll.u32 %s6555_s22, 4  ;;  %s6665_s23 = int_to_ptr.vmem [resolvable:$true] %s286_s23 }
  0x14   : > { %p6296_p9 = pneg %p6661_p8  ;;  %s6556_s25 = smov [#allocation8]  }
  0x15   : > { %s305_s26 = sshll.u32 %s6556_s25, 4  ;;  %s6557_s27 = smov [#allocation9]   ;;  %s6676_s26 = int_to_ptr.vmem [resolvable:$true] %s305_s26 }
  0x16   : > { %p6672_p11 = pnand %p6296_p9, %p9572_p1  ;;  %s6678_s28 = sshll.u32 %s6557_s27, 4  ;;  %s325_s28 = int_to_ptr.vmem [resolvable:$true] %s6678_s28 }
  0x17   : > { %s6365_s11 = scalar_lea.hbm %s9562_s1, 2048 }
  0x18   : > { %p6366_p12 = scmp.ne.s32.totalorder %s9562_s1, %s6365_s11  ;;  %p6688_p13 = pneg %p6672_p11 }
  0x19   : > { %p6372_p5 = scmp.lt.u32.totalorder %s6365_s11, %s9562_s1 }
  0x1a   : > { %p6368_p0 = pnand %p6688_p13, %p6366_p12 }
  0x1c   : > { %p6369_p3 = pneg %p6368_p0 }
  0x1e   : > { %p6374_p7 = pnand %p6372_p5, %p6369_p3 }
  0x20   : > { %6377 = shalt.err (!%p6374_p7)
}
  0x21   : > { %s6378_s29 = scalar_lea.vmem %s6665_s23, 2048  ;;  %p6386_p2 = scmp.lt.s32.totalorder %s6665_s23, %s6665_s23 }
  0x22   : > { %p6379_p9 = scmp.ne.s32.totalorder %s6665_s23, %s6378_s29  ;;  %p6387_p6 = scmp.lt.s32.totalorder %s6378_s29, %s6378_s29 }
  0x24   : > { %p6381_p10 = pnand %p6379_p9, %p6688_p13  ;;  %p6388_p12 = por %p6387_p6, %p6386_p2 }
  0x26   : > { %p6382_p1 = pneg %p6381_p10 }
  0x28   : > { %p6389_p0 = pnand %p6388_p12, %p6382_p1 }
  0x2a   : > { %6392 = shalt.err (!%p6389_p0)
}
  0x2b   : > { %s9578_s30 = smov 128   ;;  %s9579_s11 = smov 8  }
  0x2c   : > { %6299 = dma.hbm_to_vmem [thread:$0]  (!%p6672_p11), %s9562_s1, 2048, %s6665_s23, [#allocation7], %s9578_s30, %s9578_s30, %s9579_s11  }
  0x2d   : > { %s6393_s29 = scalar_lea.hbm %s9565_s4, 18432 }
  0x2e   : > { %p6394_p1 = scmp.ne.s32.totalorder %s9565_s4, %s6393_s29  ;;  %p6400_p10 = scmp.lt.u32.totalorder %s6393_s29, %s9565_s4 }
  0x30   : > { %p6396_p2 = pnand %p6394_p1, %p6688_p13 }
  0x32   : > { %p6397_p6 = pneg %p6396_p2 }
  0x34   : > { %p6402_p3 = pnand %p6400_p10, %p6397_p6 }
  0x36   : > { %6405 = shalt.err (!%p6402_p3)
}
  0x37   : > { %s6406_s23 = scalar_lea.vmem %s6676_s26, 18432  ;;  %p6414_p12 = scmp.lt.s32.totalorder %s6676_s26, %s6676_s26 }
  0x38   : > { %p6407_p5 = scmp.ne.s32.totalorder %s6676_s26, %s6406_s23  ;;  %p6415_p0 = scmp.lt.s32.totalorder %s6406_s23, %s6406_s23 }
  0x3a   : > { %p6409_p7 = pnand %p6407_p5, %p6688_p13  ;;  %p6416_p1 = por %p6415_p0, %p6414_p12 }
  0x3c   : > { %p6410_p9 = pneg %p6409_p7 }
  0x3e   : > { %p6417_p2 = pnand %p6416_p1, %p6410_p9 }
  0x40   : > { %6420 = shalt.err (!%p6417_p2)
}
  0x41   : > { %6302 = dma.hbm_to_vmem [thread:$0]  (!%p6672_p11), %s9565_s4, 18432, %s6676_s26, [#allocation7], %s9578_s30, %s9578_s30, %s9579_s11  }
  0x42   : > { %s6421_s12 = scalar_lea.hbm %s9568_s7, 2048 }
  0x43   : > { %p6422_p6 = scmp.ne.s32.totalorder %s9568_s7, %s6421_s12  ;;  %p6428_p5 = scmp.lt.u32.totalorder %s6421_s12, %s9568_s7 }
  0x45   : > { %p6424_p10 = pnand %p6422_p6, %p6688_p13 }
  0x47   : > { %p6425_p3 = pneg %p6424_p10 }
  0x49   : > { %p6430_p7 = pnand %p6428_p5, %p6425_p3 }
  0x4b   : > { %6433 = shalt.err (!%p6430_p7)
}
  0x4c   : > { %s6434_s23 = scalar_lea.vmem %s325_s28, 2048  ;;  %p6442_p1 = scmp.lt.s32.totalorder %s325_s28, %s325_s28 }
  0x4d   : > { %p6435_p9 = scmp.ne.s32.totalorder %s325_s28, %s6434_s23  ;;  %p6443_p2 = scmp.lt.s32.totalorder %s6434_s23, %s6434_s23 }
  0x4f   : > { %p6437_p12 = pnand %p6435_p9, %p6688_p13  ;;  %p6444_p4 = por %p6443_p2, %p6442_p1 }
  0x51   : > { %p6438_p0 = pneg %p6437_p12 }
  0x53   : > { %p6445_p8 = pnand %p6444_p4, %p6438_p0 }
  0x55   : > { %6448 = shalt.err (!%p6445_p8)
}
  0x56   : > { %6305 = dma.hbm_to_vmem [thread:$0]  (!%p6672_p11), %s9568_s7, 2048, %s325_s28, [#allocation10], %s9578_s30, %s9578_s30, %s9579_s11  }
  0x57   : > { %s6761_s22 = sadd.s32 1, %s6553_s16   ;;  %s35_s10 = sadd.s32 1, %s6549_s15 }
  0x58   : > { %s32_s24 = ssub.s32 %s6553_s16, %s6761_s22  ;;  %p42_p8 = scmp.ne.s32.totalorder %s6549_s15, %s6545_s14 }
  0x59   : > { %p33_p4 = scmp.eq.s32.totalorder %s32_s24, 0  ;;  %p43_p13 = scmp.eq.s32.totalorder %s6553_s16, 0 }
  0x5a   : > { %p6317_p6 = scmp.lt.s32.totalorder %s6553_s16, 2  ;;  %p9821_p3 = scmp.eq.s32.totalorder %s6642_s17, 1 }
  0x5b   : > { %s6771_s13 = scalar_select %p33_p4, %s6549_s15, %s35_s10  }
  0x5c   : > { %p44_p10 = por %p43_p13, %p42_p8  ;;  %p6775_p5 = por %p9821_p3, %p42_p8 }
  0x5d   : > { %s344_s12 = sand.u32 1, %s6549_s15   ;;  %s6277_s18 = smul.u32 6144, %s6553_s16 }
  0x5e   : > { %s6276_s28 = smul.u32 384, %s344_s12  ;;  %p6781_p11 = pnand %p6317_p6, %p44_p10 }
  0x5f   : > { %s6788_s23 = scalar_lea.hbm %s9561_s0, %s6277_s18  ;;  %s6792_s24 = scalar_lea.sflag [#allocation4], %s344_s12 }
  0x60   : > { %s348_s26 = scalar_lea.vmem [#allocation3], %s6276_s28  ;;  %s6449_s10 = scalar_lea.hbm %s6788_s23, 6144 }
  0x61   : > { %s355_s9 = sshll.u32 %s348_s26, 4  ;;  %p6450_p7 = scmp.ne.s32.totalorder %s6788_s23, %s6449_s10  ;;  %s6790_s9 = int_to_ptr.vmem [resolvable:$true] %s355_s9 }
  0x62   : > { %p6451_p9 = pneg %p6781_p11  ;;  %s6454_s29 = scalar_lea.hbm %s9561_s0, 12288 }
  0x63   : > { %p6455_p1 = scmp.lt.u32.totalorder %s6788_s23, %s9561_s0  ;;  %p6456_p2 = scmp.lt.u32.totalorder %s6454_s29, %s6449_s10 }
  0x64   : > { %p6452_p12 = pnand %p6451_p9, %p6450_p7  ;;  %p6458_p8 = scmp.lt.u32.totalorder %s6449_s10, %s6788_s23 }
  0x65   : > { %p6457_p4 = por %p6456_p2, %p6455_p1 }
  0x66   : > { %p6453_p0 = pneg %p6452_p12 }
  0x67   : > { %p6459_p13 = por %p6458_p8, %p6457_p4 }
  0x69   : > { %p6460_p6 = pnand %p6459_p13, %p6453_p0 }
  0x6b   : > { %6463 = shalt.err (!%p6460_p6)
}
  0x6c   : > { %s6464_s12 = scalar_lea.vmem %s6790_s9, 6144  ;;  %s6560_s28 = smov [#allocation3]  }
  0x6d   : > { %p6465_p10 = scmp.ne.s32.totalorder %s6790_s9, %s6464_s12  ;;  %s6469_s26 = sshll.u32 %s6560_s28, 4  ;;  %s6470_s26 = int_to_ptr.vmem [resolvable:$false] %s6469_s26 }
  0x6e   : > { %s6471_s30 = scalar_lea.vmem %s6470_s26, 12288  ;;  %p6472_p12 = scmp.lt.s32.totalorder %s6790_s9, %s6470_s26 }
  0x6f   : > { %p6467_p3 = pnand %p6465_p10, %p6451_p9  ;;  %p6473_p1 = scmp.lt.s32.totalorder %s6471_s30, %s6464_s12 }
  0x71   : > { %p6468_p7 = pneg %p6467_p3  ;;  %p6474_p2 = por %p6473_p1, %p6472_p12 }
  0x73   : > { %p6475_p4 = pnand %p6474_p2, %p6468_p7 }
  0x75   : > { %6478 = shalt.err (!%p6475_p4)
}
  0x76   : > { %s9824_s11 = smov 8   ;;  %s9825_s10 = smov 128  }
  0x77   : > { %6309 = dma.hbm_to_vmem [thread:$0]  (!%p6781_p11), %s6788_s23, 6144, %s6790_s9, %s6792_s24, %s9825_s10, %s9825_s10, %s9824_s11  }
  0x78   : > { %p9826_p9 = scmp.ne.s32.totalorder %s9818_s21, 0 }
  0x7a   : > { %367 = sbr.rel (%p9826_p9) target bundleno = 1334 (0x536), region = 60 }
  0x81   : > { %s6826_s18 = sand.u32 1, %s6545_s14   ;;  %p9827_p0 = scmp.ne.s32.totalorder %s9815_s19, 0 }
  0x82   : > { %s6278_s27 = smul.u32 384, %s6826_s18  ;;  %s370_s29 = scalar_lea.sflag [#allocation4], %s6826_s18 }
  0x84   : > { %s6832_s25 = scalar_lea.vmem [#allocation3], %s6278_s27 }
  0x85   : > { %6524 = dma.done.wait (%p9827_p0), %s370_s29, 6144  }
  0x86   : > { %6526 = vsyncadd (%p9827_p0), %s370_s29, 4294961152  ;;  %p9828_p11 = scmp.eq.s32.totalorder %s6642_s17, 0 }
  0x88   : > { %6528 = dma.done.wait (%p9828_p11), [#allocation7], 20480   ;;  %p9829_p8 = pmov %p9828_p11 }
  0x8a   : > { %6530 = vsyncadd (%p9829_p8), [#allocation7], 4294946816  ;;  %p9830_p13 = pmov %p9829_p8 }
  0x8b   : > { %p9831_p6 = pmov %p9829_p8 }
  0x8c   : > { %6532 = dma.done.wait (%p9830_p13), [#allocation10], 2048  }
  0x8d   : > { %6534 = vsyncadd (%p9831_p6), [#allocation10], 4294965248  ;;  %v470_v0 = vld [vmem:[#allocation6] sm:$0xff]  ;;  %v471_v1 = vld [vmem:[#allocation6 + $0x8] sm:$0xff]  ;;  %v9580_v37 = vmov 0.0|0.0   ;;  %vm1058_vm1 = vcmask 1040384  }
  0x8e   : > { %v472_v2 = vld [vmem:[#allocation6 + $0x10] sm:$0xff]  ;;  %v5956_v3 = vpack.c.bf16 %v471_v1, %v470_v0  ;;  %v473_v4 = vld [vmem:[#allocation6 + $0x18] sm:$0xff]  ;;  %v474_v6 = vld [vmem:[#allocation6 + $0x20] sm:$0xff]  ;;  %vm1203_vm3 = vcmask 1046528   ;;  %s10228_s24 = sld [smem:[#allocation155_spill]]  ;;  %s9327_s12 = scalar_lea.vmem [#allocation11], %s6278_s27 }
  0x8f   : > { %v5960_v5 = vpack.c.bf16 %v473_v4, %v472_v2  ;;  %v475_v7 = vld [vmem:[#allocation6 + $0x28] sm:$0xff]  ;;  %v422_v9 = vld [vmem:[%s6832_s25] sm:$0xff]  ;;  %v476_v10 = vld [vmem:[#allocation6 + $0x30] sm:$0xff]  ;;  %s6279_s27 = smul.u32 6144, %s6642_s17  ;;  %s4764_s28 = sshll.u32 %s9327_s12, 4  ;;  %s9515_s28 = int_to_ptr.vmem [resolvable:$true] %s4764_s28 }
  0x90   : > { %5957 = vmatprep.subr.bf16.mxu0 %v5956_v3  ;;  %6260 = vmatprep.subr.bf16.mxu1 %v5956_v3  ;;  %v5964_v8 = vpack.c.bf16 %v475_v7, %v474_v6  ;;  %v477_v11 = vld [vmem:[#allocation6 + $0x38] sm:$0xff]  ;;  %v478_v13 = vld [vmem:[#allocation6 + $0x40] sm:$0xff]  ;;  %v479_v14 = vld [vmem:[#allocation6 + $0x48] sm:$0xff]  ;;  %s10229_s11 = sld [smem:[#allocation156_spill]]  ;;  %s4751_s17 = scalar_lea.sflag [#allocation5], %s6826_s18 }
  0x91   : > { %5959 = vmatpush3.bf16.msra.mxu0 %v5956_v3  ;;  %6268 = vmatpush3.bf16.msra.mxu1 %v5956_v3  ;;  %v5968_v12 = vpack.c.bf16 %v477_v11, %v476_v10  ;;  %v438_v15 = vld [vmem:[%s6832_s25 + $0x80] sm:$0xff]  ;;  %v5972_v16 = vpack.c.bf16 %v479_v14, %v478_v13  ;;  %v480_v17 = vld [vmem:[#allocation6 + $0x50] sm:$0xff]  ;;  %v481_v18 = vld [vmem:[#allocation6 + $0x58] sm:$0xff]  ;;  %s6563_s29 = smov [#allocation11]  }
  0x92   : > { %5961 = vmatprep.subr.bf16.mxu0 %v5960_v5  ;;  %6261 = vmatprep.subr.bf16.mxu1 %v5960_v5  ;;  %v5976_v19 = vpack.c.bf16 %v481_v18, %v480_v17  ;;  %v482_v20 = vld [vmem:[#allocation6 + $0x60] sm:$0xff]  ;;  %v483_v21 = vld [vmem:[#allocation6 + $0x68] sm:$0xff]  ;;  %v484_v23 = vld [vmem:[#allocation6 + $0x70] sm:$0xff]  ;;  %s6483_s19 = sshll.u32 %s6563_s29, 4  ;;  %s6484_s19 = int_to_ptr.vmem [resolvable:$false] %s6483_s19 }
  0x93   : > { %5468 = vmatprep.mubr.f32.mxu0 %v422_v9  ;;  %5492 = vmatprep.mubr.f32.mxu1 %v438_v15  ;;  %v5980_v22 = vpack.c.bf16 %v483_v21, %v482_v20  ;;  %v485_v24 = vld [vmem:[#allocation6 + $0x78] sm:$0xff]  ;;  %v1901_v26 = vld [vmem:[#allocation8 + $0x280] sm:$0xff]  ;;  %v1902_v27 = vld [vmem:[#allocation8 + $0x288] sm:$0xff]  ;;  %s6485_s21 = scalar_lea.vmem %s6484_s19, 12288  ;;  %p6486_p12 = scmp.lt.s32.totalorder %s9515_s28, %s6484_s19 }
  0x94   : > { %v5984_v25 = vpack.c.bf16 %v485_v24, %v484_v23  ;;  %v6036_v28 = vpack.c.bf16 %v1902_v27, %v1901_v26  ;;  %v1869_v29 = vld [vmem:[#allocation8 + $0x180] sm:$0xff]  ;;  %v1870_v30 = vld [vmem:[#allocation8 + $0x188] sm:$0xff]  ;;  %v1903_v31 = vld [vmem:[#allocation8 + $0x290] sm:$0xff] }
  0x95   : > { %5963 = vmatpush3.bf16.msra.mxu0 %v5960_v5  ;;  %6269 = vmatpush3.bf16.msra.mxu1 %v5960_v5  ;;  %v1904_v32 = vld [vmem:[#allocation8 + $0x298] sm:$0xff]  ;;  %v423_v33 = vld [vmem:[%s6832_s25 + $0x8] sm:$0xff]  ;;  %v424_v35 = vld [vmem:[%s6832_s25 + $0x10] sm:$0xff]  ;;  %v5989_v38 = vpack.c.bf16 %v1870_v30, %v1869_v29 }
  0x96   : > { %5965 = vmatprep.subr.bf16.mxu0 %v5964_v8  ;;  %6262 = vmatprep.subr.bf16.mxu1 %v5964_v8  ;;  %v439_v34 = vld [vmem:[%s6832_s25 + $0x88] sm:$0xff]  ;;  %v440_v36 = vld [vmem:[%s6832_s25 + $0x90] sm:$0xff]  ;;  %v1872_v40 = vld [vmem:[#allocation8 + $0x198] sm:$0xff]  ;;  %v6040_v41 = vpack.c.bf16 %v1904_v32, %v1903_v31  ;;  %s9513_s10 = scalar_lea.hbm %s10229_s11, %s6279_s27 }
  0x97   : > { %v1871_v39 = vld [vmem:[#allocation8 + $0x190] sm:$0xff]  ;;  %v1905_v42 = vld [vmem:[#allocation8 + $0x2a0] sm:$0xff]  ;;  %v1906_v43 = vld [vmem:[#allocation8 + $0x2a8] sm:$0xff] }
  0x98   : > { %v425_v44 = vld [vmem:[%s6832_s25 + $0x18] sm:$0xff]  ;;  %v426_v46 = vld [vmem:[%s6832_s25 + $0x20] sm:$0xff]  ;;  %v5992_v48 = vpack.c.bf16 %v1872_v40, %v1871_v39  ;;  %v1874_v50 = vld [vmem:[#allocation8 + $0x1a8] sm:$0xff]  ;;  %v6044_v51 = vpack.c.bf16 %v1906_v43, %v1905_v42 }
  0x99   : > { %5967 = vmatpush3.bf16.msra.mxu0 %v5964_v8  ;;  %6270 = vmatpush3.bf16.msra.mxu1 %v5964_v8  ;;  %v441_v45 = vld [vmem:[%s6832_s25 + $0x98] sm:$0xff]  ;;  %v442_v47 = vld [vmem:[%s6832_s25 + $0xa0] sm:$0xff]  ;;  %v1907_v52 = vld [vmem:[#allocation8 + $0x2b0] sm:$0xff] }
  0x9a   : > { %5969 = vmatprep.subr.bf16.mxu0 %v5968_v12  ;;  %6263 = vmatprep.subr.bf16.mxu1 %v5968_v12  ;;  %v1873_v49 = vld [vmem:[#allocation8 + $0x1a0] sm:$0xff]  ;;  %v1908_v53 = vld [vmem:[#allocation8 + $0x2b8] sm:$0xff]  ;;  %v427_v54 = vld [vmem:[%s6832_s25 + $0x28] sm:$0xff] }
  0x9b   : > { %v443_v55 = vld [vmem:[%s6832_s25 + $0xa8] sm:$0xff]  ;;  %v428_v56 = vld [vmem:[%s6832_s25 + $0x30] sm:$0xff]  ;;  %v5995_v58 = vpack.c.bf16 %v1874_v50, %v1873_v49  ;;  %v1876_v60 = vld [vmem:[#allocation8 + $0x1b8] sm:$0xff]  ;;  %v6048_v61 = vpack.c.bf16 %v1908_v53, %v1907_v52 }
  0x9c   : > { %v444_v57 = vld [vmem:[%s6832_s25 + $0xb0] sm:$0xff]  ;;  %v429_v62 = vld [vmem:[%s6832_s25 + $0x38] sm:$0xff]  ;;  %v430_v0 = vld [vmem:[%s6832_s25 + $0x40] sm:$0xff] }
  0x9d   : > { %5971 = vmatpush3.bf16.msra.mxu0 %v5968_v12  ;;  %6271 = vmatpush3.bf16.msra.mxu1 %v5968_v12  ;;  %v1875_v59 = vld [vmem:[#allocation8 + $0x1b0] sm:$0xff]  ;;  %v445_v63 = vld [vmem:[%s6832_s25 + $0xb8] sm:$0xff]  ;;  %v446_v1 = vld [vmem:[%s6832_s25 + $0xc0] sm:$0xff] }
  0x9e   : > { %5973 = vmatprep.subr.bf16.mxu0 %v5972_v16  ;;  %6264 = vmatprep.subr.bf16.mxu1 %v5972_v16  ;;  %v5998_v2 = vpack.c.bf16 %v1876_v60, %v1875_v59  ;;  %v1877_v3 = vld [vmem:[#allocation8 + $0x1c0] sm:$0xff]  ;;  %v1878_v4 = vld [vmem:[#allocation8 + $0x1c8] sm:$0xff]  ;;  %v432_v7 = vld [vmem:[%s6832_s25 + $0x50] sm:$0xff] }
  0x9f   : > { %v431_v5 = vld [vmem:[%s6832_s25 + $0x48] sm:$0xff]  ;;  %v448_v8 = vld [vmem:[%s6832_s25 + $0xd0] sm:$0xff]  ;;  %v6001_v9 = vpack.c.bf16 %v1878_v4, %v1877_v3  ;;  %v1880_v11 = vld [vmem:[#allocation8 + $0x1d8] sm:$0xff] }
  0xa0   : > { %v447_v6 = vld [vmem:[%s6832_s25 + $0xc8] sm:$0xff]  ;;  %v1879_v10 = vld [vmem:[#allocation8 + $0x1d0] sm:$0xff]  ;;  %v433_v12 = vld [vmem:[%s6832_s25 + $0x58] sm:$0xff] }
  0xa1   : > { %5975 = vmatpush3.bf16.msra.mxu0 %v5972_v16  ;;  %6272 = vmatpush3.bf16.msra.mxu1 %v5972_v16  ;;  %v449_v13 = vld [vmem:[%s6832_s25 + $0xd8] sm:$0xff]  ;;  %v434_v14 = vld [vmem:[%s6832_s25 + $0x60] sm:$0xff]  ;;  %v6004_v16 = vpack.c.bf16 %v1880_v11, %v1879_v10  ;;  %v1882_v18 = vld [vmem:[#allocation8 + $0x1e8] sm:$0xff] }
  0xa2   : > { %5977 = vmatprep.subr.bf16.mxu0 %v5976_v19  ;;  %6265 = vmatprep.subr.bf16.mxu1 %v5976_v19  ;;  %v450_v15 = vld [vmem:[%s6832_s25 + $0xe0] sm:$0xff]  ;;  %v451_v20 = vld [vmem:[%s6832_s25 + $0xe8] sm:$0xff]  ;;  %v436_v21 = vld [vmem:[%s6832_s25 + $0x70] sm:$0xff] }
  0xa3   : > { %v1881_v17 = vld [vmem:[#allocation8 + $0x1e0] sm:$0xff]  ;;  %v1883_v24 = vld [vmem:[#allocation8 + $0x1f0] sm:$0xff]  ;;  %v437_v26 = vld [vmem:[%s6832_s25 + $0x78] sm:$0xff] }
  0xa4   : > { %v6007_v23 = vpack.c.bf16 %v1882_v18, %v1881_v17  ;;  %v453_v27 = vld [vmem:[%s6832_s25 + $0xf8] sm:$0xff]  ;;  %v1885_v30 = vld [vmem:[#allocation8 + $0x200] sm:$0xff]  ;;  %v1886_v31 = vld [vmem:[#allocation8 + $0x208] sm:$0xff] }
  0xa5   : > { %5979 = vmatpush3.bf16.msra.mxu0 %v5976_v19  ;;  %6273 = vmatpush3.bf16.msra.mxu1 %v5976_v19  ;;  %v435_v19 = vld [vmem:[%s6832_s25 + $0x68] sm:$0xff]  ;;  %v458_v39 = vld [vmem:[%s6832_s25 + $0x120] sm:$0xff]  ;;  %v1900_v10 = vld [vmem:[#allocation8 + $0x278] sm:$0xff] }
  0xa6   : > { %5981 = vmatprep.subr.bf16.mxu0 %v5980_v22  ;;  %6266 = vmatprep.subr.bf16.mxu1 %v5980_v22  ;;  %v455_v32 = vld [vmem:[%s6832_s25 + $0x108] sm:$0xff]  ;;  %v462_v49 = vld [vmem:[%s6832_s25 + $0x140] sm:$0xff]  ;;  %vm6968_vm4 = vmneg %vm1058_vm1 }
  0xa7   : > { %v1890_v42 = vld [vmem:[#allocation8 + $0x228] sm:$0xff]  ;;  %v466_v59 = vld [vmem:[%s6832_s25 + $0x160] sm:$0xff] }
  0xa8   : > { %v459_v43 = vld [vmem:[%s6832_s25 + $0x128] sm:$0xff]  ;;  %v1897_v3 = vld [vmem:[#allocation8 + $0x260] sm:$0xff] }
  0xa9   : > { %5983 = vmatpush3.bf16.msra.mxu0 %v5980_v22  ;;  %6274 = vmatpush3.bf16.msra.mxu1 %v5980_v22  ;;  %v452_v22 = vld [vmem:[%s6832_s25 + $0xf0] sm:$0xff]  ;;  %v1894_v52 = vld [vmem:[#allocation8 + $0x248] sm:$0xff]  ;;  %v1913_v11 = vld [vmem:[#allocation8 + $0x2e0] sm:$0xff] }
  0xaa   : > { %5985 = vmatprep.subr.bf16.mxu0 %v5984_v25  ;;  %6267 = vmatprep.subr.bf16.mxu1 %v5984_v25  ;;  %v463_v53 = vld [vmem:[%s6832_s25 + $0x148] sm:$0xff]  ;;  %v1708_v18 = vld [vmem:[#allocation8 + $0x100] sm:$0xff] }
  0xab   : > { %v1898_v4 = vld [vmem:[#allocation8 + $0x268] sm:$0xff] }
  0xad   : > { %5987 = vmatpush3.bf16.msra.mxu0 %v5984_v25  ;;  %6275 = vmatpush3.bf16.msra.mxu1 %v5984_v25  ;;  %v1884_v25 = vld [vmem:[#allocation8 + $0x1f8] sm:$0xff] }
  0xae   : > { %5988 = vmatprep.subr.bf16.mxu1 %v9580_v37  ;;  %6037 = vmatprep.subr.bf16.mxu0 %v6036_v28  ;;  %v6010_v29 = vpack.c.bf16 %v1884_v25, %v1883_v24  ;;  %v6922_v24 = vld [vmem:[%s9564_s3] ss:$0 sm:$0xff] }
  0xb0   : > { %5469 = vmatmul.mubr.f32.vlgmr.msra.gmra.mrb[0].mxu0 %v423_v33  ;;  %5493 = vmatmul.mubr.f32.vlgmr.msra.gmra.mrb[0].mxu1 %v439_v34  ;;  %v456_v33 = vld [vmem:[%s6832_s25 + $0x110] sm:$0xff]  ;;  %v6013_v34 = vpack.c.bf16 %v1886_v31, %v1885_v30 }
  0xb1   : > { %5471 = vmatprep.mubr.f32.mxu0 %v424_v35  ;;  %5495 = vmatprep.mubr.f32.mxu1 %v440_v36  ;;  %v1887_v35 = vld [vmem:[#allocation8 + $0x210] sm:$0xff]  ;;  %v1888_v36 = vld [vmem:[#allocation8 + $0x218] sm:$0xff] }
  0xb2   : > { %5990 = vmatpush1.bf16.msra.mxu1 %v5989_v38  ;;  %6039 = vmatpush3.bf16.msra.mxu0 %v6036_v28  ;;  %v454_v28 = vld [vmem:[%s6832_s25 + $0x100] sm:$0xff]  ;;  %v457_v38 = vld [vmem:[%s6832_s25 + $0x118] sm:$0xff]  ;;  %v6016_v40 = vpack.c.bf16 %v1888_v36, %v1887_v35 }
  0xb3   : > { %5991 = vmatprep.subr.bf16.mxu1 %v9580_v37  ;;  %6041 = vmatprep.subr.bf16.mxu0 %v6040_v41 }
  0xb4   : > { %5472 = vmatmul.mubr.f32.gmra.mrb[2].mxu0 %v425_v44  ;;  %5496 = vmatmul.mubr.f32.gmra.mrb[2].mxu1 %v441_v45  ;;  %v460_v44 = vld [vmem:[%s6832_s25 + $0x130] sm:$0xff] }
  0xb5   : > { %5474 = vmatprep.mubr.f32.mxu0 %v426_v46  ;;  %5498 = vmatprep.mubr.f32.mxu1 %v442_v47  ;;  %v1891_v46 = vld [vmem:[#allocation8 + $0x230] sm:$0xff]  ;;  %v1892_v47 = vld [vmem:[#allocation8 + $0x238] sm:$0xff] }
  0xb6   : > { %5993 = vmatpush1.bf16.msra.mxu1 %v5992_v48  ;;  %6043 = vmatpush3.bf16.msra.mxu0 %v6040_v41  ;;  %v1889_v41 = vld [vmem:[#allocation8 + $0x220] sm:$0xff]  ;;  %v461_v48 = vld [vmem:[%s6832_s25 + $0x138] sm:$0xff]  ;;  %v6022_v50 = vpack.c.bf16 %v1892_v47, %v1891_v46  ;;  %v6950_v46 = vld [vmem:[#allocation8 + $0x8] sm:$0xff] }
  0xb7   : > { %5994 = vmatprep.subr.bf16.mxu1 %v9580_v37  ;;  %6045 = vmatprep.subr.bf16.mxu0 %v6044_v51  ;;  %v6019_v45 = vpack.c.bf16 %v1890_v42, %v1889_v41  ;;  %v1711_v41 = vld [vmem:[#allocation8 + $0x118] sm:$0xff] }
  0xb8   : > { %5475 = vmatmul.mubr.f32.gmra.mrb[4].mxu0 %v427_v54  ;;  %5499 = vmatmul.mubr.f32.gmra.mrb[4].mxu1 %v443_v55  ;;  %v464_v54 = vld [vmem:[%s6832_s25 + $0x150] sm:$0xff] }
  0xb9   : > { %5477 = vmatprep.mubr.f32.mxu0 %v428_v56  ;;  %5501 = vmatprep.mubr.f32.mxu1 %v444_v57  ;;  %v1895_v56 = vld [vmem:[#allocation8 + $0x250] sm:$0xff]  ;;  %v1896_v57 = vld [vmem:[#allocation8 + $0x258] sm:$0xff] }
  0xba   : > { %5996 = vmatpush1.bf16.msra.mxu1 %v5995_v58  ;;  %6047 = vmatpush3.bf16.msra.mxu0 %v6044_v51  ;;  %v1893_v51 = vld [vmem:[#allocation8 + $0x240] sm:$0xff]  ;;  %v465_v58 = vld [vmem:[%s6832_s25 + $0x158] sm:$0xff]  ;;  %v6028_v60 = vpack.c.bf16 %v1896_v57, %v1895_v56 }
  0xbb   : > { %5997 = vmatprep.subr.bf16.mxu1 %v9580_v37  ;;  %6049 = vmatprep.subr.bf16.mxu0 %v6048_v61  ;;  %v6025_v55 = vpack.c.bf16 %v1894_v52, %v1893_v51 }
  0xbc   : > { %5478 = vmatmul.mubr.f32.gmra.mrb[6].mxu0 %v429_v62  ;;  %5502 = vmatmul.mubr.f32.gmra.mrb[6].mxu1 %v445_v63  ;;  %v468_v62 = vld [vmem:[%s6832_s25 + $0x170] sm:$0xff]  ;;  %v469_v63 = vld [vmem:[%s6832_s25 + $0x178] sm:$0xff] }
  0xbd   : > { %5480 = vmatprep.mubr.f32.mxu0 %v430_v0  ;;  %5504 = vmatprep.mubr.f32.mxu1 %v446_v1  ;;  %v1909_v0 = vld [vmem:[#allocation8 + $0x2c0] sm:$0xff]  ;;  %v1910_v1 = vld [vmem:[#allocation8 + $0x2c8] sm:$0xff] }
  0xbe   : > { %5999 = vmatpush1.bf16.msra.mxu1 %v5998_v2  ;;  %6051 = vmatpush3.bf16.msra.mxu0 %v6048_v61  ;;  %v467_v61 = vld [vmem:[%s6832_s25 + $0x168] sm:$0xff]  ;;  %v6052_v2 = vpack.c.bf16 %v1910_v1, %v1909_v0 }
  0xbf   : > { %6000 = vmatprep.subr.bf16.mxu1 %v9580_v37 }
  0xc0   : > { %5481 = vmatmul.mubr.f32.gmra.mrb[8].mxu0 %v431_v5  ;;  %5505 = vmatmul.mubr.f32.gmra.mrb[8].mxu1 %v447_v6  ;;  %v6031_v5 = vpack.c.bf16 %v1898_v4, %v1897_v3  ;;  %v1911_v6 = vld [vmem:[#allocation8 + $0x2d0] sm:$0xff] }
  0xc1   : > { %5483 = vmatprep.mubr.f32.mxu0 %v432_v7  ;;  %5507 = vmatprep.mubr.f32.mxu1 %v448_v8  ;;  %v1912_v7 = vld [vmem:[#allocation8 + $0x2d8] sm:$0xff] }
  0xc2   : > { %6002 = vmatpush1.bf16.msra.mxu1 %v6001_v9  ;;  %6053 = vmatprep.subr.bf16.mxu0 %v6052_v2  ;;  %v6056_v8 = vpack.c.bf16 %v1912_v7, %v1911_v6  ;;  %v1899_v9 = vld [vmem:[#allocation8 + $0x270] sm:$0xff] }
  0xc3   : > { %6003 = vmatprep.subr.bf16.mxu1 %v9580_v37  ;;  %6055 = vmatpush3.bf16.msra.mxu0 %v6052_v2  ;;  %v1713_v2 = vld [vmem:[#allocation8 + $0x128] sm:$0xff] }
  0xc4   : > { %5484 = vmatmul.mubr.f32.gmra.mrb[10].mxu0 %v433_v12  ;;  %5508 = vmatmul.mubr.f32.gmra.mrb[10].mxu1 %v449_v13  ;;  %v6034_v12 = vpack.c.bf16 %v1900_v10, %v1899_v9  ;;  %v1914_v13 = vld [vmem:[#allocation8 + $0x2e8] sm:$0xff] }
  0xc5   : > { %5486 = vmatprep.mubr.f32.mxu0 %v434_v14  ;;  %5510 = vmatprep.mubr.f32.mxu1 %v450_v15  ;;  %v6060_v14 = vpack.c.bf16 %v1914_v13, %v1913_v11  ;;  %v1915_v15 = vld [vmem:[#allocation8 + $0x2f0] sm:$0xff] }
  0xc6   : > { %6005 = vmatpush1.bf16.msra.mxu1 %v6004_v16  ;;  %6057 = vmatprep.subr.bf16.mxu0 %v6056_v8  ;;  %v1916_v16 = vld [vmem:[#allocation8 + $0x2f8] sm:$0xff] }
  0xc7   : > { %6006 = vmatprep.subr.bf16.mxu1 %v9580_v37  ;;  %6059 = vmatpush3.bf16.msra.mxu0 %v6056_v8  ;;  %v6064_v17 = vpack.c.bf16 %v1916_v16, %v1915_v15 }
  0xc8   : > { %5487 = vmatmul.mubr.f32.gmra.mrb[12].mxu0 %v435_v19  ;;  %5511 = vmatmul.mubr.f32.gmra.mrb[12].mxu1 %v451_v20  ;;  %v1709_v19 = vld [vmem:[#allocation8 + $0x108] sm:$0xff] }
  0xc9   : > { %5489 = vmatprep.mubr.f32.mxu0 %v436_v21  ;;  %5513 = vmatprep.mubr.f32.mxu1 %v452_v22  ;;  %v6910_v20 = vpack.c.bf16 %v1709_v19, %v1708_v18  ;;  %v949_v21 = vlaneseq  ;;  %v6917_v22 = vld [vmem:[%s9563_s2] ss:$0 sm:$0xff]  ;;  %v7020_v18 = vld [vmem:[#allocation8 + $0x38] sm:$0xff] }
  0xca   : > { %6008 = vmatpush1.bf16.msra.mxu1 %v6007_v23  ;;  %6061 = vmatprep.subr.bf16.mxu0 %v6060_v14 }
  0xcb   : > { %6009 = vmatprep.subr.bf16.mxu1 %v9580_v37  ;;  %6063 = vmatpush3.bf16.msra.mxu0 %v6060_v14  ;;  %v6924_v25 = vshrl.u32 %v949_v21, 7 }
  0xcc   : > { %5490 = vmatmul.mubr.f32.gmra.mrb[14].mxu0 %v437_v26  ;;  %5514 = vmatmul.mubr.f32.gmra.mrb[14].mxu1 %v453_v27 }
  0xcd   : > { %5516 = vmatprep.mubr.f32.mxu1 %v454_v28  ;;  %6065 = vmatprep.subr.bf16.mxu0 %v6064_v17  ;;  %vm953_vm0 = vcmp.ge.s32.totalorder %v6924_v25, 1 }
  0xce   : > { %6011 = vmatpush1.bf16.msra.mxu1 %v6010_v29 }
  0xcf   : > { %6012 = vmatprep.subr.bf16.mxu1 %v9580_v37  ;;  %6067 = vmatpush3.bf16.msra.mxu0 %v6064_v17  ;;  %v7018_v17 = vld [vmem:[#allocation8 + $0x30] sm:$0xff] }
  0xd0   : > { %5517 = vmatmul.mubr.f32.gmra.mrb[16].mxu1 %v455_v32  ;;  %6068 = vmatprep.subr.bf16.mxu0 %v9580_v37  ;;  %v6934_v32 = vadd.s32 16, %v6924_v25 }
  0xd1   : > { %5519 = vmatprep.mubr.f32.mxu1 %v456_v33 }
  0xd2   : > { %6014 = vmatpush1.bf16.msra.mxu1 %v6013_v34  ;;  %vm958_vm2 = vcmp.le.s32.totalorder %v6934_v32, 16 }
  0xd3   : > { %6015 = vmatprep.subr.bf16.mxu1 %v9580_v37 }
  0xd4   : > { %5520 = vmatmul.mubr.f32.gmra.mrb[18].mxu1 %v457_v38 }
  0xd5   : > { %5522 = vmatprep.mubr.f32.mxu1 %v458_v39 }
  0xd6   : > { %6017 = vmatpush1.bf16.msra.mxu1 %v6016_v40  ;;  %v1710_v40 = vld [vmem:[#allocation8 + $0x110] sm:$0xff] }
  0xd7   : > { %6018 = vmatprep.subr.bf16.mxu1 %v9580_v37  ;;  %v6973_v56 = vpack.c.bf16 %v1711_v41, %v1710_v40 }
  0xd8   : > { %5523 = vmatmul.mubr.f32.gmra.mrb[20].mxu1 %v459_v43 }
  0xd9   : > { %5525 = vmatprep.mubr.f32.mxu1 %v460_v44 }
  0xda   : > { %6020 = vmatpush1.bf16.msra.mxu1 %v6019_v45  ;;  %v6948_v45 = vld [vmem:[#allocation8] sm:$0xff] }
  0xdb   : > { %6021 = vmatprep.subr.bf16.mxu1 %v9580_v37 }
  0xdc   : > { %5526 = vmatmul.mubr.f32.gmra.mrb[22].mxu1 %v461_v48  ;;  %v6954_v48 = vld [vmem:[#allocation8 + $0x10] sm:$0xff] }
  0xdd   : > { %5528 = vmatprep.mubr.f32.mxu1 %v462_v49  ;;  %v6956_v49 = vld [vmem:[#allocation8 + $0x18] sm:$0xff] }
  0xde   : > { %6023 = vmatpush1.bf16.msra.mxu1 %v6022_v50  ;;  %v6958_v50 = vld [vmem:[#allocation8 + $0x20] sm:$0xff] }
  0xdf   : > { %6024 = vmatprep.subr.bf16.mxu1 %v9580_v37 }
  0xe0   : > { %5529 = vmatmul.mubr.f32.gmra.mrb[24].mxu1 %v463_v53 }
  0xe1   : > { %5531 = vmatprep.mubr.f32.mxu1 %v464_v54 }
  0xe2   : > { %6026 = vmatpush1.bf16.msra.mxu1 %v6025_v55 }
  0xe3   : > { %6027 = vmatprep.subr.bf16.mxu1 %v9580_v37 }
  0xe4   : > { %5532 = vmatmul.mubr.f32.gmra.mrb[26].mxu1 %v465_v58  ;;  %v6977_v58 = vld [vmem:[#allocation8 + $0x28] sm:$0xff] }
  0xe5   : > { %5534 = vmatprep.mubr.f32.mxu1 %v466_v59  ;;  %v1712_v59 = vld [vmem:[#allocation8 + $0x120] sm:$0xff] }
  0xe6   : > { %6029 = vmatpush1.bf16.msra.mxu1 %v6028_v60  ;;  %v7016_v16 = vpack.c.bf16 %v1713_v2, %v1712_v59 }
  0xe7   : > { %6030 = vmatprep.subr.bf16.mxu1 %v9580_v37 }
  0xe8   : > { %5535 = vmatmul.mubr.f32.gmra.mrb[28].mxu1 %v467_v61 }
  0xe9   : > { %5537 = vmatprep.mubr.f32.mxu1 %v468_v62 }
  0xea   : > { %6032 = vmatpush1.bf16.msra.mxu1 %v6031_v5  ;;  %v6069_v5 = vpack.c.bf16 %v6950_v46, %v6948_v45  ;;  %v7052_v46 = vld [vmem:[#allocation8 + $0x40] sm:$0xff] }
  0xeb   : > { %6033 = vmatprep.subr.bf16.mxu1 %v9580_v37 }
  0xec   : > { %5538 = vmatmul.mubr.f32.gmra.mrb[30].mxu1 %v469_v63 }
  0xee   : > { %6035 = vmatpush1.bf16.msra.mxu1 %v6034_v12 }
  0xef   : > { %6117 = vmatprep.subr.bf16.mxu1 %v6910_v20 }
 0x183   : > { %v5470_v23 = vpop.f32.mrb[0].mxu0  ;;  %v6926_v26 = vpop.f32.mrb[0].mxu1 }
 0x184   : > { %v799_v27 = vmul.f32 %v5470_v23, %v6917_v22  ;;  %v552_v28 = vpop.f32.mrb[1].mxu0  ;;  %v6929_v29 = vpop.f32.mrb[1].mxu1  ;;  %v815_v59 = vmul.f32 %v6926_v26, %v6917_v22 }
 0x185   : > { %v798_v30 = vmul.f32 %v6917_v22, %v552_v28 }
 0x186   : > { %v854_v31 = vadd.f32 %v6922_v24, %v799_v27 }
 0x187   : > { %v853_v33 = vadd.f32 %v6922_v24, %v798_v30  ;;  %v5473_v34 = vpop.f32.mrb[2].mxu0  ;;  %v6938_v35 = vpop.f32.mrb[2].mxu1 }
 0x188   : > { %v6940_v36 = vmax.f32 %v854_v31, 0.0  ;;  %v801_v38 = vmul.f32 %v5473_v34, %v6917_v22  ;;  %v562_v39 = vpop.f32.mrb[3].mxu0  ;;  %v6943_v42 = vpop.f32.mrb[3].mxu1 }
 0x189   : > { %v6945_v43 = vmax.f32 %v853_v33, 0.0  ;;  %v800_v44 = vmul.f32 %v6917_v22, %v562_v39  ;;  %v1715_v39 = vld [vmem:[#allocation8 + $0x138] sm:$0xff] }
 0x18a   : > { %9832 = vst [vmem:[#allocation18_spill] sm:$0xff] %v6940_v36  ;;  %v856_v47 = vadd.f32 %v6922_v24, %v801_v38  ;;  %v1205_v55 = vrot.slane %v6940_v36, 1  ;;  %v1060_v14 = vrot.slane %v6940_v36, 7  ;;  %v1714_v38 = vld [vmem:[#allocation8 + $0x130] sm:$0xff] }
 0x18b   : > { %9833 = vst [vmem:[#allocation19_spill] sm:$0xff] %v6945_v43  ;;  %v962_v51 = vsel %vm953_vm0, %v6945_v43, 0.0  ;;  %v855_v52 = vadd.f32 %v6922_v24, %v800_v44  ;;  %v5476_v53 = vpop.f32.mrb[4].mxu0  ;;  %4886 = vmatprep.mubr.msk.f32.mxu1 %vm953_vm0, %v6945_v43  ;;  %v6975_v57 = vpop.f32.mrb[4].mxu1 }
 0x18c   : > { %v6979_v60 = vrot.slane %v962_v51, 7  ;;  %v6981_v61 = vmax.f32 %v856_v47, 0.0  ;;  %v803_v62 = vmul.f32 %v5476_v53, %v6917_v22  ;;  %v572_v63 = vpop.f32.mrb[5].mxu0  ;;  %v1204_v0 = vrot.slane %v962_v51, 1  ;;  %v6984_v1 = vpop.f32.mrb[5].mxu1  ;;  %v7054_v47 = vld [vmem:[#allocation8 + $0x48] sm:$0xff] }
 0x18d   : > { %v6986_v3 = vmax.f32 %v855_v52, 0.0  ;;  %v802_v4 = vmul.f32 %v6917_v22, %v572_v63  ;;  %v7069_v63 = vld [vmem:[#allocation8 + $0x50] sm:$0xff] }
 0x18e   : > { %9836 = vst [vmem:[#allocation20_spill] sm:$0xff] %v6979_v60  ;;  %9837 = vst [vmem:[#allocation21_spill] sm:$0xff] %v6981_v61  ;;  %v858_v7 = vadd.f32 %v6922_v24, %v803_v62  ;;  %4888 = vmatmul.mubr.msk.f32.vlgmr.msra.gmra.mrb[32].mxu1 %vm6968_vm4, %v6979_v60  ;;  %v6998_v8 = vsel %vm1203_vm3, %v1204_v0, %v1205_v55  ;;  %v7003_v9 = vsel %vm953_vm0, %v6981_v61, 0.0  ;;  %v7071_v0 = vld [vmem:[#allocation8 + $0x58] sm:$0xff] }
 0x18f   : > { %9838 = vst [vmem:[#allocation22_spill] sm:$0xff] %v6986_v3  ;;  %9839 = vst [vmem:[#allocation23_spill] sm:$0xff] %v6998_v8  ;;  %v964_v11 = vsel %vm958_vm2, %v6986_v3, 0.0  ;;  %v857_v12 = vadd.f32 %v6922_v24, %v802_v4  ;;  %6119 = vmatpush3.bf16.msra.mxu1 %v6910_v20  ;;  %1986 = vmatprep.mubr.f32.mxu1 %v6940_v36  ;;  %v5479_v13 = vpop.f32.mrb[6].mxu0  ;;  %v7014_v15 = vpop.f32.mrb[6].mxu1  ;;  %v7036_v33 = vsel %vm1058_vm1, %v6979_v60, %v1060_v14 }
 0x190   : > { %v7022_v19 = vrot.slane %v964_v11, 1  ;;  %v7024_v21 = vmax.f32 %v858_v7, 0.0  ;;  %5572 = vmatprep.mubr.f32.mxu0 %v6998_v8  ;;  %v805_v20 = vmul.f32 %v5479_v13, %v6917_v22  ;;  %v582_v23 = vpop.f32.mrb[7].mxu0  ;;  %v1062_v27 = vrot.slane %v964_v11, 7  ;;  %6121 = vmatprep.subr.bf16.mxu1 %v6973_v56  ;;  %v7029_v28 = vpop.f32.mrb[7].mxu1  ;;  %9843 = vst [vmem:[#allocation27_spill] sm:$0xff] %v7036_v33 }
 0x191   : > { %v7031_v30 = vmax.f32 %v857_v12, 0.0  ;;  %v804_v31 = vmul.f32 %v6917_v22, %v582_v23  ;;  %v1209_v34 = vrot.slane %v7003_v9, 1  ;;  %v6128_v12 = vpack.c.bf16 %v1715_v39, %v1714_v38  ;;  %v1716_v38 = vld [vmem:[#allocation8 + $0x140] sm:$0xff]  ;;  %v1717_v39 = vld [vmem:[#allocation8 + $0x148] sm:$0xff] }
 0x192   : > { %9840 = vst [vmem:[#allocation24_spill] sm:$0xff] %v7022_v19  ;;  %9841 = vst [vmem:[#allocation25_spill] sm:$0xff] %v7024_v21  ;;  %v860_v40 = vadd.f32 %v6922_v24, %v805_v20  ;;  %1987 = vmatmul.mubr.f32.gmra.mrb[34].mxu1 %v7036_v33  ;;  %v7043_v41 = vsel %vm1203_vm3, %v1205_v55, %v7022_v19  ;;  %v7048_v44 = vsel %vm958_vm2, %v7024_v21, 0.0  ;;  %v7122_v10 = vrot.slane %v7003_v9, 7  ;;  %v1697_v33 = vld [vmem:[#allocation8 + $0xa8] sm:$0xff] }
 0x193   : > { %9842 = vst [vmem:[#allocation26_spill] sm:$0xff] %v7031_v30  ;;  %9844 = vst [vmem:[#allocation28_spill] sm:$0xff] %v7043_v41  ;;  %v859_v51 = vadd.f32 %v6922_v24, %v804_v31  ;;  %v5482_v52 = vpop.f32.mrb[8].mxu0  ;;  %4889 = vmatprep.mubr.msk.f32.mxu1 %vm958_vm2, %v6986_v3  ;;  %5573 = vmatmul.mubr.f32.vlgmr.msra.gmra.mrb[16].mxu0 %v7043_v41  ;;  %v1210_v53 = vrot.slane %v7031_v30, 1  ;;  %v7063_v55 = vrot.slane %v7048_v44, 1  ;;  %v7067_v62 = vpop.f32.mrb[8].mxu1 }
 0x194   : > { %v7073_v2 = vmax.f32 %v860_v40, 0.0  ;;  %v807_v4 = vmul.f32 %v5482_v52, %v6917_v22  ;;  %v592_v7 = vpop.f32.mrb[9].mxu0  ;;  %5575 = vmatprep.mubr.msk.f32.mxu0 %vm1203_vm3, %v7022_v19  ;;  %v7079_v11 = vsel %vm1058_vm1, %v1060_v14, %v1062_v27  ;;  %6123 = vmatpush3.bf16.msra.mxu1 %v6973_v56  ;;  %v7082_v26 = vpop.f32.mrb[9].mxu1  ;;  %v870_v52 = vadd.f32 %v6922_v24, %v815_v59 }
 0x195   : > { %9845 = vst [vmem:[#allocation29_spill] sm:$0xff] %v7063_v55  ;;  %9847 = vst [vmem:[#allocation31_spill] sm:$0xff] %v7079_v11  ;;  %v7084_v13 = vmax.f32 %v859_v51, 0.0  ;;  %v806_v20 = vmul.f32 %v6917_v22, %v592_v7  ;;  %v7088_v23 = vsel %vm1203_vm3, %v1209_v34, %v1210_v53  ;;  %v7092_v31 = vsel %vm1203_vm3, %v1210_v53, %v7063_v55  ;;  %v1718_v7 = vld [vmem:[#allocation8 + $0x150] sm:$0xff] }
 0x196   : > { %9846 = vst [vmem:[#allocation30_spill] sm:$0xff] %v7073_v2  ;;  %9849 = vst [vmem:[#allocation33_spill] sm:$0xff] %v7088_v23  ;;  %6070 = vmatpush1.bf16.msra.mxu0 %v6069_v5  ;;  %6125 = vmatprep.subr.bf16.mxu1 %v7016_v16  ;;  %v862_v14 = vadd.f32 %v6922_v24, %v807_v4  ;;  %v1215_v56 = vrot.slane %v7073_v2, 1  ;;  %v814_v53 = vmul.f32 %v6917_v22, %v6929_v29 }
 0x197   : > { %9848 = vst [vmem:[#allocation32_spill] sm:$0xff] %v7084_v13  ;;  %9850 = vst [vmem:[#allocation34_spill] sm:$0xff] %v7092_v31  ;;  %1992 = vmatmul.mubr.f32.gmra.mrb[36].mxu1 %v7079_v11  ;;  %6071 = vmatprep.subr.bf16.mxu0 %v9580_v37  ;;  %v861_v5 = vadd.f32 %v6922_v24, %v806_v20  ;;  %v5485_v40 = vpop.f32.mrb[10].mxu0  ;;  %v7111_v51 = vsel %vm953_vm0, %v7084_v13, 0.0  ;;  %v7116_v4 = vpop.f32.mrb[10].mxu1  ;;  %v1719_v20 = vld [vmem:[#allocation8 + $0x158] sm:$0xff]  ;;  %v6132_v9 = vpack.c.bf16 %v1717_v39, %v1716_v38 }
 0x198   : > { %4890 = vmatprep.mubr.msk.f32.mxu1 %vm953_vm0, %v6981_v61  ;;  %5576 = vmatmul.mubr.f32.gmra.mrb[18].mxu0 %v7088_v23  ;;  %v7118_v34 = vmax.f32 %v862_v14, 0.0  ;;  %v809_v27 = vmul.f32 %v5485_v40, %v6917_v22  ;;  %v602_v45 = vpop.f32.mrb[11].mxu0  ;;  %9852 = vst [vmem:[#allocation36_spill] sm:$0xff] %v7122_v10  ;;  %v1214_v37 = vrot.slane %v7111_v51, 1  ;;  %v7126_v59 = vpop.f32.mrb[11].mxu1  ;;  %v1065_v14 = vrot.slane %v7031_v30, 7 }
 0x199   : > { %5578 = vmatprep.mubr.f32.mxu0 %v7092_v31  ;;  %6127 = vmatpush3.bf16.msra.mxu1 %v7016_v16  ;;  %v7129_v29 = vmax.f32 %v861_v5, 0.0  ;;  %v808_v6 = vmul.f32 %v6917_v22, %v602_v45  ;;  %v9854_v40 = vpack.c.bf16 %v6956_v49, %v6954_v48  ;;  %v9856_v5 = vmov 0.0|0.0  }
 0x19a   : > { %9851 = vst [vmem:[#allocation35_spill] sm:$0xff] %v7118_v34  ;;  %6129 = vmatprep.subr.bf16.mxu1 %v6128_v12  ;;  %v864_v31 = vadd.f32 %v6922_v24, %v809_v27  ;;  %v7141_v16 = vsel %vm1203_vm3, %v1214_v37, %v1215_v56  ;;  %v7146_v45 = vsel %vm953_vm0, %v7118_v34, 0.0  ;;  %v7149_v48 = vpack.c.bf16 %v1719_v20, %v1718_v7 }
 0x19b   : > { %9853 = vst [vmem:[#allocation37_spill] sm:$0xff] %v7129_v29  ;;  %6073 = vmatpush1.bf16.msra.mxu0 %v9854_v40  ;;  %4892 = vmatmul.mubr.msk.f32.gmra.mrb[38].mxu1 %vm6968_vm4, %v7122_v10  ;;  %9855 = vst [vmem:[#allocation38_spill] sm:$0xff] %v7141_v16  ;;  %v863_v49 = vadd.f32 %v6922_v24, %v808_v6  ;;  %v5488_v27 = vpop.f32.mrb[12].mxu0  ;;  %v7158_v37 = vsel %vm958_vm2, %v7129_v29, 0.0  ;;  %v7160_v38 = vmax.f32 %v870_v52, 0.0  ;;  %v7163_v40 = vpop.f32.mrb[12].mxu1 }
 0x19c   : > { %6074 = vmatprep.subr.bf16.mxu0 %v9856_v5  ;;  %2001 = vmatprep.mubr.f32.mxu1 %v7031_v30  ;;  %v869_v39 = vadd.f32 %v6922_v24, %v814_v53  ;;  %v7165_v7 = vmax.f32 %v864_v31, 0.0  ;;  %v811_v6 = vmul.f32 %v5488_v27, %v6917_v22  ;;  %v612_v20 = vpop.f32.mrb[13].mxu0  ;;  %v1067_v23 = vrot.slane %v7048_v44, 7  ;;  %v7173_v19 = vpop.f32.mrb[13].mxu1 }
 0x19d   : > { %5579 = vmatmul.mubr.msk.f32.gmra.mrb[20].mxu0 %vm1203_vm3, %v7063_v55  ;;  %9857 = vst [vmem:[#allocation39_spill] sm:$0xff] %v7160_v38  ;;  %v7170_v55 = vrot.slane %v7158_v37, 1  ;;  %6131 = vmatpush3.bf16.msra.mxu1 %v6128_v12  ;;  %v7175_v52 = vmax.f32 %v863_v49, 0.0  ;;  %v810_v53 = vmul.f32 %v6917_v22, %v612_v20  ;;  %v7180_v31 = vsel %vm1058_vm1, %v7122_v10, %v1065_v14  ;;  %v1691_v10 = vld [vmem:[#allocation8 + $0x78] sm:$0xff] }
 0x19e   : > { %9858 = vst [vmem:[#allocation40_spill] sm:$0xff] %v7165_v7  ;;  %5581 = vmatprep.mubr.f32.mxu0 %v7141_v16  ;;  %9861 = vst [vmem:[#allocation43_spill] sm:$0xff] %v7180_v31  ;;  %v1219_v27 = vrot.slane %v7146_v45, 1  ;;  %v9862_v16 = vpack.c.bf16 %v6977_v58, %v6958_v50  ;;  %6133 = vmatprep.subr.bf16.mxu1 %v6132_v9  ;;  %v866_v44 = vadd.f32 %v6922_v24, %v811_v6 }
 0x19f   : > { %9859 = vst [vmem:[#allocation41_spill] sm:$0xff] %v7170_v55  ;;  %9860 = vst [vmem:[#allocation42_spill] sm:$0xff] %v7175_v52  ;;  %2002 = vmatmul.mubr.f32.gmra.mrb[40].mxu1 %v7180_v31  ;;  %v7190_v12 = vsel %vm1203_vm3, %v1215_v56, %v7170_v55  ;;  %v7195_v49 = vsel %vm958_vm2, %v7165_v7, 0.0  ;;  %v816_v20 = vmul.f32 %v6917_v22, %v6943_v42  ;;  %v5491_v58 = vpop.f32.mrb[14].mxu0  ;;  %v1220_v56 = vrot.slane %v7175_v52, 1  ;;  %v7211_v42 = vpop.f32.mrb[14].mxu1 }
 0x1a0   : > { %6076 = vmatpush1.bf16.msra.mxu0 %v9862_v16  ;;  %9863 = vst [vmem:[#allocation44_spill] sm:$0xff] %v7190_v12  ;;  %v865_v50 = vadd.f32 %v6922_v24, %v810_v53  ;;  %4893 = vmatprep.mubr.msk.f32.mxu1 %vm958_vm2, %v7024_v21  ;;  %v7207_v16 = vrot.slane %v7195_v49, 1  ;;  %v817_v6 = vmul.f32 %v6938_v35, %v6917_v22  ;;  %v7213_v41 = vmax.f32 %v866_v44, 0.0  ;;  %v622_v8 = vpop.f32.mrb[15].mxu0  ;;  %v7223_v21 = vpop.f32.mrb[15].mxu1 }
 0x1a1   : > { %6077 = vmatprep.subr.bf16.mxu0 %v9856_v5  ;;  %5582 = vmatmul.mubr.f32.gmra.mrb[22].mxu0 %v7190_v12  ;;  %v813_v53 = vmul.f32 %v5491_v58, %v6917_v22  ;;  %v7217_v31 = vsel %vm1058_vm1, %v1065_v14, %v1067_v23  ;;  %v818_v12 = vmul.f32 %v6917_v22, %v6984_v1 }
 0x1a2   : > { %9864 = vst [vmem:[#allocation45_spill] sm:$0xff] %v7207_v16  ;;  %9865 = vst [vmem:[#allocation46_spill] sm:$0xff] %v7213_v41  ;;  %5584 = vmatprep.mubr.msk.f32.mxu0 %vm1203_vm3, %v7170_v55  ;;  %6135 = vmatpush3.bf16.msra.mxu1 %v6132_v9  ;;  %v7225_v35 = vmax.f32 %v865_v50, 0.0  ;;  %v812_v44 = vmul.f32 %v6917_v22, %v622_v8  ;;  %v7229_v30 = vsel %vm1203_vm3, %v1219_v27, %v1220_v56 }
 0x1a3   : > { %9866 = vst [vmem:[#allocation47_spill] sm:$0xff] %v7217_v31  ;;  %9868 = vst [vmem:[#allocation49_spill] sm:$0xff] %v7229_v30  ;;  %v7233_v23 = vsel %vm1203_vm3, %v1220_v56, %v7207_v16  ;;  %v9870_v14 = vpack.c.bf16 %v7020_v18, %v7018_v17  ;;  %6137 = vmatprep.subr.bf16.mxu1 %v7149_v48  ;;  %v868_v1 = vadd.f32 %v6922_v24, %v813_v53 }
 0x1a4   : > { %9867 = vst [vmem:[#allocation48_spill] sm:$0xff] %v7225_v35  ;;  %9869 = vst [vmem:[#allocation50_spill] sm:$0xff] %v7233_v23  ;;  %2007 = vmatmul.mubr.f32.gmra.mrb[42].mxu1 %v7217_v31  ;;  %v7241_v9 = vmax.f32 %v869_v39, 0.0  ;;  %v871_v8 = vadd.f32 %v6922_v24, %v816_v20  ;;  %v1225_v27 = vrot.slane %v7213_v41, 1  ;;  %v867_v50 = vadd.f32 %v6922_v24, %v812_v44  ;;  %v7259_v20 = vpop.f32.mrb[16].mxu1 }
 0x1a5   : > { %6079 = vmatpush1.bf16.msra.mxu0 %v9870_v14  ;;  %4894 = vmatprep.mubr.msk.f32.mxu1 %vm953_vm0, %v7084_v13  ;;  %v872_v17 = vadd.f32 %v6922_v24, %v817_v6  ;;  %v7255_v18 = vsel %vm953_vm0, %v7225_v35, 0.0  ;;  %v819_v39 = vmul.f32 %v6975_v57, %v6917_v22  ;;  %v7261_v58 = vmax.f32 %v868_v1, 0.0  ;;  %v7270_v44 = vpop.f32.mrb[17].mxu1 }
 0x1a6   : > { %9871 = vst [vmem:[#allocation51_spill] sm:$0xff] %v7241_v9  ;;  %6080 = vmatprep.subr.bf16.mxu0 %v9856_v5  ;;  %5585 = vmatmul.mubr.f32.gmra.mrb[24].mxu0 %v7229_v30  ;;  %v7264_v56 = vrot.slane %v7111_v51, 7  ;;  %v1224_v53 = vrot.slane %v7255_v18, 1  ;;  %v821_v6 = vmul.f32 %v7014_v15, %v6917_v22  ;;  %v7273_v14 = vmax.f32 %v867_v50, 0.0 }
 0x1a7   : > { %9872 = vst [vmem:[#allocation52_spill] sm:$0xff] %v7261_v58  ;;  %5587 = vmatprep.mubr.f32.mxu0 %v7233_v23  ;;  %6139 = vmatpush3.bf16.msra.mxu1 %v7149_v48  ;;  %v1070_v57 = vrot.slane %v7073_v2, 7  ;;  %v873_v1 = vadd.f32 %v6922_v24, %v818_v12  ;;  %v7280_v51 = vsel %vm958_vm2, %v7160_v38, 0.0  ;;  %v9875_v23 = vpack.c.bf16 %v7054_v47, %v7052_v46  ;;  %v1688_v46 = vld [vmem:[#allocation8 + $0x60] sm:$0xff]  ;;  %v1689_v47 = vld [vmem:[#allocation8 + $0x68] sm:$0xff]  ;;  %v7312_v55 = vpop.f32.mrb[18].mxu1 }
 0x1a8   : > { %9873 = vst [vmem:[#allocation53_spill] sm:$0xff] %v7264_v56  ;;  %9874 = vst [vmem:[#allocation54_spill] sm:$0xff] %v7273_v14  ;;  %4896 = vmatmul.mubr.msk.f32.gmra.mrb[44].mxu1 %vm6968_vm4, %v7264_v56  ;;  %v7288_v15 = vmax.f32 %v871_v8, 0.0  ;;  %v7291_v48 = vsel %vm1203_vm3, %v1224_v53, %v1225_v27  ;;  %v7296_v12 = vsel %vm953_vm0, %v7261_v58, 0.0  ;;  %v1230_v50 = vrot.slane %v7241_v9, 1  ;;  %v7323_v31 = vpop.f32.mrb[19].mxu1 }
 0x1a9   : > { %6082 = vmatpush1.bf16.msra.mxu0 %v9875_v23  ;;  %9877 = vst [vmem:[#allocation56_spill] sm:$0xff] %v7291_v48  ;;  %2016 = vmatprep.mubr.f32.mxu1 %v7073_v2  ;;  %v874_v23 = vadd.f32 %v6922_v24, %v819_v39  ;;  %v7307_v8 = vsel %vm958_vm2, %v7273_v14, 0.0  ;;  %v1072_v53 = vrot.slane %v7158_v37, 7  ;;  %v820_v30 = vmul.f32 %v6917_v22, %v7029_v28  ;;  %v1690_v37 = vld [vmem:[#allocation8 + $0x70] sm:$0xff] }
 0x1aa   : > { %9876 = vst [vmem:[#allocation55_spill] sm:$0xff] %v7288_v15  ;;  %6083 = vmatprep.subr.bf16.mxu0 %v9856_v5  ;;  %5588 = vmatmul.mubr.msk.f32.gmra.mrb[26].mxu0 %vm1203_vm3, %v7207_v16  ;;  %v7316_v2 = vrot.slane %v7307_v8, 1  ;;  %v1229_v16 = vrot.slane %v7296_v12, 1  ;;  %v876_v39 = vadd.f32 %v6922_v24, %v821_v6  ;;  %v7321_v13 = vrot.slane %v7280_v51, 1 }
 0x1ab   : > { %5590 = vmatprep.mubr.f32.mxu0 %v7291_v48  ;;  %v7325_v61 = vmax.f32 %v872_v17, 0.0  ;;  %v7329_v28 = vsel %vm1058_vm1, %v7264_v56, %v1070_v57  ;;  %v7331_v48 = vmax.f32 %v873_v1, 0.0  ;;  %v9883_v11 = vpack.c.bf16 %v7071_v0, %v7069_v63 }
 0x1ac   : > { %9878 = vst [vmem:[#allocation57_spill] sm:$0xff] %v7316_v2  ;;  %9879 = vst [vmem:[#allocation58_spill] sm:$0xff] %v7321_v13  ;;  %v6087_v6 = vpack.c.bf16 %v1689_v47, %v1688_v46  ;;  %2017 = vmatmul.mubr.f32.gmra.mrb[46].mxu1 %v7329_v28  ;;  %v7339_v3 = vsel %vm1203_vm3, %v1225_v27, %v7316_v2  ;;  %v822_v17 = vmul.f32 %v6917_v22, %v7082_v26 }
 0x1ad   : > { %9880 = vst [vmem:[#allocation59_spill] sm:$0xff] %v7325_v61  ;;  %9881 = vst [vmem:[#allocation60_spill] sm:$0xff] %v7329_v28  ;;  %6085 = vmatpush1.bf16.msra.mxu0 %v9883_v11  ;;  %v7346_v56 = vsel %vm953_vm0, %v7288_v15, 0.0  ;;  %v7349_v1 = vmax.f32 %v874_v23, 0.0  ;;  %4897 = vmatprep.mubr.msk.f32.mxu1 %vm958_vm2, %v7129_v29  ;;  %v7356_v63 = vsel %vm1058_vm1, %v1070_v57, %v1072_v53  ;;  %v7359_v11 = vpop.f32.mrb[20].mxu1  ;;  %v7366_v46 = vmax.f32 %v876_v39, 0.0 }
 0x1ae   : > { %9882 = vst [vmem:[#allocation61_spill] sm:$0xff] %v7331_v48  ;;  %9884 = vst [vmem:[#allocation62_spill] sm:$0xff] %v7339_v3  ;;  %6086 = vmatprep.subr.bf16.mxu0 %v9856_v5  ;;  %5591 = vmatmul.mubr.f32.gmra.mrb[28].mxu0 %v7339_v3  ;;  %v875_v0 = vadd.f32 %v6922_v24, %v820_v30  ;;  %v6090_v26 = vpack.c.bf16 %v1691_v10, %v1690_v37  ;;  %v7374_v23 = vpop.f32.mrb[21].mxu1  ;;  %v1692_v30 = vld [vmem:[#allocation8 + $0x80] sm:$0xff]  ;;  %v1693_v53 = vld [vmem:[#allocation8 + $0x88] sm:$0xff]  ;;  %v1234_v10 = vrot.slane %v7346_v56, 1 }
 0x1af   : > { %9885 = vst [vmem:[#allocation63_spill] sm:$0xff] %v7349_v1  ;;  %9886 = vst [vmem:[#allocation64_spill] sm:$0xff] %v7356_v63  ;;  %5593 = vmatprep.mubr.msk.f32.mxu0 %vm1203_vm3, %v7316_v2  ;;  %v7364_v27 = vsel %vm1203_vm3, %v1229_v16, %v1230_v50  ;;  %v7370_v47 = vsel %vm1203_vm3, %v1230_v50, %v7321_v13  ;;  %v823_v57 = vmul.f32 %v7067_v62, %v6917_v22  ;;  %v7396_v3 = vpop.f32.mrb[22].mxu1 }
 0x1b0   : > { %9887 = vst [vmem:[#allocation65_spill] sm:$0xff] %v7364_v27  ;;  %9888 = vst [vmem:[#allocation66_spill] sm:$0xff] %v7366_v46  ;;  %v1235_v37 = vrot.slane %v7325_v61, 1  ;;  %v7381_v16 = vsel %vm958_vm2, %v7331_v48, 0.0  ;;  %v824_v50 = vmul.f32 %v6917_v22, %v7126_v59  ;;  %2022 = vmatmul.mubr.f32.gmra.mrb[48].mxu1 %v7356_v63  ;;  %v877_v62 = vadd.f32 %v6922_v24, %v822_v17 }
 0x1b1   : > { %9889 = vst [vmem:[#allocation67_spill] sm:$0xff] %v7370_v47  ;;  %6088 = vmatpush1.bf16.msra.mxu0 %v6087_v6  ;;  %4898 = vmatprep.mubr.msk.f32.mxu1 %vm953_vm0, %v7118_v34  ;;  %v7392_v39 = vmax.f32 %v875_v0, 0.0  ;;  %v825_v2 = vmul.f32 %v7116_v4, %v6917_v22  ;;  %v6093_v59 = vpack.c.bf16 %v1693_v53, %v1692_v30  ;;  %v7399_v6 = vrot.slane %v7146_v45, 7  ;;  %v7407_v0 = vpop.f32.mrb[23].mxu1 }
 0x1b2   : > { %6089 = vmatprep.subr.bf16.mxu0 %v9856_v5  ;;  %5594 = vmatmul.mubr.f32.gmra.mrb[30].mxu0 %v7364_v27  ;;  %v878_v17 = vadd.f32 %v6922_v24, %v823_v57  ;;  %v1075_v63 = vrot.slane %v7175_v52, 7  ;;  %v7405_v34 = vrot.slane %v7381_v16, 1  ;;  %v7410_v27 = vsel %vm1203_vm3, %v1234_v10, %v1235_v37  ;;  %v1694_v10 = vld [vmem:[#allocation8 + $0x90] sm:$0xff] }
 0x1b3   : > { %9890 = vst [vmem:[#allocation68_spill] sm:$0xff] %v7392_v39  ;;  %9891 = vst [vmem:[#allocation69_spill] sm:$0xff] %v7399_v6  ;;  %5596 = vmatprep.mubr.f32.mxu0 %v7370_v47  ;;  %v879_v4 = vadd.f32 %v6922_v24, %v824_v50  ;;  %v7416_v45 = vsel %vm953_vm0, %v7349_v1, 0.0  ;;  %v7421_v57 = vsel %vm958_vm2, %v7366_v46, 0.0  ;;  %v7426_v30 = vmax.f32 %v877_v62, 0.0  ;;  %v1695_v50 = vld [vmem:[#allocation8 + $0x98] sm:$0xff] }
 0x1b4   : > { %9892 = vst [vmem:[#allocation70_spill] sm:$0xff] %v7405_v34  ;;  %9893 = vst [vmem:[#allocation71_spill] sm:$0xff] %v7410_v27  ;;  %4900 = vmatmul.mubr.msk.f32.gmra.mrb[50].mxu1 %vm6968_vm4, %v7399_v6  ;;  %v827_v53 = vmul.f32 %v7163_v40, %v6917_v22  ;;  %v1077_v47 = vrot.slane %v7195_v49, 7  ;;  %v1240_v29 = vrot.slane %v7392_v39, 1  ;;  %v7437_v62 = vpop.f32.mrb[24].mxu1  ;;  %v7442_v40 = vsel %vm1203_vm3, %v1235_v37, %v7405_v34  ;;  %v1696_v49 = vld [vmem:[#allocation8 + $0xa0] sm:$0xff] }
 0x1b5   : > { %6091 = vmatpush1.bf16.msra.mxu0 %v6090_v26  ;;  %9894 = vst [vmem:[#allocation72_spill] sm:$0xff] %v7426_v30  ;;  %2031 = vmatprep.mubr.f32.mxu1 %v7175_v52  ;;  %v880_v26 = vadd.f32 %v6922_v24, %v825_v2  ;;  %9895 = vst [vmem:[#allocation73_spill] sm:$0xff] %v7442_v40  ;;  %v1239_v28 = vrot.slane %v7416_v45, 1  ;;  %v826_v52 = vmul.f32 %v6917_v22, %v7173_v19  ;;  %v7450_v2 = vpop.f32.mrb[25].mxu1 }
 0x1b6   : > { %6092 = vmatprep.subr.bf16.mxu0 %v9856_v5  ;;  %5597 = vmatmul.mubr.msk.f32.gmra.mrb[32].mxu0 %vm1203_vm3, %v7321_v13  ;;  %v7448_v13 = vrot.slane %v7421_v57, 1  ;;  %v7452_v36 = vmax.f32 %v878_v17, 0.0  ;;  %v7458_v37 = vmax.f32 %v879_v4, 0.0  ;;  %v6096_v60 = vpack.c.bf16 %v1695_v50, %v1694_v10 }
 0x1b7   : > { %5599 = vmatprep.mubr.f32.mxu0 %v7410_v27  ;;  %v7456_v27 = vsel %vm1058_vm1, %v7399_v6, %v1075_v63  ;;  %v882_v19 = vadd.f32 %v6922_v24, %v827_v53  ;;  %v828_v43 = vmul.f32 %v6917_v22, %v7223_v21  ;;  %v7467_v17 = vsel %vm953_vm0, %v7426_v30, 0.0  ;;  %v7479_v21 = vpop.f32.mrb[26].mxu1 }
 0x1b8   : > { %9896 = vst [vmem:[#allocation74_spill] sm:$0xff] %v7448_v13  ;;  %9897 = vst [vmem:[#allocation75_spill] sm:$0xff] %v7452_v36  ;;  %2032 = vmatmul.mubr.f32.gmra.mrb[52].mxu1 %v7456_v27  ;;  %v829_v4 = vmul.f32 %v7211_v42, %v6917_v22  ;;  %v6099_v53 = vpack.c.bf16 %v1697_v33, %v1696_v49  ;;  %v7481_v10 = vmax.f32 %v880_v26, 0.0  ;;  %v1244_v42 = vrot.slane %v7467_v17, 1  ;;  %v1699_v49 = vld [vmem:[#allocation8 + $0xb8] sm:$0xff] }
 0x1b9   : > { %9898 = vst [vmem:[#allocation76_spill] sm:$0xff] %v7456_v27  ;;  %9899 = vst [vmem:[#allocation77_spill] sm:$0xff] %v7458_v37  ;;  %6094 = vmatpush1.bf16.msra.mxu0 %v6093_v59  ;;  %4901 = vmatprep.mubr.msk.f32.mxu1 %vm958_vm2, %v7165_v7  ;;  %v7475_v59 = vsel %vm1058_vm1, %v1075_v63, %v1077_v47  ;;  %v7486_v50 = vsel %vm1203_vm3, %v1239_v28, %v1240_v29  ;;  %v7493_v47 = vpop.f32.mrb[27].mxu1  ;;  %v1245_v33 = vrot.slane %v7452_v36, 1 }
 0x1ba   : > { %6095 = vmatprep.subr.bf16.mxu0 %v9856_v5  ;;  %5600 = vmatmul.mubr.f32.gmra.mrb[34].mxu0 %v7442_v40  ;;  %9900 = vst [vmem:[#allocation78_spill] sm:$0xff] %v7475_v59  ;;  %9901 = vst [vmem:[#allocation79_spill] sm:$0xff] %v7481_v10  ;;  %v881_v7 = vadd.f32 %v6922_v24, %v826_v52  ;;  %v7491_v63 = vsel %vm1203_vm3, %v1240_v29, %v7448_v13  ;;  %v7500_v26 = vsel %vm958_vm2, %v7458_v37, 0.0  ;;  %v1698_v52 = vld [vmem:[#allocation8 + $0xb0] sm:$0xff] }
 0x1bb   : > { %5602 = vmatprep.mubr.msk.f32.mxu0 %vm1203_vm3, %v7405_v34  ;;  %9902 = vst [vmem:[#allocation80_spill] sm:$0xff] %v7486_v50  ;;  %9903 = vst [vmem:[#allocation81_spill] sm:$0xff] %v7491_v63  ;;  %v830_v28 = vmul.f32 %v6917_v22, %v7270_v44  ;;  %v7505_v29 = vmax.f32 %v882_v19, 0.0  ;;  %v883_v34 = vadd.f32 %v6922_v24, %v828_v43  ;;  %v7516_v44 = vpop.f32.mrb[28].mxu1  ;;  %v7521_v19 = vrot.slane %v7255_v18, 7 }
 0x1bc   : > { %2037 = vmatmul.mubr.f32.gmra.mrb[54].mxu1 %v7475_v59  ;;  %v884_v40 = vadd.f32 %v6922_v24, %v829_v4  ;;  %v7518_v59 = vmax.f32 %v881_v7, 0.0  ;;  %v7525_v43 = vrot.slane %v7500_v26, 1  ;;  %v1080_v4 = vrot.slane %v7213_v41, 7 }
 0x1bd   : > { %6097 = vmatpush1.bf16.msra.mxu0 %v6096_v60  ;;  %9904 = vst [vmem:[#allocation82_spill] sm:$0xff] %v7505_v29  ;;  %4902 = vmatprep.mubr.msk.f32.mxu1 %vm953_vm0, %v7225_v35  ;;  %v831_v60 = vmul.f32 %v7259_v20, %v6917_v22  ;;  %9906 = vst [vmem:[#allocation84_spill] sm:$0xff] %v7521_v19  ;;  %v7527_v35 = vpop.f32.mrb[29].mxu1  ;;  %v7531_v27 = vsel %vm1203_vm3, %v1244_v42, %v1245_v33  ;;  %v7537_v7 = vsel %vm953_vm0, %v7481_v10, 0.0  ;;  %v1703_v10 = vld [vmem:[#allocation8 + $0xd8] sm:$0xff] }
 0x1be   : > { %6098 = vmatprep.subr.bf16.mxu0 %v9856_v5  ;;  %5603 = vmatmul.mubr.f32.gmra.mrb[36].mxu0 %v7486_v50  ;;  %9905 = vst [vmem:[#allocation83_spill] sm:$0xff] %v7518_v59  ;;  %9907 = vst [vmem:[#allocation85_spill] sm:$0xff] %v7525_v43  ;;  %v6102_v50 = vpack.c.bf16 %v1699_v49, %v1698_v52  ;;  %v885_v20 = vadd.f32 %v6922_v24, %v830_v28  ;;  %v7542_v18 = vmax.f32 %v883_v34, 0.0  ;;  %v1700_v28 = vld [vmem:[#allocation8 + $0xc0] sm:$0xff]  ;;  %v1701_v49 = vld [vmem:[#allocation8 + $0xc8] sm:$0xff] }
 0x1bf   : > { %5605 = vmatprep.mubr.f32.mxu0 %v7491_v63  ;;  %9908 = vst [vmem:[#allocation86_spill] sm:$0xff] %v7531_v27  ;;  %9909 = vst [vmem:[#allocation87_spill] sm:$0xff] %v7537_v7  ;;  %v833_v52 = vmul.f32 %v7312_v55, %v6917_v22  ;;  %v7549_v42 = vsel %vm958_vm2, %v7505_v29, 0.0  ;;  %v886_v34 = vadd.f32 %v6922_v24, %v831_v60  ;;  %v1082_v55 = vrot.slane %v7307_v8, 7  ;;  %v7559_v63 = vpop.f32.mrb[30].mxu1  ;;  %v1702_v60 = vld [vmem:[#allocation8 + $0xd0] sm:$0xff] }
 0x1c0   : > { %4904 = vmatmul.mubr.msk.f32.gmra.mrb[56].mxu1 %vm6968_vm4, %v7521_v19  ;;  %9910 = vst [vmem:[#allocation88_spill] sm:$0xff] %v7542_v18  ;;  %v7564_v6 = vsel %vm1203_vm3, %v1245_v33, %v7525_v43  ;;  %v1249_v29 = vrot.slane %v7537_v7, 1  ;;  %v7574_v8 = vsel %vm1058_vm1, %v7521_v19, %v1080_v4  ;;  %v7579_v33 = vrot.slane %v7549_v42, 1 }
 0x1c1   : > { %6100 = vmatpush1.bf16.msra.mxu0 %v6099_v53  ;;  %2046 = vmatprep.mubr.f32.mxu1 %v7213_v41  ;;  %v7555_v53 = vmax.f32 %v884_v40, 0.0  ;;  %9912 = vst [vmem:[#allocation90_spill] sm:$0xff] %v7564_v6  ;;  %v1250_v41 = vrot.slane %v7518_v59, 1  ;;  %v832_v40 = vmul.f32 %v6917_v22, %v7323_v31  ;;  %9913 = vst [vmem:[#allocation91_spill] sm:$0xff] %v7574_v8  ;;  %v7588_v37 = vsel %vm953_vm0, %v7542_v18, 0.0 }
 0x1c2   : > { %6101 = vmatprep.subr.bf16.mxu0 %v9856_v5  ;;  %5606 = vmatmul.mubr.msk.f32.gmra.mrb[38].mxu0 %vm1203_vm3, %v7448_v13  ;;  %v7570_v13 = vpop.f32.mrb[31].mxu1  ;;  %9915 = vst [vmem:[#allocation93_spill] sm:$0xff] %v7579_v33  ;;  %v6105_v7 = vpack.c.bf16 %v1701_v49, %v1700_v28  ;;  %v888_v59 = vadd.f32 %v6922_v24, %v833_v52  ;;  %v7600_v52 = vmax.f32 %v886_v34, 0.0  ;;  %v1705_v34 = vld [vmem:[#allocation8 + $0xe8] sm:$0xff] }
 0x1c3   : > { %9911 = vst [vmem:[#allocation89_spill] sm:$0xff] %v7555_v53  ;;  %5608 = vmatprep.mubr.f32.mxu0 %v7531_v27  ;;  %v7576_v27 = vmax.f32 %v885_v20, 0.0  ;;  %v834_v31 = vmul.f32 %v6917_v22, %v7374_v23  ;;  %v835_v20 = vmul.f32 %v7359_v11, %v6917_v22  ;;  %v6108_v23 = vpack.c.bf16 %v1703_v10, %v1702_v60 }
 0x1c4   : > { %2047 = vmatmul.mubr.f32.gmra.mrb[58].mxu1 %v7574_v8  ;;  %9917 = vst [vmem:[#allocation95_spill] sm:$0xff] %v7600_v52  ;;  %v7605_v28 = vsel %vm1203_vm3, %v1249_v29, %v1250_v41  ;;  %v887_v49 = vadd.f32 %v6922_v24, %v832_v40  ;;  %v836_v10 = vmul.f32 %v6917_v22, %v7407_v0  ;;  %v1704_v29 = vld [vmem:[#allocation8 + $0xe0] sm:$0xff]  ;;  %v7622_v40 = vmax.f32 %v888_v59, 0.0 }
 0x1c5   : > { %9914 = vst [vmem:[#allocation92_spill] sm:$0xff] %v7576_v27  ;;  %6103 = vmatpush1.bf16.msra.mxu0 %v6102_v50  ;;  %4905 = vmatprep.mubr.msk.f32.mxu1 %vm958_vm2, %v7273_v14  ;;  %v7596_v50 = vsel %vm1058_vm1, %v1080_v4, %v1082_v55  ;;  %9918 = vst [vmem:[#allocation96_spill] sm:$0xff] %v7605_v28  ;;  %v1255_v14 = vrot.slane %v7555_v53, 1  ;;  %v7611_v4 = vsel %vm1203_vm3, %v1250_v41, %v7579_v33 }
 0x1c6   : > { %6104 = vmatprep.subr.bf16.mxu0 %v9856_v5  ;;  %5609 = vmatmul.mubr.f32.gmra.mrb[40].mxu0 %v7564_v6  ;;  %9916 = vst [vmem:[#allocation94_spill] sm:$0xff] %v7596_v50  ;;  %9919 = vst [vmem:[#allocation97_spill] sm:$0xff] %v7611_v4  ;;  %v1254_v55 = vrot.slane %v7588_v37, 1  ;;  %v7617_v11 = vsel %vm958_vm2, %v7576_v27, 0.0  ;;  %v889_v41 = vadd.f32 %v6922_v24, %v834_v31  ;;  %v7636_v59 = vrot.slane %v7296_v12, 7 }
 0x1c7   : > { %5611 = vmatprep.mubr.msk.f32.mxu0 %vm1203_vm3, %v7525_v43  ;;  %9920 = vst [vmem:[#allocation98_spill] sm:$0xff] %v7622_v40  ;;  %v890_v60 = vadd.f32 %v6922_v24, %v835_v20  ;;  %v837_v0 = vmul.f32 %v7396_v3, %v6917_v22  ;;  %v7640_v31 = vrot.slane %v7617_v11, 1  ;;  %v6111_v43 = vpack.c.bf16 %v1705_v34, %v1704_v29  ;;  %v1707_v29 = vld [vmem:[#allocation8 + $0xf8] sm:$0xff] }
 0x1c8   : > { %2052 = vmatmul.mubr.f32.gmra.mrb[60].mxu1 %v7596_v50  ;;  %9922 = vst [vmem:[#allocation100_spill] sm:$0xff] %v7636_v59  ;;  %v1085_v6 = vrot.slane %v7241_v9, 7  ;;  %v891_v20 = vadd.f32 %v6922_v24, %v836_v10  ;;  %v7650_v3 = vsel %vm953_vm0, %v7600_v52, 0.0  ;;  %v7655_v12 = vmax.f32 %v889_v41, 0.0  ;;  %v1706_v10 = vld [vmem:[#allocation8 + $0xf0] sm:$0xff] }
 0x1c9   : > { %6106 = vmatpush1.bf16.msra.mxu0 %v6105_v7  ;;  %4906 = vmatprep.mubr.msk.f32.mxu1 %vm953_vm0, %v7261_v58  ;;  %v7633_v7 = vmax.f32 %v887_v49, 0.0  ;;  %9923 = vst [vmem:[#allocation101_spill] sm:$0xff] %v7640_v31  ;;  %v839_v49 = vmul.f32 %v7437_v62, %v6917_v22  ;;  %v892_v34 = vadd.f32 %v6922_v24, %v837_v0  ;;  %v1087_v62 = vrot.slane %v7280_v51, 7 }
 0x1ca   : > { %6107 = vmatprep.subr.bf16.mxu0 %v9856_v5  ;;  %5612 = vmatmul.mubr.f32.gmra.mrb[42].mxu0 %v7605_v28  ;;  %v7644_v28 = vsel %vm1203_vm3, %v1254_v55, %v1255_v14  ;;  %9925 = vst [vmem:[#allocation103_spill] sm:$0xff] %v7655_v12  ;;  %v7662_v55 = vsel %vm958_vm2, %v7622_v40, 0.0  ;;  %v7675_v41 = vsel %vm1203_vm3, %v1255_v14, %v7640_v31  ;;  %v7685_v0 = vmax.f32 %v891_v20, 0.0 }
 0x1cb   : > { %9921 = vst [vmem:[#allocation99_spill] sm:$0xff] %v7633_v7  ;;  %5614 = vmatprep.mubr.f32.mxu0 %v7611_v4  ;;  %9924 = vst [vmem:[#allocation102_spill] sm:$0xff] %v7644_v28  ;;  %v1259_v4 = vrot.slane %v7650_v3, 1  ;;  %v1260_v58 = vrot.slane %v7633_v7, 1  ;;  %v7688_v51 = vrot.slane %v7662_v55, 1  ;;  %v894_v14 = vadd.f32 %v6922_v24, %v839_v49 }
 0x1cc   : > { %4908 = vmatmul.mubr.msk.f32.gmra.mrb[62].mxu1 %vm6968_vm4, %v7636_v59  ;;  %9927 = vst [vmem:[#allocation105_spill] sm:$0xff] %v7675_v41  ;;  %9929 = vst [vmem:[#allocation107_spill] sm:$0xff] %v7685_v0  ;;  %v841_v20 = vmul.f32 %v7479_v21, %v6917_v22  ;;  %v7726_v21 = vsel %vm958_vm2, %v7685_v0, 0.0 }
 0x1cd   : > { %6109 = vmatpush1.bf16.msra.mxu0 %v6108_v23  ;;  %2061 = vmatprep.mubr.f32.mxu1 %v7241_v9  ;;  %v7668_v23 = vmax.f32 %v890_v60, 0.0  ;;  %v838_v9 = vmul.f32 %v6917_v22, %v7450_v2  ;;  %v7683_v60 = vsel %vm1058_vm1, %v7636_v59, %v1085_v6  ;;  %9930 = vst [vmem:[#allocation108_spill] sm:$0xff] %v7688_v51  ;;  %v7697_v2 = vsel %vm953_vm0, %v7655_v12, 0.0 }
 0x1ce   : > { %6110 = vmatprep.subr.bf16.mxu0 %v9856_v5  ;;  %5615 = vmatmul.mubr.msk.f32.gmra.mrb[44].mxu0 %vm1203_vm3, %v7579_v33  ;;  %9928 = vst [vmem:[#allocation106_spill] sm:$0xff] %v7683_v60  ;;  %v840_v33 = vmul.f32 %v6917_v22, %v7493_v47  ;;  %v7709_v47 = vmax.f32 %v892_v34, 0.0  ;;  %v7714_v49 = vsel %vm1203_vm3, %v1259_v4, %v1260_v58  ;;  %v1720_v4 = vld [vmem:[#allocation8 + $0x160] sm:$0xff] }
 0x1cf   : > { %9926 = vst [vmem:[#allocation104_spill] sm:$0xff] %v7668_v23  ;;  %5617 = vmatprep.mubr.f32.mxu0 %v7644_v28  ;;  %v6114_v28 = vpack.c.bf16 %v1707_v29, %v1706_v10  ;;  %9933 = vst [vmem:[#allocation111_spill] sm:$0xff] %v7714_v49  ;;  %v893_v10 = vadd.f32 %v6922_v24, %v838_v9  ;;  %v1265_v29 = vrot.slane %v7668_v23, 1  ;;  %v7731_v9 = vmax.f32 %v894_v14, 0.0 }
 0x1d0   : > { %2062 = vmatmul.mubr.f32.gmra.mrb[64].mxu1 %v7683_v60  ;;  %9932 = vst [vmem:[#allocation110_spill] sm:$0xff] %v7709_v47  ;;  %v842_v34 = vmul.f32 %v6917_v22, %v7527_v35  ;;  %v843_v35 = vmul.f32 %v7516_v44, %v6917_v22  ;;  %v7744_v14 = vrot.slane %v7346_v56, 7 }
 0x1d1   : > { %6112 = vmatpush1.bf16.msra.mxu0 %v6111_v43  ;;  %4909 = vmatprep.mubr.msk.f32.mxu1 %vm958_vm2, %v7160_v38  ;;  %v7705_v43 = vsel %vm1058_vm1, %v1085_v6, %v1087_v62  ;;  %v1264_v6 = vrot.slane %v7697_v2, 1  ;;  %v1721_v62 = vld [vmem:[#allocation8 + $0x168] sm:$0xff]  ;;  %9935 = vst [vmem:[#allocation113_spill] sm:$0xff] %v7731_v9  ;;  %v1723_v38 = vld [vmem:[#allocation8 + $0x178] sm:$0xff]  ;;  %v7741_v60 = vmax.f32 %v893_v10, 0.0  ;;  %v7758_v10 = vsel %vm953_vm0, %v7709_v47, 0.0 }
 0x1d2   : > { %6113 = vmatprep.subr.bf16.mxu0 %v9856_v5  ;;  %5618 = vmatmul.mubr.f32.gmra.mrb[46].mxu0 %v7675_v41  ;;  %9931 = vst [vmem:[#allocation109_spill] sm:$0xff] %v7705_v43  ;;  %v7720_v41 = vsel %vm1203_vm3, %v1260_v58, %v7688_v51  ;;  %v895_v58 = vadd.f32 %v6922_v24, %v840_v33  ;;  %9937 = vst [vmem:[#allocation115_spill] sm:$0xff] %v7744_v14  ;;  %v7748_v33 = vrot.slane %v7726_v21, 1 }
 0x1d3   : > { %5620 = vmatprep.mubr.msk.f32.mxu0 %vm1203_vm3, %v7640_v31  ;;  %9934 = vst [vmem:[#allocation112_spill] sm:$0xff] %v7720_v41  ;;  %v896_v31 = vadd.f32 %v6922_v24, %v841_v20  ;;  %9936 = vst [vmem:[#allocation114_spill] sm:$0xff] %v7741_v60  ;;  %v7752_v20 = vsel %vm1203_vm3, %v1264_v6, %v1265_v29  ;;  %v897_v44 = vadd.f32 %v6922_v24, %v842_v34 }
 0x1d4   : > { %2067 = vmatmul.mubr.f32.gmra.mrb[66].mxu1 %v7705_v43  ;;  %9938 = vst [vmem:[#allocation116_spill] sm:$0xff] %v7748_v33  ;;  %9939 = vst [vmem:[#allocation117_spill] sm:$0xff] %v7752_v20  ;;  %v7763_v56 = vmax.f32 %v895_v58, 0.0  ;;  %v7770_v6 = vsel %vm958_vm2, %v7731_v9, 0.0  ;;  %v898_v58 = vadd.f32 %v6922_v24, %v843_v35 }
 0x1d5   : > { %6115 = vmatpush1.bf16.msra.mxu0 %v6114_v28  ;;  %4910 = vmatprep.mubr.msk.f32.mxu1 %vm953_vm0, %v7288_v15  ;;  %v1722_v28 = vld [vmem:[#allocation8 + $0x170] sm:$0xff]  ;;  %v6140_v15 = vpack.c.bf16 %v1721_v62, %v1720_v4  ;;  %v845_v4 = vmul.f32 %v7559_v63, %v6917_v22  ;;  %v3315_v62 = vld [vmem:[#allocation8 + $0x400] sm:$0xff]  ;;  %v7775_v43 = vmax.f32 %v896_v31, 0.0  ;;  %v1092_v22 = vrot.slane %v7381_v16, 7 }
 0x1d6   : > { %5621 = vmatmul.mubr.f32.gmra.mrb[48].mxu0 %v7714_v49  ;;  %v1090_v49 = vrot.slane %v7325_v61, 7  ;;  %9940 = vst [vmem:[#allocation118_spill] sm:$0xff] %v7763_v56  ;;  %v6144_v34 = vpack.c.bf16 %v1723_v38, %v1722_v28  ;;  %v7782_v63 = vsel %vm1203_vm3, %v1265_v29, %v7748_v33  ;;  %v1269_v38 = vrot.slane %v7758_v10, 1 }
 0x1d7   : > { %5623 = vmatprep.mubr.f32.mxu0 %v7720_v41  ;;  %6141 = vmatprep.subr.bf16.mxu1 %v6140_v15  ;;  %v3316_v41 = vld [vmem:[#allocation8 + $0x408] sm:$0xff]  ;;  %9941 = vst [vmem:[#allocation119_spill] sm:$0xff] %v7775_v43  ;;  %9942 = vst [vmem:[#allocation120_spill] sm:$0xff] %v7782_v63  ;;  %v1270_v28 = vrot.slane %v7741_v60, 1  ;;  %v7794_v16 = vmax.f32 %v897_v44, 0.0  ;;  %v7797_v29 = vrot.slane %v7770_v6, 1 }
 0x1d8   : > { %4912 = vmatmul.mubr.msk.f32.gmra.mrb[68].mxu1 %vm6968_vm4, %v7744_v14  ;;  %v7792_v24 = vsel %vm1058_vm1, %v7744_v14, %v1090_v49  ;;  %v7799_v35 = vpack.c.bf16 %v3316_v41, %v3315_v62  ;;  %v7814_v41 = vmax.f32 %v898_v58, 0.0  ;;  %v1275_v58 = vrot.slane %v7775_v43, 1 }
 0x1d9   : > { %2076 = vmatprep.mubr.f32.mxu1 %v7325_v61  ;;  %6143 = vmatpush3.bf16.msra.mxu1 %v6140_v15  ;;  %9943 = vst [vmem:[#allocation121_spill] sm:$0xff] %v7792_v24  ;;  %9944 = vst [vmem:[#allocation122_spill] sm:$0xff] %v7794_v16  ;;  %v7808_v15 = vsel %vm953_vm0, %v7763_v56, 0.0  ;;  %v7822_v44 = vsel %vm1203_vm3, %v1269_v38, %v1270_v28  ;;  %v7826_v62 = vsel %vm1203_vm3, %v1270_v28, %v7797_v29 }
 0x1da   : > { %5624 = vmatmul.mubr.msk.f32.gmra.mrb[50].mxu0 %vm1203_vm3, %v7688_v51  ;;  %v6363_v51 = vld [vmem:[%s9563_s2] ss:$0 sm:$0xff]  ;;  %9945 = vst [vmem:[#allocation123_spill] sm:$0xff] %v7797_v29  ;;  %6145 = vmatprep.subr.bf16.mxu1 %v6144_v34  ;;  %9946 = vst [vmem:[#allocation124_spill] sm:$0xff] %v7814_v41  ;;  %v1095_v28 = vrot.slane %v7392_v39, 7 }
 0x1db   : > { %5626 = vmatprep.mubr.f32.mxu0 %v7752_v20  ;;  %v844_v31 = vmul.f32 %v6363_v51, %v7570_v13  ;;  %v6364_v20 = vld [vmem:[%s9564_s3] ss:$0 sm:$0xff]  ;;  %v7817_v51 = vsel %vm1058_vm1, %v1090_v49, %v1092_v22  ;;  %9948 = vst [vmem:[#allocation126_spill] sm:$0xff] %v7822_v44  ;;  %9949 = vst [vmem:[#allocation127_spill] sm:$0xff] %v7826_v62  ;;  %v7833_v49 = vsel %vm958_vm2, %v7794_v16, 0.0  ;;  %6197 = vmatprep.subr.bf16.mxu0 %v7799_v35 }
 0x1dc   : > { %2077 = vmatmul.mubr.f32.gmra.mrb[70].mxu1 %v7792_v24  ;;  %v900_v13 = vadd.f32 %v6364_v20, %v845_v4  ;;  %9947 = vst [vmem:[#allocation125_spill] sm:$0xff] %v7817_v51  ;;  %v7847_v22 = vrot.slane %v7416_v45, 7  ;;  %v7851_v38 = vrot.slane %v7833_v49, 1 }
 0x1dd   : > { %4913 = vmatprep.mubr.msk.f32.mxu1 %vm958_vm2, %v7331_v48  ;;  %v899_v4 = vadd.f32 %v6364_v20, %v844_v31  ;;  %6147 = vmatpush3.bf16.msra.mxu1 %v6144_v34  ;;  %v1274_v48 = vrot.slane %v7808_v15, 1 }
 0x1de   : > { %5627 = vmatmul.mubr.f32.gmra.mrb[52].mxu0 %v7782_v63  ;;  %6148 = vmatprep.subr.bf16.mxu1 %v9856_v5  ;;  %v7838_v20 = vmax.f32 %v900_v13, 0.0  ;;  %9952 = vst [vmem:[#allocation130_spill] sm:$0xff] %v7847_v22  ;;  %9953 = vst [vmem:[#allocation131_spill] sm:$0xff] %v7851_v38  ;;  %v7860_v13 = vsel %vm953_vm0, %v7814_v41, 0.0 }
 0x1df   : > { %5629 = vmatprep.mubr.msk.f32.mxu0 %vm1203_vm3, %v7748_v33  ;;  %v7844_v34 = vmax.f32 %v899_v4, 0.0  ;;  %v7855_v31 = vsel %vm1203_vm3, %v1274_v48, %v1275_v58  ;;  %v7876_v48 = vsel %vm1203_vm3, %v1275_v58, %v7851_v38  ;;  %v1279_v4 = vrot.slane %v7860_v13, 1 }
 0x1e0   : > { %2082 = vmatmul.mubr.f32.gmra.mrb[72].mxu1 %v7817_v51  ;;  %9950 = vst [vmem:[#allocation128_spill] sm:$0xff] %v7838_v20  ;;  %9954 = vst [vmem:[#allocation132_spill] sm:$0xff] %v7855_v31  ;;  %v7868_v45 = vsel %vm958_vm2, %v7838_v20, 0.0  ;;  %v1097_v33 = vrot.slane %v7421_v57, 7 }
 0x1e1   : > { %4914 = vmatprep.mubr.msk.f32.mxu1 %vm953_vm0, %v7349_v1  ;;  %9951 = vst [vmem:[#allocation129_spill] sm:$0xff] %v7844_v34  ;;  %9955 = vst [vmem:[#allocation133_spill] sm:$0xff] %v7876_v48  ;;  %v7886_v63 = vrot.slane %v7868_v45, 1 }
 0x1e2   : > { %5630 = vmatmul.mubr.f32.gmra.mrb[54].mxu0 %v7822_v44  ;;  %v7882_v44 = vsel %vm1058_vm1, %v7847_v22, %v1095_v28 }
 0x1e3   : > { %5632 = vmatprep.mubr.f32.mxu0 %v7826_v62  ;;  %v1280_v62 = vrot.slane %v7844_v34, 1  ;;  %9956 = vst [vmem:[#allocation134_spill] sm:$0xff] %v7882_v44  ;;  %9957 = vst [vmem:[#allocation135_spill] sm:$0xff] %v7886_v63 }
 0x1e4   : > { %4916 = vmatmul.mubr.msk.f32.gmra.mrb[74].mxu1 %vm6968_vm4, %v7847_v22 }
 0x1e5   : > { %2091 = vmatprep.mubr.f32.mxu1 %v7392_v39  ;;  %v7896_v58 = vsel %vm1203_vm3, %v1279_v4, %v1280_v62  ;;  %v7903_v57 = vsel %vm1203_vm3, %v1280_v62, %v7886_v63  ;;  %v3317_v62 = vld [vmem:[#allocation8 + $0x410] sm:$0xff]  ;;  %v9745_v4 = vmov 0.0  }
 0x1e6   : > { %5633 = vmatmul.mubr.msk.f32.gmra.mrb[56].mxu0 %vm1203_vm3, %v7797_v29  ;;  %9958 = vst [vmem:[#allocation136_spill] sm:$0xff] %v7896_v58  ;;  %9960 = vst [vmem:[#allocation138_spill] sm:$0xff] %v7903_v57  ;;  %v9968_v29 = vld [vmem:[#allocation83_spill] sm:$0xff] }
 0x1e7   : > { %5635 = vmatprep.mubr.f32.mxu0 %v7855_v31  ;;  %v7899_v31 = vsel %vm1058_vm1, %v1095_v28, %v1097_v33  ;;  %v1100_v33 = vrot.slane %v7452_v36, 7  ;;  %v3318_v28 = vld [vmem:[#allocation8 + $0x418] sm:$0xff] }
 0x1e8   : > { %2092 = vmatmul.mubr.f32.gmra.mrb[76].mxu1 %v7882_v44  ;;  %9959 = vst [vmem:[#allocation137_spill] sm:$0xff] %v7899_v31 }
 0x1e9   : > { %4917 = vmatprep.mubr.msk.f32.mxu1 %vm958_vm2, %v7366_v46 }
 0x1ea   : > { %5636 = vmatmul.mubr.f32.gmra.mrb[58].mxu0 %v7876_v48  ;;  %v9963_v48 = vld [vmem:[#allocation77_spill] sm:$0xff] }
 0x1eb   : > { %5638 = vmatprep.mubr.msk.f32.mxu0 %vm1203_vm3, %v7851_v38  ;;  %v7911_v38 = vrot.slane %v7467_v17, 7 }
 0x1ec   : > { %2097 = vmatmul.mubr.f32.gmra.mrb[78].mxu1 %v7899_v31 }
 0x1ed   : > { %4918 = vmatprep.mubr.msk.f32.mxu1 %vm953_vm0, %v7426_v30  ;;  %9961 = vst [vmem:[#allocation139_spill] sm:$0xff] %v7911_v38  ;;  %v7924_v17 = vsel %vm1058_vm1, %v7911_v38, %v1100_v33 }
 0x1ee   : > { %5639 = vmatmul.mubr.f32.gmra.mrb[60].mxu0 %v7896_v58  ;;  %9962 = vst [vmem:[#allocation140_spill] sm:$0xff] %v7924_v17  ;;  %v6200_v58 = vpack.c.bf16 %v3318_v28, %v3317_v62  ;;  %v9966_v62 = vld [vmem:[#allocation87_spill] sm:$0xff] }
 0x1ef   : > { %5641 = vmatprep.mubr.f32.mxu0 %v7903_v57  ;;  %v1102_v57 = vrot.slane %v7500_v26, 7  ;;  %v9965_v26 = vld [vmem:[#allocation79_spill] sm:$0xff]  ;;  %v7943_v28 = vrot.slane %v9966_v62, 7 }
 0x1f0   : > { %4920 = vmatmul.mubr.msk.f32.gmra.mrb[80].mxu1 %vm6968_vm4, %v7911_v38 }
 0x1f1   : > { %2106 = vmatprep.mubr.f32.mxu1 %v7452_v36  ;;  %9967 = vst [vmem:[#allocation87_spill] sm:$0xff] %v7943_v28 }
 0x1f2   : > { %5642 = vmatmul.mubr.msk.f32.gmra.mrb[62].mxu0 %vm1203_vm3, %v7886_v63  ;;  %v7935_v63 = vsel %vm1058_vm1, %v1100_v33, %v1102_v57  ;;  %v3319_v57 = vld [vmem:[#allocation8 + $0x420] sm:$0xff]  ;;  %v3320_v33 = vld [vmem:[#allocation8 + $0x428] sm:$0xff] }
 0x1f3   : > { %2591 = vmatprep.mubr.f32.mxu0 %v9745_v4  ;;  %9964 = vst [vmem:[#allocation141_spill] sm:$0xff] %v7935_v63  ;;  %v6204_v62 = vpack.c.bf16 %v3320_v33, %v3319_v57  ;;  %v9976_v57 = vld [vmem:[#allocation22_spill] sm:$0xff] }
 0x1f4   : > { %2107 = vmatmul.mubr.f32.gmra.mrb[82].mxu1 %v7924_v17 }
 0x1f5   : > { %4921 = vmatprep.mubr.msk.f32.mxu1 %vm958_vm2, %v9963_v48  ;;  %v9971_v48 = vld [vmem:[#allocation82_spill] sm:$0xff] }
 0x1f6   : > { %2592 = vmatmul.mubr.f32.vlgmr.msra.gmra.mrb[64].mxu0 %v9745_v4 }
 0x1f7   : > { %2596 = vmatprep.mubr.f32.mxu0 %v9745_v4  ;;  %6199 = vmatpush3.bf16.msra.mxu0 %v7799_v35  ;;  %v1105_v35 = vrot.slane %v9968_v29, 7 }
 0x1f8   : > { %6201 = vmatprep.subr.bf16.mxu0 %v6200_v58  ;;  %2112 = vmatmul.mubr.f32.gmra.mrb[84].mxu1 %v7935_v63  ;;  %v1107_v63 = vrot.slane %v7549_v42, 7  ;;  %v9975_v42 = vld [vmem:[#allocation27_spill] sm:$0xff] }
 0x1f9   : > { %4922 = vmatprep.mubr.msk.f32.mxu1 %vm953_vm0, %v9965_v26  ;;  %v9969_v26 = vld [vmem:[#allocation19_spill] sm:$0xff] }
 0x1fa   : > { %2597 = vmatmul.mubr.f32.gmra.mrb[66].mxu0 %v9745_v4 }
 0x1fb   : > { %2601 = vmatprep.mubr.f32.mxu0 %v9745_v4  ;;  %6203 = vmatpush3.bf16.msra.mxu0 %v6200_v58  ;;  %v7957_v58 = vsel %vm1058_vm1, %v7943_v28, %v1105_v35 }
 0x1fc   : > { %4924 = vmatmul.mubr.msk.f32.gmra.mrb[86].mxu1 %vm6968_vm4, %v7943_v28  ;;  %9970 = vst [vmem:[#allocation19_spill] sm:$0xff] %v7957_v58  ;;  %6205 = vmatprep.subr.bf16.mxu0 %v6204_v62 }
 0x1fd   : > { %2121 = vmatprep.mubr.f32.mxu1 %v9968_v29  ;;  %v9973_v29 = vld [vmem:[#allocation18_spill] sm:$0xff] }
 0x1fe   : > { %2602 = vmatmul.mubr.f32.gmra.mrb[68].mxu0 %v9745_v4  ;;  %v9972_v4 = vld [vmem:[#allocation20_spill] sm:$0xff] }
 0x1ff   : > { %4966 = vmatprep.mubr.msk.f32.mxu0 %vm953_vm0, %v9969_v26  ;;  %6207 = vmatpush3.bf16.msra.mxu0 %v6204_v62  ;;  %v7969_v26 = vsel %vm1058_vm1, %v1105_v35, %v1107_v63  ;;  %v9978_v63 = vld [vmem:[#allocation31_spill] sm:$0xff]  ;;  %v9979_v35 = vld [vmem:[#allocation21_spill] sm:$0xff]  ;;  %v9981_v62 = vld [vmem:[#allocation36_spill] sm:$0xff] }
 0x200   : > { %2122 = vmatmul.mubr.f32.gmra.mrb[88].mxu1 %v7957_v58  ;;  %9974 = vst [vmem:[#allocation20_spill] sm:$0xff] %v7969_v26 }
 0x201   : > { %4925 = vmatprep.mubr.msk.f32.mxu1 %vm958_vm2, %v9971_v48 }
 0x202   : > { %4968 = vmatmul.mubr.msk.f32.gmra.mrb[70].mxu0 %vm6968_vm4, %v9972_v4  ;;  %v7980_v4 = vrot.slane %v7588_v37, 7  ;;  %v1112_v37 = vrot.slane %v7617_v11, 7  ;;  %v9984_v11 = vld [vmem:[#allocation43_spill] sm:$0xff] }
 0x203   : > { %2611 = vmatprep.mubr.f32.mxu0 %v9973_v29  ;;  %v1110_v29 = vrot.slane %v7555_v53, 7 }
 0x204   : > { %2127 = vmatmul.mubr.f32.gmra.mrb[90].mxu1 %v7969_v26  ;;  %9977 = vst [vmem:[#allocation18_spill] sm:$0xff] %v7980_v4 }
 0x205   : > { %4926 = vmatprep.mubr.msk.f32.mxu1 %vm953_vm0, %v7542_v18  ;;  %v7993_v33 = vsel %vm1058_vm1, %v7980_v4, %v1110_v29 }
 0x206   : > { %2612 = vmatmul.mubr.f32.gmra.mrb[72].mxu0 %v9975_v42  ;;  %9980 = vst [vmem:[#allocation27_spill] sm:$0xff] %v7993_v33  ;;  %v9982_v42 = vld [vmem:[#allocation26_spill] sm:$0xff] }
 0x207   : > { %4969 = vmatprep.mubr.msk.f32.mxu0 %vm958_vm2, %v9976_v57  ;;  %v8005_v57 = vsel %vm1058_vm1, %v1110_v29, %v1112_v37  ;;  %v9987_v29 = vld [vmem:[#allocation47_spill] sm:$0xff]  ;;  %v3321_v37 = vld [vmem:[#allocation8 + $0x430] sm:$0xff] }
 0x208   : > { %4928 = vmatmul.mubr.msk.f32.gmra.mrb[92].mxu1 %vm6968_vm4, %v7980_v4  ;;  %9983 = vst [vmem:[#allocation22_spill] sm:$0xff] %v8005_v57 }
 0x209   : > { %2136 = vmatprep.mubr.f32.mxu1 %v7555_v53 }
 0x20a   : > { %2617 = vmatmul.mubr.f32.gmra.mrb[74].mxu0 %v9978_v63  ;;  %v9985_v63 = vld [vmem:[#allocation25_spill] sm:$0xff] }
 0x20b   : > { %4970 = vmatprep.mubr.msk.f32.mxu0 %vm953_vm0, %v9979_v35  ;;  %v8016_v35 = vrot.slane %v7650_v3, 7 }
 0x20c   : > { %2137 = vmatmul.mubr.f32.gmra.mrb[94].mxu1 %v7993_v33 }
 0x20d   : > { %4929 = vmatprep.mubr.msk.f32.mxu1 %vm958_vm2, %v7576_v27  ;;  %9986 = vst [vmem:[#allocation31_spill] sm:$0xff] %v8016_v35 }
 0x20e   : > { %4972 = vmatmul.mubr.msk.f32.gmra.mrb[76].mxu0 %vm6968_vm4, %v9981_v62  ;;  %v3322_v62 = vld [vmem:[#allocation8 + $0x438] sm:$0xff] }
 0x20f   : > { %2626 = vmatprep.mubr.f32.mxu0 %v9982_v42  ;;  %v1115_v42 = vrot.slane %v7633_v7, 7 }
 0x210   : > { %2142 = vmatmul.mubr.f32.gmra.mrb[96].mxu1 %v8005_v57 }
 0x211   : > { %4930 = vmatprep.mubr.msk.f32.mxu1 %vm953_vm0, %v7600_v52  ;;  %v8029_v3 = vsel %vm1058_vm1, %v8016_v35, %v1115_v42  ;;  %v1117_v52 = vrot.slane %v7662_v55, 7  ;;  %v9993_v55 = vld [vmem:[#allocation60_spill] sm:$0xff] }
 0x212   : > { %2627 = vmatmul.mubr.f32.gmra.mrb[78].mxu0 %v9984_v11  ;;  %v9988_v11 = vld [vmem:[#allocation32_spill] sm:$0xff]  ;;  %9989 = vst [vmem:[#allocation142_spill] sm:$0xff] %v8029_v3 }
 0x213   : > { %4973 = vmatprep.mubr.msk.f32.mxu0 %vm958_vm2, %v9985_v63  ;;  %v6208_v63 = vpack.c.bf16 %v3322_v62, %v3321_v37  ;;  %v8041_v62 = vsel %vm1058_vm1, %v1115_v42, %v1117_v52  ;;  %v9994_v37 = vld [vmem:[#allocation37_spill] sm:$0xff]  ;;  %v9996_v52 = vld [vmem:[#allocation64_spill] sm:$0xff]  ;;  %v9997_v42 = vld [vmem:[#allocation35_spill] sm:$0xff] }
 0x214   : > { %4932 = vmatmul.mubr.msk.f32.gmra.mrb[98].mxu1 %vm6968_vm4, %v8016_v35  ;;  %9992 = vst [vmem:[#allocation143_spill] sm:$0xff] %v8041_v62 }
 0x215   : > { %2151 = vmatprep.mubr.f32.mxu1 %v7633_v7  ;;  %6209 = vmatprep.subr.bf16.mxu0 %v6208_v63  ;;  %v9991_v7 = vld [vmem:[#allocation30_spill] sm:$0xff] }
 0x216   : > { %2632 = vmatmul.mubr.f32.gmra.mrb[80].mxu0 %v9987_v29  ;;  %v9990_v29 = vld [vmem:[#allocation53_spill] sm:$0xff] }
 0x217   : > { %4974 = vmatprep.mubr.msk.f32.mxu0 %vm953_vm0, %v9988_v11  ;;  %6211 = vmatpush3.bf16.msra.mxu0 %v6208_v63  ;;  %v1120_v63 = vrot.slane %v7668_v23, 7 }
 0x218   : > { %2152 = vmatmul.mubr.f32.gmra.mrb[100].mxu1 %v8029_v3 }
 0x219   : > { %4933 = vmatprep.mubr.msk.f32.mxu1 %vm958_vm2, %v7622_v40 }
 0x21a   : > { %4976 = vmatmul.mubr.msk.f32.gmra.mrb[82].mxu0 %vm6968_vm4, %v9990_v29  ;;  %v8052_v29 = vrot.slane %v7697_v2, 7  ;;  %v1122_v2 = vrot.slane %v7726_v21, 7  ;;  %v3325_v21 = vld [vmem:[#allocation8 + $0x450] sm:$0xff] }
 0x21b   : > { %2641 = vmatprep.mubr.f32.mxu0 %v9991_v7  ;;  %v3324_v7 = vld [vmem:[#allocation8 + $0x448] sm:$0xff] }
 0x21c   : > { %2157 = vmatmul.mubr.f32.gmra.mrb[102].mxu1 %v8041_v62  ;;  %9995 = vst [vmem:[#allocation144_spill] sm:$0xff] %v8052_v29 }
 0x21d   : > { %4934 = vmatprep.mubr.msk.f32.mxu1 %vm953_vm0, %v7655_v12 }
 0x21e   : > { %2642 = vmatmul.mubr.f32.gmra.mrb[84].mxu0 %v9993_v55  ;;  %v3323_v55 = vld [vmem:[#allocation8 + $0x440] sm:$0xff] }
 0x21f   : > { %4977 = vmatprep.mubr.msk.f32.mxu0 %vm958_vm2, %v9994_v37  ;;  %v8065_v37 = vsel %vm1058_vm1, %v8052_v29, %v1120_v63  ;;  %v6212_v11 = vpack.c.bf16 %v3324_v7, %v3323_v55  ;;  %v10002_v55 = vld [vmem:[#allocation76_spill] sm:$0xff] }
 0x220   : > { %4936 = vmatmul.mubr.msk.f32.gmra.mrb[104].mxu1 %vm6968_vm4, %v8052_v29  ;;  %9998 = vst [vmem:[#allocation145_spill] sm:$0xff] %v8065_v37  ;;  %v3326_v29 = vld [vmem:[#allocation8 + $0x458] sm:$0xff] }
 0x221   : > { %2166 = vmatprep.mubr.f32.mxu1 %v7668_v23  ;;  %6213 = vmatprep.subr.bf16.mxu0 %v6212_v11  ;;  %v8077_v23 = vsel %vm1058_vm1, %v1120_v63, %v1122_v2  ;;  %v6216_v7 = vpack.c.bf16 %v3326_v29, %v3325_v21  ;;  %v3327_v63 = vld [vmem:[#allocation8 + $0x460] sm:$0xff]  ;;  %v3328_v2 = vld [vmem:[#allocation8 + $0x468] sm:$0xff] }
 0x222   : > { %2647 = vmatmul.mubr.f32.gmra.mrb[86].mxu0 %v9996_v52  ;;  %v9999_v52 = vld [vmem:[#allocation69_spill] sm:$0xff]  ;;  %10001 = vst [vmem:[#allocation146_spill] sm:$0xff] %v8077_v23  ;;  %v6220_v29 = vpack.c.bf16 %v3328_v2, %v3327_v63  ;;  %v10005_v21 = vld [vmem:[#allocation78_spill] sm:$0xff] }
 0x223   : > { %4978 = vmatprep.mubr.msk.f32.mxu0 %vm953_vm0, %v9997_v42  ;;  %v10000_v42 = vld [vmem:[#allocation42_spill] sm:$0xff]  ;;  %6215 = vmatpush3.bf16.msra.mxu0 %v6212_v11  ;;  %v1125_v11 = vrot.slane %v7741_v60, 7 }
 0x224   : > { %2167 = vmatmul.mubr.f32.gmra.mrb[106].mxu1 %v8065_v37  ;;  %6217 = vmatprep.subr.bf16.mxu0 %v6216_v7  ;;  %v10008_v2 = vld [vmem:[#allocation46_spill] sm:$0xff] }
 0x225   : > { %4937 = vmatprep.mubr.msk.f32.mxu1 %vm958_vm2, %v7685_v0  ;;  %v10003_v0 = vld [vmem:[#allocation40_spill] sm:$0xff] }
 0x226   : > { %4980 = vmatmul.mubr.msk.f32.gmra.mrb[88].mxu0 %vm6968_vm4, %v9999_v52  ;;  %v3330_v52 = vld [vmem:[#allocation8 + $0x478] sm:$0xff] }
 0x227   : > { %2656 = vmatprep.mubr.f32.mxu0 %v10000_v42  ;;  %v8088_v42 = vrot.slane %v7758_v10, 7  ;;  %6219 = vmatpush3.bf16.msra.mxu0 %v6216_v7  ;;  %v1127_v7 = vrot.slane %v7770_v6, 7  ;;  %v8124_v6 = vrot.slane %v7808_v15, 7  ;;  %v1132_v15 = vrot.slane %v7833_v49, 7  ;;  %v10016_v49 = vld [vmem:[#allocation106_spill] sm:$0xff] }
 0x228   : > { %2172 = vmatmul.mubr.f32.gmra.mrb[108].mxu1 %v8077_v23  ;;  %6221 = vmatprep.subr.bf16.mxu0 %v6220_v29 }
 0x229   : > { %4938 = vmatprep.mubr.msk.f32.mxu1 %vm953_vm0, %v7709_v47  ;;  %10004 = vst [vmem:[#allocation147_spill] sm:$0xff] %v8088_v42  ;;  %v8101_v10 = vsel %vm1058_vm1, %v8088_v42, %v1125_v11  ;;  %10011 = vst [vmem:[#allocation149_spill] sm:$0xff] %v8124_v6 }
 0x22a   : > { %2657 = vmatmul.mubr.f32.gmra.mrb[90].mxu0 %v10002_v55  ;;  %v10006_v55 = vld [vmem:[#allocation48_spill] sm:$0xff]  ;;  %10007 = vst [vmem:[#allocation78_spill] sm:$0xff] %v8101_v10 }
 0x22b   : > { %4981 = vmatprep.mubr.msk.f32.mxu0 %vm958_vm2, %v10003_v0  ;;  %6223 = vmatpush3.bf16.msra.mxu0 %v6220_v29  ;;  %v3329_v0 = vld [vmem:[#allocation8 + $0x470] sm:$0xff] }
 0x22c   : > { %4940 = vmatmul.mubr.msk.f32.gmra.mrb[110].mxu1 %vm6968_vm4, %v8088_v42  ;;  %v6224_v63 = vpack.c.bf16 %v3330_v52, %v3329_v0  ;;  %v10010_v0 = vld [vmem:[#allocation54_spill] sm:$0xff]  ;;  %v1130_v52 = vrot.slane %v7775_v43, 7 }
 0x22d   : > { %2181 = vmatprep.mubr.f32.mxu1 %v7741_v60 }
 0x22e   : > { %2662 = vmatmul.mubr.f32.gmra.mrb[92].mxu0 %v10005_v21  ;;  %6225 = vmatprep.subr.bf16.mxu0 %v6224_v63  ;;  %v8137_v29 = vsel %vm1058_vm1, %v8124_v6, %v1130_v52 }
 0x22f   : > { %4982 = vmatprep.mubr.msk.f32.mxu0 %vm953_vm0, %v10006_v55  ;;  %v8113_v55 = vsel %vm1058_vm1, %v1125_v11, %v1127_v7  ;;  %6227 = vmatpush3.bf16.msra.mxu0 %v6224_v63  ;;  %v10012_v11 = vld [vmem:[#allocation52_spill] sm:$0xff]  ;;  %10013 = vst [vmem:[#allocation150_spill] sm:$0xff] %v8137_v29  ;;  %v10014_v7 = vld [vmem:[#allocation51_spill] sm:$0xff]  ;;  %v8149_v63 = vsel %vm1058_vm1, %v1130_v52, %v1132_v15  ;;  %v10019_v52 = vld [vmem:[#allocation109_spill] sm:$0xff] }
 0x230   : > { %2182 = vmatmul.mubr.f32.gmra.mrb[112].mxu1 %v8101_v10  ;;  %10009 = vst [vmem:[#allocation148_spill] sm:$0xff] %v8113_v55  ;;  %10015 = vst [vmem:[#allocation151_spill] sm:$0xff] %v8149_v63  ;;  %v10020_v15 = vld [vmem:[#allocation55_spill] sm:$0xff] }
 0x231   : > { %4941 = vmatprep.mubr.msk.f32.mxu1 %vm958_vm2, %v7731_v9 }
 0x232   : > { %4984 = vmatmul.mubr.msk.f32.gmra.mrb[94].mxu0 %vm6968_vm4, %v7521_v19 }
 0x233   : > { %2671 = vmatprep.mubr.f32.mxu0 %v10008_v2  ;;  %v10048_v2 = vld [vmem:[#allocation58_spill] sm:$0xff] }
 0x234   : > { %2187 = vmatmul.mubr.f32.gmra.mrb[114].mxu1 %v8113_v55 }
 0x235   : > { %4942 = vmatprep.mubr.msk.f32.mxu1 %vm953_vm0, %v7763_v56 }
 0x236   : > { %2672 = vmatmul.mubr.f32.gmra.mrb[96].mxu0 %v7574_v8  ;;  %v10044_v8 = vld [vmem:[#allocation57_spill] sm:$0xff] }
 0x237   : > { %4985 = vmatprep.mubr.msk.f32.mxu0 %vm958_vm2, %v10010_v0 }
 0x238   : > { %4944 = vmatmul.mubr.msk.f32.gmra.mrb[116].mxu1 %vm6968_vm4, %v8124_v6 }
 0x239   : > { %2196 = vmatprep.mubr.f32.mxu1 %v7775_v43 }
 0x23a   : > { %2677 = vmatmul.mubr.f32.gmra.mrb[98].mxu0 %v7596_v50  ;;  %v8160_v50 = vrot.slane %v7860_v13, 7  ;;  %v1137_v13 = vrot.slane %v7868_v45, 7  ;;  %v10023_v45 = vmov 0.0  }
 0x23b   : > { %4986 = vmatprep.mubr.msk.f32.mxu0 %vm953_vm0, %v10012_v11  ;;  %v10017_v11 = vld [vmem:[#allocation39_spill] sm:$0xff] }
 0x23c   : > { %2197 = vmatmul.mubr.f32.gmra.mrb[118].mxu1 %v8137_v29  ;;  %10018 = vst [vmem:[#allocation152_spill] sm:$0xff] %v8160_v50 }
 0x23d   : > { %4945 = vmatprep.mubr.msk.f32.mxu1 %vm958_vm2, %v7794_v16 }
 0x23e   : > { %4988 = vmatmul.mubr.msk.f32.gmra.mrb[100].mxu0 %vm6968_vm4, %v7636_v59 }
 0x23f   : > { %2686 = vmatprep.mubr.f32.mxu0 %v10014_v7  ;;  %v1135_v7 = vrot.slane %v7844_v34, 7 }
 0x240   : > { %2202 = vmatmul.mubr.f32.gmra.mrb[120].mxu1 %v8149_v63 }
 0x241   : > { %4946 = vmatprep.mubr.msk.f32.mxu1 %vm953_vm0, %v7814_v41  ;;  %v8173_v41 = vsel %vm1058_vm1, %v8160_v50, %v1135_v7 }
 0x242   : > { %2687 = vmatmul.mubr.f32.gmra.mrb[102].mxu0 %v10016_v49  ;;  %10021 = vst [vmem:[#allocation153_spill] sm:$0xff] %v8173_v41  ;;  %v10040_v49 = vld [vmem:[#allocation56_spill] sm:$0xff] }
 0x243   : > { %4989 = vmatprep.mubr.msk.f32.mxu0 %vm958_vm2, %v10017_v11 }
 0x244   : > { %4948 = vmatmul.mubr.msk.f32.gmra.mrb[122].mxu1 %vm6968_vm4, %v8160_v50  ;;  %v10024_v50 = vld [vmem:[#allocation61_spill] sm:$0xff] }
 0x245   : > { %2211 = vmatprep.mubr.f32.mxu1 %v7844_v34  ;;  %v3283_v34 = vld [vmem:[#allocation8 + $0x300] sm:$0xff] }
 0x246   : > { %2692 = vmatmul.mubr.f32.gmra.mrb[104].mxu0 %v10019_v52  ;;  %v8185_v52 = vsel %vm1058_vm1, %v1135_v7, %v1137_v13  ;;  %v10025_v13 = vld [vmem:[#allocation23_spill] sm:$0xff] }
 0x247   : > { %4990 = vmatprep.mubr.msk.f32.mxu0 %vm953_vm0, %v10020_v15  ;;  %v3284_v15 = vld [vmem:[#allocation8 + $0x308] sm:$0xff]  ;;  %10022 = vst [vmem:[#allocation154_spill] sm:$0xff] %v8185_v52 }
 0x248   : > { %2212 = vmatmul.mubr.f32.gmra.mrb[124].mxu1 %v8173_v41  ;;  %v6149_v41 = vpack.c.bf16 %v3284_v15, %v3283_v34  ;;  %v3287_v34 = vld [vmem:[#allocation8 + $0x320] sm:$0xff]  ;;  %v3288_v15 = vld [vmem:[#allocation8 + $0x328] sm:$0xff] }
 0x249   : > { %4949 = vmatprep.mubr.msk.f32.mxu1 %vm958_vm2, %v7838_v20  ;;  %v3285_v20 = vld [vmem:[#allocation8 + $0x310] sm:$0xff] }
 0x24a   : > { %4992 = vmatmul.mubr.msk.f32.gmra.mrb[106].mxu0 %vm6968_vm4, %v7744_v14  ;;  %v3286_v14 = vld [vmem:[#allocation8 + $0x318] sm:$0xff] }
 0x24b   : > { %2701 = vmatprep.mubr.f32.mxu0 %v7325_v61  ;;  %v6152_v7 = vpack.c.bf16 %v3286_v14, %v3285_v20  ;;  %v3290_v14 = vld [vmem:[#allocation8 + $0x338] sm:$0xff]  ;;  %v10027_v20 = vld [vmem:[#allocation24_spill] sm:$0xff] }
 0x24c   : > { %2217 = vmatmul.mubr.f32.gmra.mrb[126].mxu1 %v8185_v52  ;;  %v6155_v52 = vpack.c.bf16 %v3288_v15, %v3287_v34  ;;  %v3292_v34 = vld [vmem:[#allocation8 + $0x348] sm:$0xff]  ;;  %v10029_v15 = vld [vmem:[#allocation34_spill] sm:$0xff]  ;;  %v10038_v61 = vld [vmem:[#allocation45_spill] sm:$0xff] }
 0x24d   : > { %5676 = vmatprep.mubr.f32.mxu1 %v10023_v45 }
 0x24e   : > { %2702 = vmatmul.mubr.f32.gmra.mrb[108].mxu0 %v7792_v24  ;;  %v10037_v24 = vld [vmem:[#allocation141_spill] sm:$0xff] }
 0x24f   : > { %4993 = vmatprep.mubr.msk.f32.mxu0 %vm958_vm2, %v10024_v50 }
 0x250   : > { %5677 = vmatmul.mubr.f32.vlgmr.msra.gmra.mrb[128].mxu1 %v10023_v45 }
 0x251   : > { %6150 = vmatpush1.bf16.msra.mxu1 %v6149_v41  ;;  %5679 = vmatprep.mubr.f32.mxu1 %v10023_v45  ;;  %v10026_v41 = vld [vmem:[#allocation28_spill] sm:$0xff] }
 0x252   : > { %2707 = vmatmul.mubr.f32.gmra.mrb[110].mxu0 %v7817_v51  ;;  %6151 = vmatprep.subr.bf16.mxu1 %v9856_v5  ;;  %v3289_v45 = vld [vmem:[#allocation8 + $0x330] sm:$0xff]  ;;  %v10036_v51 = vld [vmem:[#allocation50_spill] sm:$0xff] }
 0x253   : > { %4994 = vmatprep.mubr.msk.f32.mxu0 %vm953_vm0, %v7349_v1 }
 0x254   : > { %5680 = vmatmul.mubr.f32.gmra.mrb[130].mxu1 %v10025_v13  ;;  %v10028_v13 = vld [vmem:[#allocation33_spill] sm:$0xff] }
 0x255   : > { %5682 = vmatprep.mubr.f32.mxu1 %v10026_v41  ;;  %6153 = vmatpush1.bf16.msra.mxu1 %v6152_v7  ;;  %v6158_v41 = vpack.c.bf16 %v3290_v14, %v3289_v45  ;;  %v3291_v7 = vld [vmem:[#allocation8 + $0x340] sm:$0xff]  ;;  %v3294_v45 = vld [vmem:[#allocation8 + $0x358] sm:$0xff] }
 0x256   : > { %4996 = vmatmul.mubr.msk.f32.gmra.mrb[112].mxu0 %vm6968_vm4, %v7847_v22  ;;  %6154 = vmatprep.subr.bf16.mxu1 %v9856_v5  ;;  %v10031_v14 = vld [vmem:[#allocation38_spill] sm:$0xff]  ;;  %v10034_v22 = vld [vmem:[#allocation49_spill] sm:$0xff] }
 0x257   : > { %2716 = vmatprep.mubr.f32.mxu0 %v7392_v39  ;;  %v10030_v39 = vld [vmem:[#allocation29_spill] sm:$0xff] }
 0x258   : > { %5683 = vmatmul.mubr.msk.f32.gmra.mrb[132].mxu1 %vm1203_vm3, %v10027_v20  ;;  %v6161_v20 = vpack.c.bf16 %v3292_v34, %v3291_v7  ;;  %v3296_v7 = vld [vmem:[#allocation8 + $0x368] sm:$0xff] }
 0x259   : > { %5685 = vmatprep.mubr.f32.mxu1 %v10028_v13  ;;  %6156 = vmatpush1.bf16.msra.mxu1 %v6155_v52  ;;  %v3293_v52 = vld [vmem:[#allocation8 + $0x350] sm:$0xff] }
 0x25a   : > { %2717 = vmatmul.mubr.f32.gmra.mrb[114].mxu0 %v7882_v44  ;;  %6157 = vmatprep.subr.bf16.mxu1 %v9856_v5 }
 0x25b   : > { %4997 = vmatprep.mubr.msk.f32.mxu0 %vm958_vm2, %v7366_v46  ;;  %v6164_v46 = vpack.c.bf16 %v3294_v45, %v3293_v52  ;;  %v3297_v45 = vld [vmem:[#allocation8 + $0x370] sm:$0xff] }
 0x25c   : > { %5686 = vmatmul.mubr.f32.gmra.mrb[134].mxu1 %v10029_v15 }
 0x25d   : > { %5688 = vmatprep.mubr.msk.f32.mxu1 %vm1203_vm3, %v10030_v39  ;;  %6159 = vmatpush1.bf16.msra.mxu1 %v6158_v41  ;;  %v3295_v41 = vld [vmem:[#allocation8 + $0x360] sm:$0xff] }
 0x25e   : > { %2722 = vmatmul.mubr.f32.gmra.mrb[116].mxu0 %v7899_v31  ;;  %6160 = vmatprep.subr.bf16.mxu1 %v9856_v5  ;;  %v10032_v31 = vld [vmem:[#allocation44_spill] sm:$0xff] }
 0x25f   : > { %4998 = vmatprep.mubr.msk.f32.mxu0 %vm953_vm0, %v7426_v30  ;;  %v10033_v30 = vld [vmem:[#allocation41_spill] sm:$0xff] }
 0x260   : > { %5689 = vmatmul.mubr.f32.gmra.mrb[136].mxu1 %v10031_v14 }
 0x261   : > { %5691 = vmatprep.mubr.f32.mxu1 %v10032_v31  ;;  %6162 = vmatpush1.bf16.msra.mxu1 %v6161_v20  ;;  %v1983_v44 = vpop.f32.mrb[32].mxu1  ;;  %v6167_v20 = vpack.c.bf16 %v3296_v7, %v3295_v41  ;;  %v3299_v7 = vld [vmem:[#allocation8 + $0x380] sm:$0xff] }
 0x262   : > { %5000 = vmatmul.mubr.msk.f32.gmra.mrb[118].mxu0 %vm6968_vm4, %v7911_v38  ;;  %6163 = vmatprep.subr.bf16.mxu1 %v9856_v5  ;;  %v1985_v34 = vpop.f32.mrb[33].mxu1  ;;  %v10035_v38 = vld [vmem:[#allocation77_spill] sm:$0xff] }
 0x263   : > { %2731 = vmatprep.mubr.f32.mxu0 %v7452_v36  ;;  %v3298_v36 = vld [vmem:[#allocation8 + $0x378] sm:$0xff] }
 0x264   : > { %5692 = vmatmul.mubr.msk.f32.gmra.mrb[138].mxu1 %vm1203_vm3, %v10033_v30  ;;  %v6170_v41 = vpack.c.bf16 %v3298_v36, %v3297_v45 }
 0x265   : > { %5694 = vmatprep.mubr.f32.mxu1 %v10034_v22  ;;  %6165 = vmatpush1.bf16.msra.mxu1 %v6164_v46  ;;  %v1988_v52 = vpop.f32.mrb[34].mxu1  ;;  %v10039_v46 = vld [vmem:[#allocation79_spill] sm:$0xff] }
 0x266   : > { %2732 = vmatmul.mubr.f32.gmra.mrb[120].mxu0 %v7924_v17  ;;  %6166 = vmatprep.subr.bf16.mxu1 %v9856_v5  ;;  %v1990_v1 = vpop.f32.mrb[35].mxu1  ;;  %v5574_v34 = vpop.f32.mrb[16].mxu0 }
 0x267   : > { %5001 = vmatprep.mubr.msk.f32.mxu0 %vm958_vm2, %v10035_v38  ;;  %v8239_v50 = vadd.f32 %v5574_v34, %v1988_v52  ;;  %v2288_v17 = vpop.f32.mrb[17].mxu0  ;;  %v3300_v52 = vld [vmem:[#allocation8 + $0x388] sm:$0xff] }
 0x268   : > { %5695 = vmatmul.mubr.f32.gmra.mrb[140].mxu1 %v10036_v51  ;;  %v8244_v38 = vadd.f32 %v2288_v17, %v1983_v44  ;;  %v10041_v44 = vld [vmem:[#allocation62_spill] sm:$0xff]  ;;  %v6173_v36 = vpack.c.bf16 %v3300_v52, %v3299_v7 }
 0x269   : > { %5697 = vmatprep.mubr.msk.f32.mxu1 %vm1203_vm3, %v10038_v61  ;;  %6168 = vmatpush1.bf16.msra.mxu1 %v6167_v20  ;;  %v10042_v20 = vld [vmem:[#allocation83_spill] sm:$0xff] }
 0x26a   : > { %2737 = vmatmul.mubr.f32.gmra.mrb[122].mxu0 %v10037_v24  ;;  %v1993_v1 = vpop.f32.mrb[36].mxu1  ;;  %6169 = vmatprep.subr.bf16.mxu1 %v9856_v5 }
 0x26b   : > { %5002 = vmatprep.mubr.msk.f32.mxu0 %vm953_vm0, %v10039_v46  ;;  %v1995_v34 = vpop.f32.mrb[37].mxu1  ;;  %v5577_v11 = vpop.f32.mrb[18].mxu0  ;;  %v3302_v46 = vld [vmem:[#allocation8 + $0x398] sm:$0xff] }
 0x26c   : > { %5698 = vmatmul.mubr.f32.gmra.mrb[142].mxu1 %v10040_v49  ;;  %v2298_v24 = vpop.f32.mrb[19].mxu0  ;;  %v3301_v34 = vld [vmem:[#allocation8 + $0x390] sm:$0xff] }
 0x26d   : > { %5700 = vmatprep.mubr.f32.mxu1 %v10041_v44  ;;  %v8255_v17 = vadd.f32 %v2298_v24, %v1993_v1  ;;  %6171 = vmatpush1.bf16.msra.mxu1 %v6170_v41  ;;  %v10045_v24 = vld [vmem:[#allocation65_spill] sm:$0xff]  ;;  %v6176_v41 = vpack.c.bf16 %v3302_v46, %v3301_v34  ;;  %v3305_v34 = vld [vmem:[#allocation8 + $0x3b0] sm:$0xff] }
 0x26e   : > { %5004 = vmatmul.mubr.msk.f32.gmra.mrb[124].mxu0 %vm6968_vm4, %v7943_v28  ;;  %v1998_v45 = vpop.f32.mrb[38].mxu1  ;;  %6172 = vmatprep.subr.bf16.mxu1 %v9856_v5 }
 0x26f   : > { %2746 = vmatprep.mubr.f32.mxu0 %v10042_v20  ;;  %v8259_v59 = vadd.f32 %v5577_v11, %v1998_v45  ;;  %v2000_v0 = vpop.f32.mrb[39].mxu1  ;;  %v3303_v11 = vld [vmem:[#allocation8 + $0x3a0] sm:$0xff]  ;;  %v10047_v20 = vld [vmem:[#allocation67_spill] sm:$0xff] }
 0x270   : > { %5701 = vmatmul.mubr.msk.f32.gmra.mrb[144].mxu1 %vm1203_vm3, %v10044_v8  ;;  %v5580_v28 = vpop.f32.mrb[20].mxu0  ;;  %v3304_v0 = vld [vmem:[#allocation8 + $0x3a8] sm:$0xff] }
 0x271   : > { %10043 = vst [vmem:[#allocation23_spill] sm:$0xff] %v8259_v59  ;;  %5703 = vmatprep.mubr.f32.mxu1 %v10045_v24  ;;  %v2308_v1 = vpop.f32.mrb[21].mxu0  ;;  %6174 = vmatpush1.bf16.msra.mxu1 %v6173_v36  ;;  %v6179_v46 = vpack.c.bf16 %v3304_v0, %v3303_v11  ;;  %v3308_v0 = vld [vmem:[#allocation8 + $0x3c8] sm:$0xff] }
 0x272   : > { %2747 = vmatmul.mubr.f32.gmra.mrb[126].mxu0 %v7957_v58  ;;  %v2003_v7 = vpop.f32.mrb[40].mxu1  ;;  %6175 = vmatprep.subr.bf16.mxu1 %v9856_v5 }
 0x273   : > { %5005 = vmatprep.mubr.msk.f32.mxu0 %vm958_vm2, %v9971_v48  ;;  %v8269_v52 = vadd.f32 %v2308_v1, %v2003_v7  ;;  %v2005_v45 = vpop.f32.mrb[41].mxu1  ;;  %v3306_v1 = vld [vmem:[#allocation8 + $0x3b8] sm:$0xff]  ;;  %v10050_v48 = vld [vmem:[#allocation71_spill] sm:$0xff] }
 0x274   : > { %5704 = vmatmul.mubr.f32.gmra.mrb[146].mxu1 %v10047_v20  ;;  %v5583_v58 = vpop.f32.mrb[22].mxu0 }
 0x275   : > { %10046 = vst [vmem:[#allocation28_spill] sm:$0xff] %v8269_v52  ;;  %5706 = vmatprep.mubr.msk.f32.mxu1 %vm1203_vm3, %v10048_v2  ;;  %v2318_v59 = vpop.f32.mrb[23].mxu0  ;;  %6177 = vmatpush1.bf16.msra.mxu1 %v6176_v41  ;;  %v10051_v52 = vld [vmem:[#allocation73_spill] sm:$0xff]  ;;  %v6182_v41 = vpack.c.bf16 %v3306_v1, %v3305_v34 }
 0x276   : > { %2752 = vmatmul.mubr.f32.gmra.mrb[128].mxu0 %v7969_v26  ;;  %6178 = vmatprep.subr.bf16.mxu1 %v9856_v5  ;;  %v3310_v1 = vld [vmem:[#allocation8 + $0x3d8] sm:$0xff] }
 0x277   : > { %5006 = vmatprep.mubr.msk.f32.mxu0 %vm953_vm0, %v7542_v18  ;;  %v2008_v36 = vpop.f32.mrb[42].mxu1 }
 0x278   : > { %v8279_v7 = vadd.f32 %v5580_v28, %v2008_v36  ;;  %v2010_v45 = vpop.f32.mrb[43].mxu1  ;;  %5707 = vmatmul.mubr.f32.gmra.mrb[148].mxu1 %v10050_v48  ;;  %v3307_v28 = vld [vmem:[#allocation8 + $0x3c0] sm:$0xff] }
 0x279   : > { %v5586_v26 = vpop.f32.mrb[24].mxu0  ;;  %5709 = vmatprep.mubr.f32.mxu1 %v10051_v52  ;;  %6180 = vmatpush1.bf16.msra.mxu1 %v6179_v46  ;;  %v6185_v46 = vpack.c.bf16 %v3308_v0, %v3307_v28 }
 0x27a   : > { %10049 = vst [vmem:[#allocation24_spill] sm:$0xff] %v8279_v7  ;;  %5008 = vmatmul.mubr.msk.f32.gmra.mrb[130].mxu0 %vm6968_vm4, %v7980_v4  ;;  %v2328_v18 = vpop.f32.mrb[25].mxu0  ;;  %6181 = vmatprep.subr.bf16.mxu1 %v9856_v5  ;;  %v10053_v7 = vld [vmem:[#allocation70_spill] sm:$0xff]  ;;  %v10054_v4 = vld [vmem:[#allocation80_spill] sm:$0xff] }
 0x27b   : > { %2761 = vmatprep.mubr.f32.mxu0 %v7555_v53  ;;  %v2013_v11 = vpop.f32.mrb[44].mxu1  ;;  %v10056_v53 = vld [vmem:[#allocation81_spill] sm:$0xff] }
 0x27c   : > { %v8288_v36 = vadd.f32 %v2318_v59, %v2013_v11  ;;  %v2015_v45 = vpop.f32.mrb[45].mxu1  ;;  %5710 = vmatmul.mubr.msk.f32.gmra.mrb[150].mxu1 %vm1203_vm3, %v10053_v7  ;;  %v3309_v59 = vld [vmem:[#allocation8 + $0x3d0] sm:$0xff] }
 0x27d   : > { %v5589_v19 = vpop.f32.mrb[26].mxu0  ;;  %5712 = vmatprep.mubr.f32.mxu1 %v10054_v4  ;;  %6183 = vmatpush1.bf16.msra.mxu1 %v6182_v41  ;;  %v10058_v41 = vld [vmem:[#allocation95_spill] sm:$0xff]  ;;  %v6188_v28 = vpack.c.bf16 %v3310_v1, %v3309_v59 }
 0x27e   : > { %10052 = vst [vmem:[#allocation33_spill] sm:$0xff] %v8288_v36  ;;  %2762 = vmatmul.mubr.f32.gmra.mrb[132].mxu0 %v7993_v33  ;;  %v2338_v52 = vpop.f32.mrb[27].mxu0  ;;  %6184 = vmatprep.subr.bf16.mxu1 %v9856_v5  ;;  %v10057_v36 = vld [vmem:[#allocation74_spill] sm:$0xff]  ;;  %v10062_v59 = vld [vmem:[#allocation99_spill] sm:$0xff] }
 0x27f   : > { %5009 = vmatprep.mubr.msk.f32.mxu0 %vm958_vm2, %v7576_v27  ;;  %v2018_v34 = vpop.f32.mrb[46].mxu1 }
 0x280   : > { %v8298_v11 = vadd.f32 %v5583_v58, %v2018_v34  ;;  %v2020_v45 = vpop.f32.mrb[47].mxu1  ;;  %5713 = vmatmul.mubr.f32.gmra.mrb[152].mxu1 %v10056_v53  ;;  %v3311_v58 = vld [vmem:[#allocation8 + $0x3e0] sm:$0xff]  ;;  %v3312_v34 = vld [vmem:[#allocation8 + $0x3e8] sm:$0xff] }
 0x281   : > { %v8301_v33 = vpop.f32.mrb[28].mxu0  ;;  %5715 = vmatprep.mubr.msk.f32.mxu1 %vm1203_vm3, %v10057_v36  ;;  %6186 = vmatpush1.bf16.msra.mxu1 %v6185_v46  ;;  %v10060_v53 = vld [vmem:[#allocation86_spill] sm:$0xff]  ;;  %v6191_v1 = vpack.c.bf16 %v3312_v34, %v3311_v58  ;;  %v10067_v34 = vld [vmem:[#allocation97_spill] sm:$0xff] }
 0x282   : > { %10055 = vst [vmem:[#allocation34_spill] sm:$0xff] %v8298_v11  ;;  %2767 = vmatmul.mubr.f32.gmra.mrb[134].mxu0 %v8005_v57  ;;  %v2348_v27 = vpop.f32.mrb[29].mxu0  ;;  %6187 = vmatprep.subr.bf16.mxu1 %v9856_v5  ;;  %v10061_v36 = vld [vmem:[#allocation90_spill] sm:$0xff] }
 0x283   : > { %5010 = vmatprep.mubr.msk.f32.mxu0 %vm953_vm0, %v10058_v41  ;;  %v2023_v0 = vpop.f32.mrb[48].mxu1 }
 0x284   : > { %v8310_v45 = vadd.f32 %v2328_v18, %v2023_v0  ;;  %v2025_v11 = vpop.f32.mrb[49].mxu1  ;;  %5716 = vmatmul.mubr.f32.gmra.mrb[154].mxu1 %v10060_v53  ;;  %v3313_v18 = vld [vmem:[#allocation8 + $0x3f0] sm:$0xff]  ;;  %v10064_v53 = vld [vmem:[#allocation85_spill] sm:$0xff] }
 0x285   : > { %v8313_v57 = vpop.f32.mrb[30].mxu0  ;;  %5718 = vmatprep.mubr.f32.mxu1 %v10061_v36  ;;  %6189 = vmatpush1.bf16.msra.mxu1 %v6188_v28  ;;  %v3314_v11 = vld [vmem:[#allocation8 + $0x3f8] sm:$0xff] }
 0x286   : > { %10059 = vst [vmem:[#allocation29_spill] sm:$0xff] %v8310_v45  ;;  %5012 = vmatmul.mubr.msk.f32.gmra.mrb[136].mxu0 %vm6968_vm4, %v8016_v35  ;;  %v2358_v46 = vpop.f32.mrb[31].mxu0  ;;  %6190 = vmatprep.subr.bf16.mxu1 %v9856_v5  ;;  %v10065_v35 = vld [vmem:[#allocation96_spill] sm:$0xff]  ;;  %v6194_v28 = vpack.c.bf16 %v3314_v11, %v3313_v18  ;;  %v10070_v18 = vld [vmem:[#allocation102_spill] sm:$0xff] }
 0x287   : > { %2776 = vmatprep.mubr.f32.mxu0 %v10062_v59  ;;  %v2028_v41 = vpop.f32.mrb[50].mxu1 }
 0x288   : > { %v8321_v0 = vadd.f32 %v5586_v26, %v2028_v41  ;;  %v2030_v45 = vpop.f32.mrb[51].mxu1  ;;  %5719 = vmatmul.mubr.msk.f32.gmra.mrb[156].mxu1 %vm1203_vm3, %v10064_v53 }
 0x289   : > { %v8325_v4 = vpop.f32.mrb[32].mxu0  ;;  %5721 = vmatprep.mubr.f32.mxu1 %v10065_v35  ;;  %6192 = vmatpush1.bf16.msra.mxu1 %v6191_v1 }
 0x28a   : > { %10063 = vst [vmem:[#allocation38_spill] sm:$0xff] %v8321_v0  ;;  %2777 = vmatmul.mubr.f32.gmra.mrb[138].mxu0 %v8029_v3  ;;  %v2368_v59 = vpop.f32.mrb[33].mxu0  ;;  %6193 = vmatprep.subr.bf16.mxu1 %v9856_v5  ;;  %v10068_v3 = vld [vmem:[#allocation93_spill] sm:$0xff] }
 0x28b   : > { %5013 = vmatprep.mubr.msk.f32.mxu0 %vm958_vm2, %v7622_v40  ;;  %v2033_v58 = vpop.f32.mrb[52].mxu1  ;;  %v10073_v40 = vld [vmem:[#allocation104_spill] sm:$0xff] }
 0x28c   : > { %v8333_v26 = vadd.f32 %v2338_v52, %v2033_v58  ;;  %v2035_v41 = vpop.f32.mrb[53].mxu1  ;;  %5722 = vmatmul.mubr.f32.gmra.mrb[158].mxu1 %v10067_v34  ;;  %v10071_v58 = vld [vmem:[#allocation144_spill] sm:$0xff] }
 0x28d   : > { %v8336_v45 = vpop.f32.mrb[34].mxu0  ;;  %5724 = vmatprep.mubr.msk.f32.mxu1 %vm1203_vm3, %v10068_v3  ;;  %6195 = vmatpush1.bf16.msra.mxu1 %v6194_v28  ;;  %v10072_v41 = vld [vmem:[#allocation105_spill] sm:$0xff] }
 0x28e   : > { %10066 = vst [vmem:[#allocation44_spill] sm:$0xff] %v8333_v26  ;;  %2782 = vmatmul.mubr.f32.gmra.mrb[140].mxu0 %v8041_v62  ;;  %v8341_v0 = vpop.f32.mrb[35].mxu0  ;;  %v10077_v26 = vld [vmem:[#allocation107_spill] sm:$0xff] }
 0x28f   : > { %5014 = vmatprep.mubr.msk.f32.mxu0 %vm953_vm0, %v7655_v12  ;;  %v2038_v5 = vpop.f32.mrb[54].mxu1 }
 0x290   : > { %v8346_v52 = vadd.f32 %v5589_v19, %v2038_v5  ;;  %v2040_v1 = vpop.f32.mrb[55].mxu1  ;;  %5725 = vmatmul.mubr.f32.gmra.mrb[160].mxu1 %v10070_v18  ;;  %v10075_v5 = vld [vmem:[#allocation101_spill] sm:$0xff] }
 0x291   : > { %v8349_v11 = vpop.f32.mrb[36].mxu0  ;;  %5727 = vmatprep.mubr.f32.mxu1 %v10072_v41 }
 0x292   : > { %10069 = vst [vmem:[#allocation41_spill] sm:$0xff] %v8346_v52  ;;  %5016 = vmatmul.mubr.msk.f32.gmra.mrb[142].mxu0 %vm6968_vm4, %v10071_v58  ;;  %v8355_v62 = vpop.f32.mrb[37].mxu0  ;;  %v10076_v52 = vld [vmem:[#allocation111_spill] sm:$0xff] }
 0x293   : > { %2791 = vmatprep.mubr.f32.mxu0 %v10073_v40  ;;  %v2043_v12 = vpop.f32.mrb[56].mxu1 }
 0x294   : > { %v8358_v28 = vadd.f32 %v2348_v27, %v2043_v12  ;;  %v2045_v19 = vpop.f32.mrb[57].mxu1  ;;  %5728 = vmatmul.mubr.msk.f32.gmra.mrb[162].mxu1 %vm1203_vm3, %v10075_v5 }
 0x295   : > { %v8362_v1 = vpop.f32.mrb[38].mxu0  ;;  %5730 = vmatprep.mubr.f32.mxu1 %v10076_v52  ;;  %v10079_v19 = vld [vmem:[#allocation112_spill] sm:$0xff] }
 0x296   : > { %10074 = vst [vmem:[#allocation49_spill] sm:$0xff] %v8358_v28  ;;  %2792 = vmatmul.mubr.f32.gmra.mrb[144].mxu0 %v8065_v37  ;;  %v8366_v58 = vpop.f32.mrb[39].mxu0  ;;  %v10080_v37 = vld [vmem:[#allocation108_spill] sm:$0xff] }
 0x297   : > { %5017 = vmatprep.mubr.msk.f32.mxu0 %vm958_vm2, %v10077_v26  ;;  %v2048_v40 = vpop.f32.mrb[58].mxu1 }
 0x298   : > { %v8372_v27 = vadd.f32 %v8301_v33, %v2048_v40  ;;  %v2050_v12 = vpop.f32.mrb[59].mxu1  ;;  %5731 = vmatmul.mubr.f32.gmra.mrb[164].mxu1 %v10079_v19  ;;  %v10082_v33 = vld [vmem:[#allocation117_spill] sm:$0xff] }
 0x299   : > { %v8375_v28 = vpop.f32.mrb[40].mxu0  ;;  %5733 = vmatprep.mubr.msk.f32.mxu1 %vm1203_vm3, %v10080_v37 }
 0x29a   : > { %10078 = vst [vmem:[#allocation50_spill] sm:$0xff] %v8372_v27  ;;  %2797 = vmatmul.mubr.f32.gmra.mrb[146].mxu0 %v8077_v23  ;;  %v8380_v52 = vpop.f32.mrb[41].mxu0  ;;  %v10083_v23 = vld [vmem:[#allocation120_spill] sm:$0xff] }
 0x29b   : > { %5018 = vmatprep.mubr.msk.f32.mxu0 %vm953_vm0, %v7709_v47  ;;  %v2053_v26 = vpop.f32.mrb[60].mxu1 }
 0x29c   : > { %v8385_v5 = vadd.f32 %v2358_v46, %v2053_v26  ;;  %v2055_v40 = vpop.f32.mrb[61].mxu1  ;;  %5734 = vmatmul.mubr.f32.gmra.mrb[166].mxu1 %v10082_v33  ;;  %v10085_v26 = vld [vmem:[#allocation116_spill] sm:$0xff] }
 0x29d   : > { %v8388_v12 = vpop.f32.mrb[42].mxu0  ;;  %5736 = vmatprep.mubr.f32.mxu1 %v10083_v23 }
 0x29e   : > { %10081 = vst [vmem:[#allocation45_spill] sm:$0xff] %v8385_v5  ;;  %5020 = vmatmul.mubr.msk.f32.gmra.mrb[148].mxu0 %vm6968_vm4, %v8088_v42  ;;  %v8394_v27 = vpop.f32.mrb[43].mxu0  ;;  %v10086_v5 = vld [vmem:[#allocation126_spill] sm:$0xff] }
 0x29f   : > { %2806 = vmatprep.mubr.f32.mxu0 %v7741_v60  ;;  %v2058_v37 = vpop.f32.mrb[62].mxu1 }
 0x2a0   : > { %v8398_v47 = vadd.f32 %v8313_v57, %v2058_v37  ;;  %v2060_v46 = vpop.f32.mrb[63].mxu1  ;;  %5737 = vmatmul.mubr.msk.f32.gmra.mrb[168].mxu1 %vm1203_vm3, %v10085_v26  ;;  %v10088_v37 = vld [vmem:[#allocation127_spill] sm:$0xff] }
 0x2a1   : > { %v8402_v40 = vpop.f32.mrb[44].mxu0  ;;  %5739 = vmatprep.mubr.f32.mxu1 %v10086_v5 }
 0x2a2   : > { %10084 = vst [vmem:[#allocation56_spill] sm:$0xff] %v8398_v47  ;;  %2807 = vmatmul.mubr.f32.gmra.mrb[150].mxu0 %v8101_v10  ;;  %v8406_v42 = vpop.f32.mrb[45].mxu0  ;;  %v10089_v47 = vld [vmem:[#allocation123_spill] sm:$0xff] }
 0x2a3   : > { %5021 = vmatprep.mubr.msk.f32.mxu0 %vm958_vm2, %v7731_v9  ;;  %v2063_v60 = vpop.f32.mrb[64].mxu1 }
 0x2a4   : > { %v8411_v23 = vadd.f32 %v2368_v59, %v2063_v60  ;;  %v2065_v57 = vpop.f32.mrb[65].mxu1  ;;  %5740 = vmatmul.mubr.f32.gmra.mrb[170].mxu1 %v10088_v37 }
 0x2a5   : > { %v8414_v46 = vpop.f32.mrb[46].mxu0  ;;  %5742 = vmatprep.mubr.msk.f32.mxu1 %vm1203_vm3, %v10089_v47  ;;  %v10091_v57 = vld [vmem:[#allocation132_spill] sm:$0xff] }
 0x2a6   : > { %10087 = vst [vmem:[#allocation62_spill] sm:$0xff] %v8411_v23  ;;  %2812 = vmatmul.mubr.f32.gmra.mrb[152].mxu0 %v8113_v55  ;;  %v8419_v10 = vpop.f32.mrb[47].mxu0  ;;  %v10092_v55 = vld [vmem:[#allocation133_spill] sm:$0xff] }
 0x2a7   : > { %5022 = vmatprep.mubr.msk.f32.mxu0 %vm953_vm0, %v7763_v56  ;;  %v2068_v9 = vpop.f32.mrb[66].mxu1 }
 0x2a8   : > { %v8425_v60 = vadd.f32 %v8325_v4, %v2068_v9  ;;  %v2070_v59 = vpop.f32.mrb[67].mxu1  ;;  %5743 = vmatmul.mubr.f32.gmra.mrb[172].mxu1 %v10091_v57  ;;  %v10094_v4 = vld [vmem:[#allocation131_spill] sm:$0xff] }
 0x2a9   : > { %v8428_v23 = vpop.f32.mrb[48].mxu0  ;;  %5745 = vmatprep.mubr.f32.mxu1 %v10092_v55 }
 0x2aa   : > { %10090 = vst [vmem:[#allocation57_spill] sm:$0xff] %v8425_v60  ;;  %5024 = vmatmul.mubr.msk.f32.gmra.mrb[154].mxu0 %vm6968_vm4, %v8124_v6  ;;  %v8434_v47 = vpop.f32.mrb[49].mxu0  ;;  %v10095_v60 = vld [vmem:[#allocation21_spill] sm:$0xff] }
 0x2ab   : > { %2821 = vmatprep.mubr.f32.mxu0 %v7775_v43  ;;  %v2073_v56 = vpop.f32.mrb[68].mxu1  ;;  %v10096_v43 = vld [vmem:[#allocation36_spill] sm:$0xff] }
 0x2ac   : > { %v8438_v37 = vadd.f32 %v8341_v0, %v2073_v56  ;;  %v2075_v9 = vpop.f32.mrb[69].mxu1  ;;  %5746 = vmatmul.mubr.msk.f32.gmra.mrb[174].mxu1 %vm1203_vm3, %v10094_v4 }
 0x2ad   : > { %v8442_v59 = vpop.f32.mrb[50].mxu0  ;;  %5041 = vmatprep.mubr.msk.f32.mxu1 %vm953_vm0, %v10095_v60  ;;  %v10097_v60 = vld [vmem:[#allocation26_spill] sm:$0xff] }
 0x2ae   : > { %10093 = vst [vmem:[#allocation65_spill] sm:$0xff] %v8438_v37  ;;  %2822 = vmatmul.mubr.f32.gmra.mrb[156].mxu0 %v8137_v29  ;;  %v8448_v6 = vpop.f32.mrb[51].mxu0 }
 0x2af   : > { %5025 = vmatprep.mubr.msk.f32.mxu0 %vm958_vm2, %v7794_v16  ;;  %v2078_v56 = vpop.f32.mrb[70].mxu1 }
 0x2b0   : > { %v8454_v0 = vadd.f32 %v8336_v45, %v2078_v56  ;;  %v2080_v9 = vpop.f32.mrb[71].mxu1  ;;  %5043 = vmatmul.mubr.msk.f32.vlgmr.msra.gmra.mrb[176].mxu1 %vm6968_vm4, %v10096_v43  ;;  %v10098_v56 = vld [vmem:[#allocation43_spill] sm:$0xff]  ;;  %v10099_v43 = vld [vmem:[#allocation25_spill] sm:$0xff] }
 0x2b1   : > { %v8459_v29 = vpop.f32.mrb[52].mxu0  ;;  %3400 = vmatprep.mubr.f32.mxu1 %v10097_v60 }
 0x2b2   : > { %2827 = vmatmul.mubr.f32.gmra.mrb[158].mxu0 %v8149_v63  ;;  %v8463_v37 = vpop.f32.mrb[53].mxu0  ;;  %v10101_v63 = vld [vmem:[#allocation32_spill] sm:$0xff] }
 0x2b3   : > { %5780 = vmatprep.mubr.f32.mxu0 %v10028_v13  ;;  %v2083_v16 = vpop.f32.mrb[72].mxu1 }
 0x2b4   : > { %v8467_v4 = vadd.f32 %v8355_v62, %v2083_v16  ;;  %v2085_v45 = vpop.f32.mrb[73].mxu1  ;;  %3401 = vmatmul.mubr.f32.gmra.mrb[178].mxu1 %v10098_v56 }
 0x2b5   : > { %v8470_v9 = vpop.f32.mrb[54].mxu0  ;;  %5044 = vmatprep.mubr.msk.f32.mxu1 %vm958_vm2, %v10099_v43  ;;  %v10100_v45 = vld [vmem:[#allocation47_spill] sm:$0xff] }
 0x2b6   : > { %5781 = vmatmul.mubr.f32.vlgmr.msra.gmra.mrb[160].mxu0 %v10029_v15  ;;  %v8476_v60 = vpop.f32.mrb[55].mxu0 }
 0x2b7   : > { %5783 = vmatprep.mubr.msk.f32.mxu0 %vm1203_vm3, %v10030_v39  ;;  %v2088_v13 = vpop.f32.mrb[74].mxu1 }
 0x2b8   : > { %v8481_v16 = vadd.f32 %v8349_v11, %v2088_v13  ;;  %v2090_v62 = vpop.f32.mrb[75].mxu1  ;;  %3406 = vmatmul.mubr.f32.gmra.mrb[180].mxu1 %v10100_v45  ;;  %v10102_v13 = vld [vmem:[#allocation53_spill] sm:$0xff]  ;;  %v10103_v45 = vld [vmem:[#allocation30_spill] sm:$0xff] }
 0x2b9   : > { %v8484_v56 = vpop.f32.mrb[56].mxu0  ;;  %5045 = vmatprep.mubr.msk.f32.mxu1 %vm953_vm0, %v10101_v63 }
 0x2ba   : > { %5784 = vmatmul.mubr.f32.gmra.mrb[162].mxu0 %v10031_v14  ;;  %v8490_v15 = vpop.f32.mrb[57].mxu0 }
 0x2bb   : > { %5786 = vmatprep.mubr.f32.mxu0 %v10032_v31  ;;  %v2093_v39 = vpop.f32.mrb[76].mxu1 }
 0x2bc   : > { %v8494_v43 = vadd.f32 %v8366_v58, %v2093_v39  ;;  %v2095_v11 = vpop.f32.mrb[77].mxu1  ;;  %5047 = vmatmul.mubr.msk.f32.gmra.mrb[182].mxu1 %vm6968_vm4, %v10102_v13  ;;  %v10104_v39 = vld [vmem:[#allocation60_spill] sm:$0xff]  ;;  %v10105_v13 = vld [vmem:[#allocation37_spill] sm:$0xff] }
 0x2bd   : > { %v8499_v62 = vpop.f32.mrb[58].mxu0  ;;  %3415 = vmatprep.mubr.f32.mxu1 %v10103_v45 }
 0x2be   : > { %5787 = vmatmul.mubr.msk.f32.gmra.mrb[164].mxu0 %vm1203_vm3, %v10033_v30  ;;  %v8504_v63 = vpop.f32.mrb[59].mxu0 }
 0x2bf   : > { %5789 = vmatprep.mubr.f32.mxu0 %v10034_v22  ;;  %v2098_v31 = vpop.f32.mrb[78].mxu1 }
 0x2c0   : > { %v8508_v14 = vadd.f32 %v8362_v1, %v2098_v31  ;;  %v2100_v58 = vpop.f32.mrb[79].mxu1  ;;  %3416 = vmatmul.mubr.f32.gmra.mrb[184].mxu1 %v10104_v39  ;;  %v10106_v31 = vld [vmem:[#allocation64_spill] sm:$0xff]  ;;  %v10107_v39 = vld [vmem:[#allocation35_spill] sm:$0xff] }
 0x2c1   : > { %v8511_v11 = vpop.f32.mrb[60].mxu0  ;;  %5048 = vmatprep.mubr.msk.f32.mxu1 %vm958_vm2, %v10105_v13 }
 0x2c2   : > { %5790 = vmatmul.mubr.f32.gmra.mrb[166].mxu0 %v10036_v51  ;;  %v8517_v30 = vpop.f32.mrb[61].mxu0 }
 0x2c3   : > { %5792 = vmatprep.mubr.msk.f32.mxu0 %vm1203_vm3, %v10038_v61  ;;  %v2103_v22 = vpop.f32.mrb[80].mxu1 }
 0x2c4   : > { %v8522_v1 = vadd.f32 %v8380_v52, %v2103_v22  ;;  %v2105_v45 = vpop.f32.mrb[81].mxu1  ;;  %3421 = vmatmul.mubr.f32.gmra.mrb[186].mxu1 %v10106_v31 }
 0x2c5   : > { %v8525_v58 = vpop.f32.mrb[62].mxu0  ;;  %5049 = vmatprep.mubr.msk.f32.mxu1 %vm953_vm0, %v10107_v39  ;;  %v10109_v45 = vld [vmem:[#allocation69_spill] sm:$0xff]  ;;  %v10110_v39 = vld [vmem:[#allocation42_spill] sm:$0xff] }
 0x2c6   : > { %5793 = vmatmul.mubr.f32.gmra.mrb[168].mxu0 %v10040_v49  ;;  %v8531_v51 = vpop.f32.mrb[63].mxu0 }
 0x2c7   : > { %5795 = vmatprep.mubr.f32.mxu0 %v10041_v44  ;;  %v2108_v61 = vpop.f32.mrb[82].mxu1 }
 0x2c8   : > { %v8535_v13 = vadd.f32 %v8375_v28, %v2108_v61  ;;  %v2110_v52 = vpop.f32.mrb[83].mxu1  ;;  %5051 = vmatmul.mubr.msk.f32.gmra.mrb[188].mxu1 %vm6968_vm4, %v10109_v45 }
 0x2c9   : > { %v2593_v22 = vpop.f32.mrb[64].mxu0  ;;  %3430 = vmatprep.mubr.f32.mxu1 %v10110_v39 }
 0x2ca   : > { %10108 = vst [vmem:[#allocation67_spill] sm:$0xff] %v8535_v13  ;;  %v8541_v31 = vadd.f32 %v2593_v22, %v8244_v38  ;;  %5796 = vmatmul.mubr.msk.f32.gmra.mrb[170].mxu0 %vm1203_vm3, %v10044_v8  ;;  %v2595_v49 = vpop.f32.mrb[65].mxu0  ;;  %v10111_v13 = vld [vmem:[#allocation76_spill] sm:$0xff] }
 0x2cb   : > { %5798 = vmatprep.mubr.f32.mxu0 %v10045_v24  ;;  %v2113_v44 = vpop.f32.mrb[84].mxu1  ;;  %v10112_v38 = vld [vmem:[#allocation40_spill] sm:$0xff]  ;;  %v10114_v49 = vld [vmem:[#allocation73_spill] sm:$0xff] }
 0x2cc   : > { %v8548_v28 = vadd.f32 %v8394_v27, %v2113_v44  ;;  %v2115_v61 = vpop.f32.mrb[85].mxu1  ;;  %3431 = vmatmul.mubr.f32.gmra.mrb[190].mxu1 %v10111_v13  ;;  %v10113_v13 = vld [vmem:[#allocation48_spill] sm:$0xff] }
 0x2cd   : > { %v2598_v52 = vpop.f32.mrb[66].mxu0  ;;  %5052 = vmatprep.mubr.msk.f32.mxu1 %vm958_vm2, %v10112_v38 }
 0x2ce   : > { %v8552_v45 = vadd.f32 %v2598_v52, %v8239_v50  ;;  %5799 = vmatmul.mubr.f32.gmra.mrb[172].mxu0 %v10047_v20  ;;  %v2600_v8 = vpop.f32.mrb[67].mxu0  ;;  %v10115_v52 = vld [vmem:[#allocation84_spill] sm:$0xff] }
 0x2cf   : > { %5801 = vmatprep.mubr.msk.f32.mxu0 %vm1203_vm3, %v10048_v2  ;;  %v2118_v24 = vpop.f32.mrb[86].mxu1  ;;  %v10117_v8 = vld [vmem:[#allocation46_spill] sm:$0xff] }
 0x2d0   : > { %v8561_v27 = vadd.f32 %v8388_v12, %v2118_v24  ;;  %v2120_v22 = vpop.f32.mrb[87].mxu1  ;;  %3436 = vmatmul.mubr.f32.gmra.mrb[192].mxu1 %v10005_v21  ;;  %v10116_v21 = vld [vmem:[#allocation23_spill] sm:$0xff] }
 0x2d1   : > { %v2603_v39 = vpop.f32.mrb[68].mxu0  ;;  %5053 = vmatprep.mubr.msk.f32.mxu1 %vm953_vm0, %v10113_v13  ;;  %v10119_v13 = vld [vmem:[#allocation91_spill] sm:$0xff] }
 0x2d2   : > { %v8565_v50 = vadd.f32 %v2603_v39, %v8255_v17  ;;  %5802 = vmatmul.mubr.f32.gmra.mrb[174].mxu0 %v10050_v48  ;;  %v2605_v20 = vpop.f32.mrb[69].mxu0  ;;  %v10118_v48 = vld [vmem:[#allocation80_spill] sm:$0xff] }
 0x2d3   : > { %5804 = vmatprep.mubr.f32.mxu0 %v10114_v49  ;;  %v2123_v2 = vpop.f32.mrb[88].mxu1  ;;  %v10120_v20 = vld [vmem:[#allocation28_spill] sm:$0xff] }
 0x2d4   : > { %v8573_v12 = vadd.f32 %v8406_v42, %v2123_v2  ;;  %v2125_v44 = vpop.f32.mrb[89].mxu1  ;;  %5055 = vmatmul.mubr.msk.f32.gmra.mrb[194].mxu1 %vm6968_vm4, %v10115_v52 }
 0x2d5   : > { %v2608_v61 = vpop.f32.mrb[70].mxu0  ;;  %3445 = vmatprep.mubr.f32.mxu1 %v10117_v8  ;;  %v10121_v44 = vld [vmem:[#allocation54_spill] sm:$0xff] }
 0x2d6   : > { %v8579_v17 = vadd.f32 %v2608_v61, %v10116_v21  ;;  %v2610_v38 = vpop.f32.mrb[71].mxu0  ;;  %5805 = vmatmul.mubr.msk.f32.gmra.mrb[176].mxu0 %vm1203_vm3, %v10053_v7  ;;  %v10122_v61 = vld [vmem:[#allocation81_spill] sm:$0xff]  ;;  %v10123_v7 = vld [vmem:[#allocation74_spill] sm:$0xff] }
 0x2d7   : > { %5807 = vmatprep.mubr.f32.mxu0 %v10118_v48  ;;  %v2128_v24 = vpop.f32.mrb[90].mxu1  ;;  %v10124_v8 = vld [vmem:[#allocation94_spill] sm:$0xff]  ;;  %v10125_v48 = vld [vmem:[#allocation24_spill] sm:$0xff] }
 0x2d8   : > { %v8586_v42 = vadd.f32 %v8402_v40, %v2128_v24  ;;  %v2130_v22 = vpop.f32.mrb[91].mxu1  ;;  %3446 = vmatmul.mubr.f32.gmra.mrb[196].mxu1 %v10119_v13  ;;  %v10127_v13 = vld [vmem:[#allocation86_spill] sm:$0xff] }
 0x2d9   : > { %v2613_v39 = vpop.f32.mrb[72].mxu0  ;;  %5056 = vmatprep.mubr.msk.f32.mxu1 %vm958_vm2, %v10121_v44 }
 0x2da   : > { %v8590_v49 = vadd.f32 %v2613_v39, %v10120_v20  ;;  %v2615_v2 = vpop.f32.mrb[73].mxu0  ;;  %5808 = vmatmul.mubr.f32.gmra.mrb[178].mxu0 %v10122_v61  ;;  %v10126_v39 = vld [vmem:[#allocation52_spill] sm:$0xff] }
 0x2db   : > { %5810 = vmatprep.mubr.msk.f32.mxu0 %vm1203_vm3, %v10123_v7  ;;  %v2133_v52 = vpop.f32.mrb[92].mxu1  ;;  %v10128_v61 = vld [vmem:[#allocation100_spill] sm:$0xff]  ;;  %v10129_v7 = vld [vmem:[#allocation33_spill] sm:$0xff] }
 0x2dc   : > { %v8599_v40 = vadd.f32 %v8419_v10, %v2133_v52  ;;  %v2135_v21 = vpop.f32.mrb[93].mxu1  ;;  %3451 = vmatmul.mubr.f32.gmra.mrb[198].mxu1 %v10124_v8 }
 0x2dd   : > { %v2618_v38 = vpop.f32.mrb[74].mxu0  ;;  %5057 = vmatprep.mubr.msk.f32.mxu1 %vm953_vm0, %v10126_v39  ;;  %v10132_v39 = vld [vmem:[#allocation34_spill] sm:$0xff] }
 0x2de   : > { %v8603_v24 = vadd.f32 %v2618_v38, %v10125_v48  ;;  %v2620_v22 = vpop.f32.mrb[75].mxu0  ;;  %5811 = vmatmul.mubr.f32.gmra.mrb[180].mxu0 %v10127_v13  ;;  %v10130_v38 = vld [vmem:[#allocation51_spill] sm:$0xff] }
 0x2df   : > { %5813 = vmatprep.mubr.f32.mxu0 %v10061_v36  ;;  %v2138_v20 = vpop.f32.mrb[94].mxu1  ;;  %v10131_v22 = vld [vmem:[#allocation106_spill] sm:$0xff] }
 0x2e0   : > { %v8611_v10 = vadd.f32 %v8414_v46, %v2138_v20  ;;  %v2140_v2 = vpop.f32.mrb[95].mxu1  ;;  %5059 = vmatmul.mubr.msk.f32.gmra.mrb[200].mxu1 %vm6968_vm4, %v10128_v61  ;;  %v10134_v61 = vld [vmem:[#allocation109_spill] sm:$0xff] }
 0x2e1   : > { %v2623_v44 = vpop.f32.mrb[76].mxu0  ;;  %3460 = vmatprep.mubr.f32.mxu1 %v10130_v38  ;;  %v10133_v2 = vld [vmem:[#allocation39_spill] sm:$0xff] }
 0x2e2   : > { %v8617_v52 = vadd.f32 %v2623_v44, %v10129_v7  ;;  %v2625_v21 = vpop.f32.mrb[77].mxu0  ;;  %5814 = vmatmul.mubr.msk.f32.gmra.mrb[182].mxu0 %vm1203_vm3, %v10064_v53  ;;  %v10135_v7 = vld [vmem:[#allocation29_spill] sm:$0xff] }
 0x2e3   : > { %5816 = vmatprep.mubr.f32.mxu0 %v10065_v35  ;;  %v2143_v36 = vpop.f32.mrb[96].mxu1 }
 0x2e4   : > { %v8624_v46 = vadd.f32 %v8434_v47, %v2143_v36  ;;  %v2145_v8 = vpop.f32.mrb[97].mxu1  ;;  %3461 = vmatmul.mubr.f32.gmra.mrb[202].mxu1 %v10131_v22  ;;  %v10136_v36 = vld [vmem:[#allocation55_spill] sm:$0xff]  ;;  %v10138_v22 = vld [vmem:[#allocation38_spill] sm:$0xff] }
 0x2e5   : > { %v2628_v48 = vpop.f32.mrb[78].mxu0  ;;  %5060 = vmatprep.mubr.msk.f32.mxu1 %vm958_vm2, %v10133_v2  ;;  %v10139_v2 = vld [vmem:[#allocation59_spill] sm:$0xff] }
 0x2e6   : > { %v8628_v13 = vadd.f32 %v2628_v48, %v10132_v39  ;;  %v2630_v20 = vpop.f32.mrb[79].mxu0  ;;  %5817 = vmatmul.mubr.f32.gmra.mrb[184].mxu0 %v10067_v34  ;;  %v10137_v48 = vld [vmem:[#allocation115_spill] sm:$0xff] }
 0x2e7   : > { %5819 = vmatprep.mubr.msk.f32.mxu0 %vm1203_vm3, %v10068_v3  ;;  %v2148_v53 = vpop.f32.mrb[98].mxu1 }
 0x2e8   : > { %v8637_v47 = vadd.f32 %v8428_v23, %v2148_v53  ;;  %v2150_v35 = vpop.f32.mrb[99].mxu1  ;;  %3466 = vmatmul.mubr.f32.gmra.mrb[204].mxu1 %v10134_v61  ;;  %v10140_v53 = vld [vmem:[#allocation101_spill] sm:$0xff] }
 0x2e9   : > { %v2633_v44 = vpop.f32.mrb[80].mxu0  ;;  %5061 = vmatprep.mubr.msk.f32.mxu1 %vm953_vm0, %v10136_v36  ;;  %v10142_v61 = vld [vmem:[#allocation121_spill] sm:$0xff] }
 0x2ea   : > { %v8641_v21 = vadd.f32 %v2633_v44, %v10135_v7  ;;  %v2635_v38 = vpop.f32.mrb[81].mxu0  ;;  %5820 = vmatmul.mubr.f32.gmra.mrb[186].mxu0 %v10070_v18  ;;  %v10141_v18 = vld [vmem:[#allocation111_spill] sm:$0xff]  ;;  %v10143_v7 = vld [vmem:[#allocation44_spill] sm:$0xff] }
 0x2eb   : > { %5822 = vmatprep.mubr.f32.mxu0 %v10072_v41  ;;  %v2153_v3 = vpop.f32.mrb[100].mxu1 }
 0x2ec   : > { %v8649_v23 = vadd.f32 %v8448_v6, %v2153_v3  ;;  %v2155_v34 = vpop.f32.mrb[101].mxu1  ;;  %5063 = vmatmul.mubr.msk.f32.gmra.mrb[206].mxu1 %vm6968_vm4, %v10137_v48  ;;  %v10144_v3 = vld [vmem:[#allocation61_spill] sm:$0xff]  ;;  %v1517_v48 = vld [vmem:[#allocation9 + $0x8] sm:$0xff] }
 0x2ed   : > { %v2638_v8 = vpop.f32.mrb[82].mxu0  ;;  %3475 = vmatprep.mubr.f32.mxu1 %v10139_v2  ;;  %v10145_v34 = vld [vmem:[#allocation108_spill] sm:$0xff] }
 0x2ee   : > { %v8655_v39 = vadd.f32 %v2638_v8, %v10138_v22  ;;  %v2640_v20 = vpop.f32.mrb[83].mxu0  ;;  %5823 = vmatmul.mubr.msk.f32.gmra.mrb[188].mxu0 %vm1203_vm3, %v10140_v53  ;;  %v10146_v53 = vld [vmem:[#allocation125_spill] sm:$0xff] }
 0x2ef   : > { %5825 = vmatprep.mubr.f32.mxu0 %v10141_v18  ;;  %v2158_v41 = vpop.f32.mrb[102].mxu1 }
 0x2f0   : > { %v8662_v6 = vadd.f32 %v8442_v59, %v2158_v41  ;;  %v2160_v35 = vpop.f32.mrb[103].mxu1  ;;  %3476 = vmatmul.mubr.f32.gmra.mrb[208].mxu1 %v10142_v61  ;;  %v1516_v59 = vld [vmem:[#allocation9] sm:$0xff]  ;;  %v10147_v41 = vld [vmem:[#allocation41_spill] sm:$0xff]  ;;  %v10148_v61 = vld [vmem:[#allocation63_spill] sm:$0xff] }
 0x2f1   : > { %v2643_v44 = vpop.f32.mrb[84].mxu0  ;;  %5064 = vmatprep.mubr.msk.f32.mxu1 %vm958_vm2, %v10144_v3  ;;  %v6228_v18 = vpack.c.bf16 %v1517_v48, %v1516_v59  ;;  %v10150_v59 = vld [vmem:[#allocation130_spill] sm:$0xff] }
 0x2f2   : > { %v8666_v38 = vadd.f32 %v2643_v44, %v10143_v7  ;;  %v2645_v36 = vpop.f32.mrb[85].mxu0  ;;  %5826 = vmatmul.mubr.f32.gmra.mrb[190].mxu0 %v10079_v19  ;;  %v10149_v19 = vld [vmem:[#allocation120_spill] sm:$0xff] }
 0x2f3   : > { %5828 = vmatprep.mubr.msk.f32.mxu0 %vm1203_vm3, %v10145_v34  ;;  %v2163_v8 = vpop.f32.mrb[104].mxu1  ;;  %6229 = vmatprep.subr.bf16.mxu0 %v6228_v18  ;;  %v1518_v7 = vld [vmem:[#allocation9 + $0x10] sm:$0xff]  ;;  %v1519_v36 = vld [vmem:[#allocation9 + $0x18] sm:$0xff] }
 0x2f4   : > { %v8675_v22 = vadd.f32 %v8463_v37, %v2163_v8  ;;  %v2165_v20 = vpop.f32.mrb[105].mxu1  ;;  %3481 = vmatmul.mubr.f32.gmra.mrb[210].mxu1 %v10146_v53  ;;  %6231 = vmatpush3.bf16.msra.mxu0 %v6228_v18  ;;  %v6232_v48 = vpack.c.bf16 %v1519_v36, %v1518_v7  ;;  %v10152_v53 = vld [vmem:[#allocation68_spill] sm:$0xff]  ;;  %v1520_v18 = vld [vmem:[#allocation9 + $0x20] sm:$0xff] }
 0x2f5   : > { %v2648_v2 = vpop.f32.mrb[86].mxu0  ;;  %5065 = vmatprep.mubr.msk.f32.mxu1 %vm953_vm0, %v10148_v61  ;;  %v10151_v20 = vld [vmem:[#allocation49_spill] sm:$0xff]  ;;  %v10154_v36 = vld [vmem:[#allocation50_spill] sm:$0xff] }
 0x2f6   : > { %v8679_v35 = vadd.f32 %v2648_v2, %v10147_v41  ;;  %v2650_v44 = vpop.f32.mrb[87].mxu0  ;;  %5829 = vmatmul.mubr.f32.gmra.mrb[192].mxu0 %v10082_v33  ;;  %6233 = vmatprep.subr.bf16.mxu0 %v6232_v48  ;;  %v1521_v41 = vld [vmem:[#allocation9 + $0x28] sm:$0xff] }
 0x2f7   : > { %5831 = vmatprep.mubr.f32.mxu0 %v10149_v19  ;;  %v2168_v37 = vpop.f32.mrb[106].mxu1  ;;  %v6236_v7 = vpack.c.bf16 %v1521_v41, %v1520_v18  ;;  %v10158_v18 = vld [vmem:[#allocation137_spill] sm:$0xff] }
 0x2f8   : > { %v8687_v3 = vadd.f32 %v8459_v29, %v2168_v37  ;;  %v2170_v34 = vpop.f32.mrb[107].mxu1  ;;  %5067 = vmatmul.mubr.msk.f32.gmra.mrb[212].mxu1 %vm6968_vm4, %v10150_v59  ;;  %6235 = vmatpush3.bf16.msra.mxu0 %v6232_v48  ;;  %v10153_v37 = vld [vmem:[#allocation134_spill] sm:$0xff]  ;;  %v10157_v59 = vld [vmem:[#allocation123_spill] sm:$0xff]  ;;  %v1522_v48 = vld [vmem:[#allocation9 + $0x30] sm:$0xff] }
 0x2f9   : > { %v2653_v8 = vpop.f32.mrb[88].mxu0  ;;  %3490 = vmatprep.mubr.f32.mxu1 %v10152_v53  ;;  %6237 = vmatprep.subr.bf16.mxu0 %v6236_v7 }
 0x2fa   : > { %v8693_v2 = vadd.f32 %v2653_v8, %v10151_v20  ;;  %v2655_v33 = vpop.f32.mrb[89].mxu0  ;;  %5832 = vmatmul.mubr.msk.f32.gmra.mrb[194].mxu0 %vm1203_vm3, %v10085_v26  ;;  %v10155_v26 = vld [vmem:[#allocation66_spill] sm:$0xff]  ;;  %v1523_v20 = vld [vmem:[#allocation9 + $0x38] sm:$0xff] }
 0x2fb   : > { %5834 = vmatprep.mubr.f32.mxu0 %v10086_v5  ;;  %v2173_v29 = vpop.f32.mrb[108].mxu1  ;;  %v10156_v5 = vld [vmem:[#allocation127_spill] sm:$0xff]  ;;  %v6240_v41 = vpack.c.bf16 %v1523_v20, %v1522_v48  ;;  %v10162_v20 = vld [vmem:[#allocation56_spill] sm:$0xff] }
 0x2fc   : > { %v8700_v44 = vadd.f32 %v8476_v60, %v2173_v29  ;;  %v2175_v61 = vpop.f32.mrb[109].mxu1  ;;  %3491 = vmatmul.mubr.f32.gmra.mrb[214].mxu1 %v10153_v37  ;;  %6239 = vmatpush3.bf16.msra.mxu0 %v6236_v7  ;;  %v1524_v7 = vld [vmem:[#allocation9 + $0x40] sm:$0xff] }
 0x2fd   : > { %v2658_v19 = vpop.f32.mrb[90].mxu0  ;;  %5068 = vmatprep.mubr.msk.f32.mxu1 %vm958_vm2, %v10155_v26  ;;  %v10159_v61 = vld [vmem:[#allocation45_spill] sm:$0xff]  ;;  %6241 = vmatprep.subr.bf16.mxu0 %v6240_v41 }
 0x2fe   : > { %v8704_v34 = vadd.f32 %v2658_v19, %v10154_v36  ;;  %v2660_v8 = vpop.f32.mrb[91].mxu0  ;;  %5835 = vmatmul.mubr.f32.gmra.mrb[196].mxu0 %v10156_v5  ;;  %v10160_v36 = vld [vmem:[#allocation72_spill] sm:$0xff] }
 0x2ff   : > { %5837 = vmatprep.mubr.msk.f32.mxu0 %vm1203_vm3, %v10157_v59  ;;  %v2178_v60 = vpop.f32.mrb[110].mxu1  ;;  %v1525_v8 = vld [vmem:[#allocation9 + $0x48] sm:$0xff] }
 0x300   : > { %v8713_v33 = vadd.f32 %v8470_v9, %v2178_v60  ;;  %v2180_v53 = vpop.f32.mrb[111].mxu1  ;;  %3496 = vmatmul.mubr.f32.gmra.mrb[216].mxu1 %v10158_v18  ;;  %6243 = vmatpush3.bf16.msra.mxu0 %v6240_v41  ;;  %v10161_v60 = vld [vmem:[#allocation139_spill] sm:$0xff]  ;;  %v6244_v48 = vpack.c.bf16 %v1525_v8, %v1524_v7  ;;  %v10165_v18 = vld [vmem:[#allocation136_spill] sm:$0xff] }
 0x301   : > { %v2663_v29 = vpop.f32.mrb[92].mxu0  ;;  %5069 = vmatprep.mubr.msk.f32.mxu1 %vm953_vm0, %v10160_v36  ;;  %v1526_v41 = vld [vmem:[#allocation9 + $0x50] sm:$0xff] }
 0x302   : > { %v8717_v19 = vadd.f32 %v2663_v29, %v10159_v61  ;;  %v2665_v37 = vpop.f32.mrb[93].mxu0  ;;  %5838 = vmatmul.mubr.f32.gmra.mrb[198].mxu0 %v10091_v57  ;;  %v10164_v29 = vld [vmem:[#allocation131_spill] sm:$0xff]  ;;  %6245 = vmatprep.subr.bf16.mxu0 %v6244_v48  ;;  %v1527_v61 = vld [vmem:[#allocation9 + $0x58] sm:$0xff]  ;;  %v10166_v7 = vld [vmem:[#allocation140_spill] sm:$0xff] }
 0x303   : > { %5840 = vmatprep.mubr.f32.mxu0 %v10092_v55  ;;  %v2183_v9 = vpop.f32.mrb[112].mxu1  ;;  %v10163_v55 = vld [vmem:[#allocation75_spill] sm:$0xff]  ;;  %v6248_v8 = vpack.c.bf16 %v1527_v61, %v1526_v41  ;;  %v10171_v61 = vld [vmem:[#allocation141_spill] sm:$0xff] }
 0x304   : > { %v8725_v26 = vadd.f32 %v8490_v15, %v2183_v9  ;;  %v2185_v5 = vpop.f32.mrb[113].mxu1  ;;  %5071 = vmatmul.mubr.msk.f32.gmra.mrb[218].mxu1 %vm6968_vm4, %v10161_v60  ;;  %6247 = vmatpush3.bf16.msra.mxu0 %v6244_v48  ;;  %v10170_v48 = vld [vmem:[#allocation135_spill] sm:$0xff] }
 0x305   : > { %v2668_v59 = vpop.f32.mrb[94].mxu0  ;;  %3505 = vmatprep.mubr.f32.mxu1 %v10163_v55  ;;  %v10167_v5 = vld [vmem:[#allocation62_spill] sm:$0xff]  ;;  %6249 = vmatprep.subr.bf16.mxu0 %v6248_v8 }
 0x306   : > { %v8731_v53 = vadd.f32 %v2668_v59, %v10162_v20  ;;  %v2670_v57 = vpop.f32.mrb[95].mxu0  ;;  %5841 = vmatmul.mubr.msk.f32.gmra.mrb[200].mxu0 %vm1203_vm3, %v10164_v29  ;;  %v10168_v20 = vld [vmem:[#allocation77_spill] sm:$0xff]  ;;  %v1528_v55 = vld [vmem:[#allocation9 + $0x60] sm:$0xff]  ;;  %v1529_v29 = vld [vmem:[#allocation9 + $0x68] sm:$0xff] }
 0x307   : > { %5843 = vmatprep.mubr.f32.mxu0 %v10165_v18  ;;  %v2188_v15 = vpop.f32.mrb[114].mxu1  ;;  %v10169_v57 = vld [vmem:[#allocation138_spill] sm:$0xff] }
 0x308   : > { %v8738_v37 = vadd.f32 %v8484_v56, %v2188_v15  ;;  %v2190_v36 = vpop.f32.mrb[115].mxu1  ;;  %3506 = vmatmul.mubr.f32.gmra.mrb[220].mxu1 %v10166_v7  ;;  %6251 = vmatpush3.bf16.msra.mxu0 %v6248_v8  ;;  %v1530_v8 = vld [vmem:[#allocation9 + $0x70] sm:$0xff] }
 0x309   : > { %v2673_v9 = vpop.f32.mrb[96].mxu0  ;;  %5072 = vmatprep.mubr.msk.f32.mxu1 %vm958_vm2, %v10168_v20  ;;  %v6252_v36 = vpack.c.bf16 %v1529_v29, %v1528_v55  ;;  %v10174_v20 = vmov 0.0   ;;  %v10175_v29 = vld [vmem:[#allocation87_spill] sm:$0xff] }
 0x30a   : > { %v8742_v59 = vadd.f32 %v2673_v9, %v10167_v5  ;;  %v2675_v60 = vpop.f32.mrb[97].mxu0  ;;  %5844 = vmatmul.mubr.f32.gmra.mrb[202].mxu0 %v10169_v57  ;;  %v10172_v9 = vld [vmem:[#allocation57_spill] sm:$0xff] }
 0x30b   : > { %5846 = vmatprep.mubr.msk.f32.mxu0 %vm1203_vm3, %v10170_v48  ;;  %v2193_v56 = vpop.f32.mrb[116].mxu1  ;;  %v10173_v60 = vld [vmem:[#allocation79_spill] sm:$0xff]  ;;  %6253 = vmatprep.subr.bf16.mxu0 %v6252_v36  ;;  %v1531_v57 = vld [vmem:[#allocation9 + $0x78] sm:$0xff] }
 0x30c   : > { %v8751_v18 = vadd.f32 %v8504_v63, %v2193_v56  ;;  %v2195_v15 = vpop.f32.mrb[117].mxu1  ;;  %3511 = vmatmul.mubr.f32.gmra.mrb[222].mxu1 %v10171_v61  ;;  %6255 = vmatpush3.bf16.msra.mxu0 %v6252_v36 }
 0x30d   : > { %v2678_v41 = vpop.f32.mrb[98].mxu0  ;;  %5073 = vmatprep.mubr.msk.f32.mxu1 %vm953_vm0, %v10173_v60  ;;  %v6256_v15 = vpack.c.bf16 %v1531_v57, %v1530_v8 }
 0x30e   : > { %v8755_v7 = vadd.f32 %v2678_v41, %v10172_v9  ;;  %v2680_v5 = vpop.f32.mrb[99].mxu0  ;;  %5847 = vmatmul.mubr.f32.gmra.mrb[204].mxu0 %v10174_v20  ;;  %v10176_v41 = vld [vmem:[#allocation65_spill] sm:$0xff] }
 0x30f   : > { %5849 = vmatprep.mubr.f32.mxu0 %v10174_v20  ;;  %v2198_v63 = vpop.f32.mrb[118].mxu1  ;;  %v10177_v5 = vld [vmem:[#allocation83_spill] sm:$0xff]  ;;  %6257 = vmatprep.subr.bf16.mxu0 %v6256_v15 }
 0x310   : > { %v8763_v48 = vadd.f32 %v8499_v62, %v2198_v63  ;;  %v2200_v56 = vpop.f32.mrb[119].mxu1  ;;  %5075 = vmatmul.mubr.msk.f32.gmra.mrb[224].mxu1 %vm6968_vm4, %v10175_v29  ;;  %6259 = vmatpush3.bf16.msra.mxu0 %v6256_v15 }
 0x311   : > { %v2683_v55 = vpop.f32.mrb[100].mxu0  ;;  %3520 = vmatprep.mubr.f32.mxu1 %v10177_v5  ;;  %v10178_v56 = vld [vmem:[#allocation19_spill] sm:$0xff] }
 0x312   : > { %v8769_v61 = vadd.f32 %v2683_v55, %v10176_v41  ;;  %v2685_v9 = vpop.f32.mrb[101].mxu0  ;;  %5850 = vmatmul.mubr.f32.gmra.mrb[206].mxu0 %v10174_v20  ;;  %v10179_v55 = vld [vmem:[#allocation82_spill] sm:$0xff] }
 0x313   : > { %v2203_v36 = vpop.f32.mrb[120].mxu1 }
 0x314   : > { %v8774_v62 = vadd.f32 %v8517_v30, %v2203_v36  ;;  %v2205_v60 = vpop.f32.mrb[121].mxu1  ;;  %3521 = vmatmul.mubr.f32.gmra.mrb[226].mxu1 %v10178_v56  ;;  %v10180_v30 = vld [vmem:[#allocation20_spill] sm:$0xff] }
 0x315   : > { %v2688_v63 = vpop.f32.mrb[102].mxu0  ;;  %5076 = vmatprep.mubr.msk.f32.mxu1 %vm958_vm2, %v10179_v55  ;;  %v10181_v60 = vld [vmem:[#allocation88_spill] sm:$0xff] }
 0x316   : > { %v8778_v8 = vadd.f32 %v2688_v63, %v8454_v0  ;;  %v2690_v57 = vpop.f32.mrb[103].mxu0 }
 0x317   : > { %v2208_v29 = vpop.f32.mrb[122].mxu1 }
 0x318   : > { %v8784_v41 = vadd.f32 %v8511_v11, %v2208_v29  ;;  %v2210_v15 = vpop.f32.mrb[123].mxu1  ;;  %3526 = vmatmul.mubr.f32.gmra.mrb[228].mxu1 %v10180_v30  ;;  %v10182_v11 = vld [vmem:[#allocation18_spill] sm:$0xff]  ;;  %v10183_v29 = vld [vmem:[#allocation89_spill] sm:$0xff] }
 0x319   : > { %v2693_v9 = vpop.f32.mrb[104].mxu0  ;;  %5077 = vmatprep.mubr.msk.f32.mxu1 %vm953_vm0, %v10181_v60 }
 0x31a   : > { %v8788_v5 = vadd.f32 %v2693_v9, %v8467_v4  ;;  %v2695_v36 = vpop.f32.mrb[105].mxu0 }
 0x31b   : > { %v2213_v0 = vpop.f32.mrb[124].mxu1 }
 0x31c   : > { %v8794_v63 = vadd.f32 %v8531_v51, %v2213_v0  ;;  %v2215_v56 = vpop.f32.mrb[125].mxu1  ;;  %5079 = vmatmul.mubr.msk.f32.gmra.mrb[230].mxu1 %vm6968_vm4, %v10182_v11  ;;  %v10184_v51 = vld [vmem:[#allocation27_spill] sm:$0xff] }
 0x31d   : > { %v2698_v57 = vpop.f32.mrb[106].mxu0  ;;  %3535 = vmatprep.mubr.f32.mxu1 %v10183_v29  ;;  %v10185_v56 = vld [vmem:[#allocation92_spill] sm:$0xff] }
 0x31e   : > { %v8800_v55 = vadd.f32 %v2698_v57, %v8481_v16  ;;  %v2700_v4 = vpop.f32.mrb[107].mxu0 }
 0x31f   : > { %v2218_v15 = vpop.f32.mrb[126].mxu1 }
 0x320   : > { %v8804_v9 = vadd.f32 %v8525_v58, %v2218_v15  ;;  %v2220_v30 = vpop.f32.mrb[127].mxu1  ;;  %3536 = vmatmul.mubr.f32.gmra.mrb[232].mxu1 %v10184_v51  ;;  %v10186_v58 = vld [vmem:[#allocation22_spill] sm:$0xff] }
 0x321   : > { %v2703_v36 = vpop.f32.mrb[108].mxu0  ;;  %5080 = vmatprep.mubr.msk.f32.mxu1 %vm958_vm2, %v10185_v56  ;;  %v10187_v30 = vld [vmem:[#allocation95_spill] sm:$0xff] }
 0x322   : > { %v8808_v60 = vadd.f32 %v2703_v36, %v8494_v43  ;;  %v2705_v0 = vpop.f32.mrb[109].mxu0  ;;  %v10189_v56 = vld [vmem:[#allocation31_spill] sm:$0xff] }
 0x323   : > { %v5678_v16 = vpop.f32.mrb[128].mxu1 }
 0x324   : > { %v8814_v57 = vadd.f32 %v5678_v16, %v8552_v45  ;;  %v2898_v4 = vpop.f32.mrb[129].mxu1  ;;  %3541 = vmatmul.mubr.f32.gmra.mrb[234].mxu1 %v10186_v58 }
 0x325   : > { %v2708_v11 = vpop.f32.mrb[110].mxu0  ;;  %v8821_v15 = vadd.f32 %v2898_v4, %v8541_v31  ;;  %5081 = vmatprep.mubr.msk.f32.mxu1 %vm953_vm0, %v10187_v30  ;;  %v10191_v30 = vld [vmem:[#allocation142_spill] sm:$0xff] }
 0x326   : > { %v8818_v29 = vadd.f32 %v2708_v11, %v8508_v14  ;;  %v2710_v43 = vpop.f32.mrb[111].mxu0  ;;  %v10190_v11 = vld [vmem:[#allocation99_spill] sm:$0xff] }
 0x327   : > { %v5681_v36 = vpop.f32.mrb[130].mxu1 }
 0x328   : > { %v8827_v51 = vadd.f32 %v5681_v36, %v8579_v17  ;;  %v2908_v0 = vpop.f32.mrb[131].mxu1  ;;  %5083 = vmatmul.mubr.msk.f32.gmra.mrb[236].mxu1 %vm6968_vm4, %v10189_v56  ;;  %v10192_v36 = vld [vmem:[#allocation67_spill] sm:$0xff] }
 0x329   : > { %v2713_v45 = vpop.f32.mrb[112].mxu0  ;;  %v8836_v31 = vadd.f32 %v2908_v0, %v8565_v50  ;;  %3550 = vmatprep.mubr.f32.mxu1 %v10190_v11  ;;  %v10193_v50 = vld [vmem:[#allocation98_spill] sm:$0xff]  ;;  %v10194_v11 = vld [vmem:[#allocation143_spill] sm:$0xff] }
 0x32a   : > { %10188 = vst [vmem:[#allocation58_spill] sm:$0xff] %v8827_v51  ;;  %v8833_v14 = vadd.f32 %v2713_v45, %v8522_v1  ;;  %v2715_v16 = vpop.f32.mrb[113].mxu0 }
 0x32b   : > { %v5684_v4 = vpop.f32.mrb[132].mxu1 }
 0x32c   : > { %v8840_v58 = vadd.f32 %v5684_v4, %v8603_v24  ;;  %v2918_v43 = vpop.f32.mrb[133].mxu1  ;;  %3551 = vmatmul.mubr.f32.gmra.mrb[238].mxu1 %v10191_v30 }
 0x32d   : > { %v2718_v17 = vpop.f32.mrb[114].mxu0  ;;  %v8847_v1 = vadd.f32 %v2918_v43, %v8590_v49  ;;  %5084 = vmatprep.mubr.msk.f32.mxu1 %vm958_vm2, %v10193_v50  ;;  %v10195_v43 = vld [vmem:[#allocation103_spill] sm:$0xff]  ;;  %v10196_v50 = vld [vmem:[#allocation144_spill] sm:$0xff] }
 0x32e   : > { %v8844_v51 = vadd.f32 %v2718_v17, %v10192_v36  ;;  %v2720_v45 = vpop.f32.mrb[115].mxu0 }
 0x32f   : > { %v5687_v0 = vpop.f32.mrb[134].mxu1 }
 0x330   : > { %v8853_v56 = vadd.f32 %v5687_v0, %v8628_v13  ;;  %v2928_v16 = vpop.f32.mrb[135].mxu1  ;;  %3556 = vmatmul.mubr.f32.gmra.mrb[240].mxu1 %v10194_v11 }
 0x331   : > { %v2723_v24 = vpop.f32.mrb[116].mxu0  ;;  %v8860_v17 = vadd.f32 %v2928_v16, %v8617_v52  ;;  %5085 = vmatprep.mubr.msk.f32.mxu1 %vm953_vm0, %v10195_v43  ;;  %v10198_v43 = vld [vmem:[#allocation145_spill] sm:$0xff] }
 0x332   : > { %v8857_v4 = vadd.f32 %v2723_v24, %v8548_v28  ;;  %v2725_v49 = vpop.f32.mrb[117].mxu0  ;;  %v10197_v24 = vld [vmem:[#allocation104_spill] sm:$0xff] }
 0x333   : > { %v5690_v30 = vpop.f32.mrb[136].mxu1 }
 0x334   : > { %v8866_v36 = vadd.f32 %v5690_v30, %v8655_v39  ;;  %v2938_v45 = vpop.f32.mrb[137].mxu1  ;;  %5087 = vmatmul.mubr.msk.f32.gmra.mrb[242].mxu1 %vm6968_vm4, %v10196_v50 }
 0x335   : > { %v2728_v13 = vpop.f32.mrb[118].mxu0  ;;  %v8875_v52 = vadd.f32 %v2938_v45, %v8641_v21  ;;  %3565 = vmatprep.mubr.f32.mxu1 %v10197_v24  ;;  %v10199_v21 = vld [vmem:[#allocation107_spill] sm:$0xff]  ;;  %v10200_v24 = vld [vmem:[#allocation146_spill] sm:$0xff] }
 0x336   : > { %v8872_v28 = vadd.f32 %v2728_v13, %v8561_v27  ;;  %v2730_v0 = vpop.f32.mrb[119].mxu0 }
 0x337   : > { %v5693_v16 = vpop.f32.mrb[138].mxu1 }
 0x338   : > { %v8879_v11 = vadd.f32 %v5693_v16, %v8679_v35  ;;  %v2948_v49 = vpop.f32.mrb[139].mxu1  ;;  %3566 = vmatmul.mubr.f32.gmra.mrb[244].mxu1 %v10198_v43 }
 0x339   : > { %v2733_v39 = vpop.f32.mrb[120].mxu0  ;;  %v8886_v27 = vadd.f32 %v2948_v49, %v8666_v38  ;;  %5088 = vmatprep.mubr.msk.f32.mxu1 %vm958_vm2, %v10199_v21  ;;  %v10202_v21 = vld [vmem:[#allocation147_spill] sm:$0xff] }
 0x33a   : > { %v8883_v30 = vadd.f32 %v2733_v39, %v8573_v12  ;;  %v2735_v13 = vpop.f32.mrb[121].mxu0  ;;  %v10201_v39 = vld [vmem:[#allocation110_spill] sm:$0xff] }
 0x33b   : > { %v5696_v45 = vpop.f32.mrb[140].mxu1 }
 0x33c   : > { %v8892_v50 = vadd.f32 %v5696_v45, %v8704_v34  ;;  %v2958_v0 = vpop.f32.mrb[141].mxu1  ;;  %3571 = vmatmul.mubr.f32.gmra.mrb[246].mxu1 %v10200_v24 }
 0x33d   : > { %v2738_v35 = vpop.f32.mrb[122].mxu0  ;;  %v8899_v12 = vadd.f32 %v2958_v0, %v8693_v2  ;;  %5089 = vmatprep.mubr.msk.f32.mxu1 %vm953_vm0, %v10201_v39  ;;  %v10204_v39 = vld [vmem:[#allocation78_spill] sm:$0xff] }
 0x33e   : > { %v8896_v16 = vadd.f32 %v2738_v35, %v8586_v42  ;;  %v2740_v38 = vpop.f32.mrb[123].mxu0  ;;  %v10203_v35 = vld [vmem:[#allocation114_spill] sm:$0xff] }
 0x33f   : > { %v5699_v49 = vpop.f32.mrb[142].mxu1 }
 0x340   : > { %v8905_v43 = vadd.f32 %v5699_v49, %v8731_v53  ;;  %v2968_v13 = vpop.f32.mrb[143].mxu1  ;;  %5091 = vmatmul.mubr.msk.f32.gmra.mrb[248].mxu1 %vm6968_vm4, %v10202_v21 }
 0x341   : > { %v2743_v34 = vpop.f32.mrb[124].mxu0  ;;  %v8914_v2 = vadd.f32 %v2968_v13, %v8717_v19  ;;  %3580 = vmatprep.mubr.f32.mxu1 %v10203_v35  ;;  %v10206_v35 = vld [vmem:[#allocation148_spill] sm:$0xff] }
 0x342   : > { %v8911_v42 = vadd.f32 %v2743_v34, %v8599_v40  ;;  %v2745_v45 = vpop.f32.mrb[125].mxu0  ;;  %v10205_v34 = vld [vmem:[#allocation113_spill] sm:$0xff] }
 0x343   : > { %v5702_v0 = vpop.f32.mrb[144].mxu1 }
 0x344   : > { %v8918_v24 = vadd.f32 %v5702_v0, %v8755_v7  ;;  %v2978_v38 = vpop.f32.mrb[145].mxu1  ;;  %3581 = vmatmul.mubr.f32.gmra.mrb[250].mxu1 %v10204_v39 }
 0x345   : > { %v2748_v53 = vpop.f32.mrb[126].mxu0  ;;  %v8923_v21 = vadd.f32 %v2978_v38, %v8742_v59  ;;  %5092 = vmatprep.mubr.msk.f32.mxu1 %vm958_vm2, %v10205_v34  ;;  %v10208_v34 = vld [vmem:[#allocation149_spill] sm:$0xff] }
 0x346   : > { %v2749_v49 = vadd.f32 %v2748_v53, %v8611_v10  ;;  %v2750_v40 = vpop.f32.mrb[127].mxu0  ;;  %v10207_v53 = vld [vmem:[#allocation118_spill] sm:$0xff] }
 0x347   : > { %v5705_v19 = vpop.f32.mrb[146].mxu1 }
 0x348   : > { %v8929_v13 = vadd.f32 %v5705_v19, %v8778_v8  ;;  %v2988_v45 = vpop.f32.mrb[147].mxu1  ;;  %3586 = vmatmul.mubr.f32.gmra.mrb[252].mxu1 %v10206_v35 }
 0x349   : > { %v2753_v7 = vpop.f32.mrb[128].mxu0  ;;  %v8936_v10 = vadd.f32 %v2988_v45, %v8769_v61  ;;  %5093 = vmatprep.mubr.msk.f32.mxu1 %vm953_vm0, %v10207_v53  ;;  %v10210_v53 = vld [vmem:[#allocation150_spill] sm:$0xff] }
 0x34a   : > { %v8933_v0 = vadd.f32 %v2753_v7, %v8624_v46  ;;  %v2755_v59 = vpop.f32.mrb[129].mxu0  ;;  %v10209_v7 = vld [vmem:[#allocation119_spill] sm:$0xff] }
 0x34b   : > { %v5708_v38 = vpop.f32.mrb[148].mxu1 }
 0x34c   : > { %v8942_v39 = vadd.f32 %v5708_v38, %v8800_v55  ;;  %v2998_v40 = vpop.f32.mrb[149].mxu1  ;;  %5095 = vmatmul.mubr.msk.f32.gmra.mrb[254].mxu1 %vm6968_vm4, %v10208_v34 }
 0x34d   : > { %v2758_v8 = vpop.f32.mrb[130].mxu0  ;;  %v8949_v61 = vadd.f32 %v2998_v40, %v8788_v5  ;;  %3595 = vmatprep.mubr.f32.mxu1 %v10209_v7  ;;  %v10212_v7 = vld [vmem:[#allocation151_spill] sm:$0xff] }
 0x34e   : > { %v2759_v46 = vadd.f32 %v2758_v8, %v8637_v47  ;;  %v2760_v19 = vpop.f32.mrb[131].mxu0  ;;  %v10211_v8 = vld [vmem:[#allocation122_spill] sm:$0xff] }
 0x34f   : > { %v5711_v45 = vpop.f32.mrb[150].mxu1 }
 0x350   : > { %v8953_v35 = vadd.f32 %v5711_v45, %v8818_v29  ;;  %v3008_v59 = vpop.f32.mrb[151].mxu1  ;;  %3596 = vmatmul.mubr.f32.gmra.mrb[0].mxu1 %v10210_v53 }
 0x351   : > { %v2763_v55 = vpop.f32.mrb[132].mxu0  ;;  %v8958_v34 = vadd.f32 %v3008_v59, %v8808_v60  ;;  %5096 = vmatprep.mubr.msk.f32.mxu1 %vm958_vm2, %v10211_v8  ;;  %v10214_v8 = vld [vmem:[#allocation152_spill] sm:$0xff] }
 0x352   : > { %v2764_v38 = vadd.f32 %v2763_v55, %v8649_v23  ;;  %v2765_v47 = vpop.f32.mrb[133].mxu0  ;;  %v10213_v55 = vld [vmem:[#allocation124_spill] sm:$0xff] }
 0x353   : > { %v5714_v5 = vpop.f32.mrb[152].mxu1 }
 0x354   : > { %v8964_v40 = vadd.f32 %v5714_v5, %v8844_v51  ;;  %v3018_v19 = vpop.f32.mrb[153].mxu1  ;;  %3601 = vmatmul.mubr.f32.gmra.mrb[2].mxu1 %v10212_v7 }
 0x355   : > { %v2768_v29 = vpop.f32.mrb[134].mxu0  ;;  %v8969_v23 = vadd.f32 %v3018_v19, %v8833_v14  ;;  %5097 = vmatprep.mubr.msk.f32.mxu1 %vm953_vm0, %v10213_v55 }
 0x356   : > { %v2769_v45 = vadd.f32 %v2768_v29, %v8662_v6  ;;  %v2770_v60 = vpop.f32.mrb[135].mxu0  ;;  %v10215_v29 = vld [vmem:[#allocation129_spill] sm:$0xff] }
 0x357   : > { %v5717_v59 = vpop.f32.mrb[154].mxu1  ;;  %v10216_v60 = vld [vmem:[#allocation153_spill] sm:$0xff] }
 0x358   : > { %v8975_v53 = vadd.f32 %v5717_v59, %v8872_v28  ;;  %v3028_v47 = vpop.f32.mrb[155].mxu1  ;;  %5099 = vmatmul.mubr.msk.f32.gmra.mrb[4].mxu1 %vm6968_vm4, %v10214_v8  ;;  %v10217_v59 = vld [vmem:[#allocation128_spill] sm:$0xff]  ;;  %v10218_v8 = vld [vmem:[#allocation154_spill] sm:$0xff] }
 0x359   : > { %v2773_v51 = vpop.f32.mrb[136].mxu0  ;;  %v8982_v14 = vadd.f32 %v3028_v47, %v8857_v4  ;;  %3610 = vmatprep.mubr.f32.mxu1 %v10215_v29 }
 0x35a   : > { %v2774_v6 = vadd.f32 %v2773_v51, %v8675_v22  ;;  %v2775_v5 = vpop.f32.mrb[137].mxu0 }
 0x35b   : > { %v5720_v25 = vpop.f32.mrb[156].mxu1 }
 0x35c   : > { %v8986_v19 = vadd.f32 %v5720_v25, %v8896_v16  ;;  %v3038_v7 = vpop.f32.mrb[157].mxu1  ;;  %3611 = vmatmul.mubr.f32.gmra.mrb[6].mxu1 %v10216_v60 }
 0x35d   : > { %v2778_v28 = vpop.f32.mrb[138].mxu0  ;;  %v8991_v54 = vadd.f32 %v3038_v7, %v8883_v30  ;;  %5100 = vmatprep.mubr.msk.f32.mxu1 %vm958_vm2, %v10217_v59 }
 0x35e   : > { %v2779_v55 = vadd.f32 %v2778_v28, %v8687_v3  ;;  %v2780_v22 = vpop.f32.mrb[139].mxu0 }
 0x35f   : > { %v5723_v4 = vpop.f32.mrb[158].mxu1 }
 0x360   : > { %v8996_v51 = vadd.f32 %v5723_v4, %v2749_v49  ;;  %v3048_v16 = vpop.f32.mrb[159].mxu1  ;;  %3616 = vmatmul.mubr.f32.gmra.mrb[8].mxu1 %v10218_v8 }
 0x361   : > { %v2783_v47 = vpop.f32.mrb[140].mxu0  ;;  %v9001_v29 = vadd.f32 %v3048_v16, %v8911_v42  ;;  %3620 = vmatprep.mubr.f32.mxu1 %v10174_v20 }
 0x362   : > { %v2784_v5 = vadd.f32 %v2783_v47, %v8700_v44  ;;  %v2785_v3 = vpop.f32.mrb[141].mxu0 }
 0x363   : > { %v5726_v30 = vpop.f32.mrb[160].mxu1 }
 0x364   : > { %v9004_v25 = vadd.f32 %v5726_v30, %v2759_v46  ;;  %v3058_v28 = vpop.f32.mrb[161].mxu1  ;;  %3621 = vmatmul.mubr.f32.gmra.mrb[10].mxu1 %v10174_v20 }
 0x365   : > { %v2788_v32 = vpop.f32.mrb[142].mxu0  ;;  %v9009_v7 = vadd.f32 %v3058_v28, %v8933_v0  ;;  %3625 = vmatprep.mubr.f32.mxu1 %v10174_v20 }
 0x366   : > { %v2789_v49 = vadd.f32 %v2788_v32, %v8713_v33  ;;  %v2790_v60 = vpop.f32.mrb[143].mxu0 }
 0x367   : > { %v5729_v44 = vpop.f32.mrb[162].mxu1 }
 0x368   : > { %v9012_v42 = vadd.f32 %v5729_v44, %v2769_v45  ;;  %v3068_v59 = vpop.f32.mrb[163].mxu1  ;;  %3626 = vmatmul.mubr.f32.gmra.mrb[12].mxu1 %v10174_v20 }
 0x369   : > { %v2793_v22 = vpop.f32.mrb[144].mxu0  ;;  %v9016_v4 = vadd.f32 %v3068_v59, %v2764_v38  ;;  %3630 = vmatprep.mubr.f32.mxu1 %v10174_v20 }
 0x36a   : > { %v2794_v46 = vadd.f32 %v2793_v22, %v8725_v26  ;;  %v2795_v47 = vpop.f32.mrb[145].mxu0 }
 0x36b   : > { %v5732_v33 = vpop.f32.mrb[164].mxu1 }
 0x36c   : > { %v9019_v0 = vadd.f32 %v5732_v33, %v2779_v55  ;;  %v3078_v8 = vpop.f32.mrb[165].mxu1  ;;  %3631 = vmatmul.mubr.f32.gmra.mrb[14].mxu1 %v10174_v20 }
 0x36d   : > { %v2798_v16 = vpop.f32.mrb[146].mxu0  ;;  %v9023_v3 = vadd.f32 %v3078_v8, %v2774_v6 }
 0x36e   : > { %v2799_v45 = vadd.f32 %v2798_v16, %v8738_v37  ;;  %v2800_v30 = vpop.f32.mrb[147].mxu0 }
 0x36f   : > { %v5735_v32 = vpop.f32.mrb[166].mxu1 }
 0x370   : > { %v9025_v28 = vadd.f32 %v5735_v32, %v2789_v49  ;;  %v3088_v38 = vpop.f32.mrb[167].mxu1 }
 0x371   : > { %v2803_v26 = vpop.f32.mrb[148].mxu0  ;;  %v9028_v44 = vadd.f32 %v3088_v38, %v2784_v5 }
 0x372   : > { %v2804_v60 = vadd.f32 %v2803_v26, %v8751_v18  ;;  %v2805_v55 = vpop.f32.mrb[149].mxu0 }
 0x373   : > { %v5738_v22 = vpop.f32.mrb[168].mxu1 }
 0x374   : > { %v9030_v59 = vadd.f32 %v5738_v22, %v2799_v45  ;;  %v3098_v20 = vpop.f32.mrb[169].mxu1 }
 0x375   : > { %v2808_v47 = vpop.f32.mrb[150].mxu0  ;;  %v9033_v6 = vadd.f32 %v3098_v20, %v2794_v46 }
 0x376   : > { %v2809_v37 = vadd.f32 %v2808_v47, %v8763_v48  ;;  %v2810_v33 = vpop.f32.mrb[151].mxu0 }
 0x377   : > { %v5741_v16 = vpop.f32.mrb[170].mxu1 }
 0x378   : > { %v9035_v49 = vadd.f32 %v5741_v16, %v2809_v37  ;;  %v3108_v30 = vpop.f32.mrb[171].mxu1 }
 0x379   : > { %v2813_v8 = vpop.f32.mrb[152].mxu0  ;;  %v9038_v5 = vadd.f32 %v3108_v30, %v2804_v60 }
 0x37a   : > { %10219 = vst [vmem:[#allocation71_spill] sm:$0xff] %v9035_v49  ;;  %v2814_v18 = vadd.f32 %v2813_v8, %v8774_v62  ;;  %v2815_v32 = vpop.f32.mrb[153].mxu0 }
 0x37b   : > { %v5744_v26 = vpop.f32.mrb[172].mxu1 }
 0x37c   : > { %v3118_v38 = vpop.f32.mrb[173].mxu1 }
 0x37d   : > { %v2818_v45 = vpop.f32.mrb[154].mxu0  ;;  %v9041_v22 = vadd.f32 %v3118_v38, %v2814_v18 }
 0x37e   : > { %v2819_v55 = vadd.f32 %v2818_v45, %v8784_v41  ;;  %v2820_v48 = vpop.f32.mrb[155].mxu0 }
 0x37f   : > { %v5747_v47 = vpop.f32.mrb[174].mxu1 }
 0x380   : > { %v9043_v46 = vadd.f32 %v5744_v26, %v2819_v55  ;;  %v3128_v37 = vpop.f32.mrb[175].mxu1 }
 0x381   : > { %v2823_v20 = vpop.f32.mrb[156].mxu0 }
 0x382   : > { %10220 = vst [vmem:[#allocation70_spill] sm:$0xff] %v9043_v46  ;;  %v2824_v33 = vadd.f32 %v2823_v20, %v8794_v63  ;;  %v2825_v16 = vpop.f32.mrb[157].mxu0  ;;  %v9054_v63 = vld [vmem:[%s9566_s5] ss:$0 sm:$0xff] }
 0x383   : > { %v3397_v60 = vpop.f32.mrb[176].mxu1 }
 0x384   : > { %v9046_v62 = vadd.f32 %v3128_v37, %v2824_v33  ;;  %v3399_v30 = vpop.f32.mrb[177].mxu1 }
 0x385   : > { %v2828_v8 = vpop.f32.mrb[158].mxu0 }
 0x386   : > { %10221 = vst [vmem:[#allocation90_spill] sm:$0xff] %v9046_v62  ;;  %v2829_v32 = vadd.f32 %v2828_v8, %v8804_v9  ;;  %v2830_v49 = vpop.f32.mrb[159].mxu0  ;;  %v9060_v9 = vld [vmem:[%s9567_s6] ss:$0 sm:$0xff] }
 0x387   : > { %v3402_v18 = vpop.f32.mrb[178].mxu1 }
 0x388   : > { %v9049_v41 = vadd.f32 %v5747_v47, %v2829_v32  ;;  %v3404_v45 = vpop.f32.mrb[179].mxu1 }
 0x389   : > { %v5782_v26 = vpop.f32.mrb[160].mxu0 }
 0x38a   : > { %10222 = vst [vmem:[#allocation85_spill] sm:$0xff] %v9049_v41  ;;  %v3708_v38 = vadd.f32 %v5782_v26, %v3402_v18  ;;  %v3702_v55 = vpop.f32.mrb[161].mxu0 }
 0x38b   : > { %v3703_v48 = vadd.f32 %v3702_v55, %v3397_v60  ;;  %v3407_v37 = vpop.f32.mrb[180].mxu1 }
 0x38c   : > { %v3942_v20 = vadd.f32 %v3708_v38, %v8814_v57  ;;  %v3409_v47 = vpop.f32.mrb[181].mxu1 }
 0x38d   : > { %v3941_v49 = vadd.f32 %v3703_v48, %v8821_v15  ;;  %v5785_v33 = vpop.f32.mrb[162].mxu0  ;;  %v10223_v48 = vld [vmem:[#allocation58_spill] sm:$0xff] }
 0x38e   : > { %v3996_v16 = vmul.f32 %v9054_v63, %v3942_v20  ;;  %v3712_v8 = vpop.f32.mrb[163].mxu0 }
 0x38f   : > { %v3995_v30 = vmul.f32 %v9054_v63, %v3941_v49  ;;  %v3713_v32 = vadd.f32 %v3712_v8, %v3407_v37  ;;  %v3412_v18 = vpop.f32.mrb[182].mxu1 }
 0x390   : > { %v4050_v60 = vadd.f32 %v9060_v9, %v3996_v16  ;;  %v3718_v45 = vadd.f32 %v5785_v33, %v3412_v18  ;;  %v3414_v26 = vpop.f32.mrb[183].mxu1 }
 0x391   : > { %v3943_v57 = vadd.f32 %v3713_v32, %v8836_v31  ;;  %v5788_v38 = vpop.f32.mrb[164].mxu0  ;;  %v4049_v55 = vadd.f32 %v9060_v9, %v3995_v30 }
 0x392   : > { %v3722_v41 = vpop.f32.mrb[165].mxu0  ;;  %v3944_v47 = vadd.f32 %v3718_v45, %v10223_v48  ;;  %v4098_v62 = vmax.f32 %v4050_v60, 0.0 }
 0x393   : > { %v3997_v15 = vmul.f32 %v9054_v63, %v3943_v57  ;;  %v4097_v20 = vmax.f32 %v4049_v55, 0.0  ;;  %v3417_v46 = vpop.f32.mrb[184].mxu1 }
 0x394   : > { %v3998_v37 = vmul.f32 %v9054_v63, %v3944_v47  ;;  %v3723_v49 = vadd.f32 %v3722_v41, %v3417_v46  ;;  %v3419_v16 = vpop.f32.mrb[185].mxu1 }
 0x395   : > { %v5791_v8 = vpop.f32.mrb[166].mxu0  ;;  %5884 = vmatprep.mubr.f32.mxu0 %v4097_v20  ;;  %v4051_v31 = vadd.f32 %v9060_v9, %v3997_v15 }
 0x396   : > { %v3732_v33 = vpop.f32.mrb[167].mxu0  ;;  %5885 = vmatmul.mubr.f32.vlgmr.msra.gmra.mrb[208].mxu0 %v4098_v62  ;;  %v3945_v30 = vadd.f32 %v3723_v49, %v8847_v1  ;;  %v4052_v18 = vadd.f32 %v9060_v9, %v3998_v37 }
 0x397   : > { %v4099_v32 = vmax.f32 %v4051_v31, 0.0  ;;  %v3422_v57 = vpop.f32.mrb[186].mxu1 }
 0x398   : > { %v3999_v45 = vmul.f32 %v9054_v63, %v3945_v30  ;;  %v3728_v60 = vadd.f32 %v5788_v38, %v3422_v57  ;;  %v3424_v26 = vpop.f32.mrb[187].mxu1  ;;  %v4100_v46 = vmax.f32 %v4052_v18, 0.0 }
 0x399   : > { %v5794_v55 = vpop.f32.mrb[168].mxu0  ;;  %5887 = vmatprep.mubr.f32.mxu0 %v4099_v32 }
 0x39a   : > { %v3742_v41 = vpop.f32.mrb[169].mxu0  ;;  %v3946_v48 = vadd.f32 %v3728_v60, %v8840_v58  ;;  %5888 = vmatmul.mubr.f32.gmra.mrb[210].mxu0 %v4100_v46  ;;  %v4053_v15 = vadd.f32 %v9060_v9, %v3999_v45 }
 0x39b   : > { %v3427_v62 = vpop.f32.mrb[188].mxu1 }
 0x39c   : > { %v4000_v1 = vmul.f32 %v9054_v63, %v3946_v48  ;;  %v3733_v47 = vadd.f32 %v3732_v33, %v3427_v62  ;;  %v3429_v20 = vpop.f32.mrb[189].mxu1  ;;  %v4101_v49 = vmax.f32 %v4053_v15, 0.0 }
 0x39d   : > { %v5797_v37 = vpop.f32.mrb[170].mxu0 }
 0x39e   : > { %v3752_v16 = vpop.f32.mrb[171].mxu0  ;;  %v3947_v38 = vadd.f32 %v3733_v47, %v8860_v17  ;;  %5890 = vmatprep.mubr.f32.mxu0 %v4101_v49  ;;  %v4054_v31 = vadd.f32 %v9060_v9, %v4000_v1 }
 0x39f   : > { %v3432_v30 = vpop.f32.mrb[190].mxu1 }
 0x3a0   : > { %v4001_v32 = vmul.f32 %v9054_v63, %v3947_v38  ;;  %v3738_v58 = vadd.f32 %v5791_v8, %v3432_v30  ;;  %v3434_v18 = vpop.f32.mrb[191].mxu1  ;;  %v4102_v45 = vmax.f32 %v4054_v31, 0.0 }
 0x3a1   : > { %v5800_v57 = vpop.f32.mrb[172].mxu0 }
 0x3a2   : > { %v3762_v60 = vpop.f32.mrb[173].mxu0  ;;  %v3948_v26 = vadd.f32 %v3738_v58, %v8853_v56  ;;  %5891 = vmatmul.mubr.f32.gmra.mrb[212].mxu0 %v4102_v45  ;;  %v4055_v33 = vadd.f32 %v9060_v9, %v4001_v32 }
 0x3a3   : > { %v3437_v46 = vpop.f32.mrb[192].mxu1 }
 0x3a4   : > { %v4002_v48 = vmul.f32 %v9054_v63, %v3948_v26  ;;  %v3743_v17 = vadd.f32 %v3742_v41, %v3437_v46  ;;  %v3439_v15 = vpop.f32.mrb[193].mxu1  ;;  %v4103_v1 = vmax.f32 %v4055_v33, 0.0 }
 0x3a5   : > { %v9084_v62 = vpop.f32.mrb[174].mxu0 }
 0x3a6   : > { %v3772_v47 = vpop.f32.mrb[175].mxu0  ;;  %v3949_v8 = vadd.f32 %v3743_v17, %v8875_v52  ;;  %5893 = vmatprep.mubr.f32.mxu0 %v4103_v1  ;;  %v4056_v20 = vadd.f32 %v9060_v9, %v4002_v48 }
 0x3a7   : > { %v3442_v49 = vpop.f32.mrb[194].mxu1 }
 0x3a8   : > { %v4003_v56 = vmul.f32 %v9054_v63, %v3949_v8  ;;  %v3748_v38 = vadd.f32 %v5794_v55, %v3442_v49  ;;  %v3444_v31 = vpop.f32.mrb[195].mxu1  ;;  %v4104_v32 = vmax.f32 %v4056_v20, 0.0 }
 0x3a9   : > { %v9089_v30 = vpop.f32.mrb[176].mxu0 }
 0x3aa   : > { %v9091_v58 = vpop.f32.mrb[177].mxu0  ;;  %v3950_v41 = vadd.f32 %v3748_v38, %v8866_v36  ;;  %5894 = vmatmul.mubr.f32.gmra.mrb[214].mxu0 %v4104_v32  ;;  %v4057_v18 = vadd.f32 %v9060_v9, %v4003_v56 }
 0x3ab   : > { %v3447_v45 = vpop.f32.mrb[196].mxu1 }
 0x3ac   : > { %v4004_v52 = vmul.f32 %v9054_v63, %v3950_v41  ;;  %v3753_v26 = vadd.f32 %v3752_v16, %v3447_v45  ;;  %v3449_v33 = vpop.f32.mrb[197].mxu1  ;;  %v4105_v48 = vmax.f32 %v4057_v18, 0.0 }
 0x3ad   : > { %v9096_v46 = vpop.f32.mrb[178].mxu0 }
 0x3ae   : > { %v9098_v55 = vpop.f32.mrb[179].mxu0  ;;  %v3951_v17 = vadd.f32 %v3753_v26, %v8886_v27  ;;  %5896 = vmatprep.mubr.f32.mxu0 %v4105_v48  ;;  %v4058_v15 = vadd.f32 %v9060_v9, %v4004_v52 }
 0x3af   : > { %v3452_v1 = vpop.f32.mrb[198].mxu1 }
 0x3b0   : > { %v4005_v36 = vmul.f32 %v9054_v63, %v3951_v17  ;;  %v3758_v8 = vadd.f32 %v5797_v37, %v3452_v1  ;;  %v3454_v20 = vpop.f32.mrb[199].mxu1  ;;  %v4106_v56 = vmax.f32 %v4058_v15, 0.0 }
 0x3b1   : > { %v9103_v49 = vpop.f32.mrb[180].mxu0 }
 0x3b2   : > { %v9105_v16 = vpop.f32.mrb[181].mxu0  ;;  %v3952_v38 = vadd.f32 %v3758_v8, %v8879_v11  ;;  %5897 = vmatmul.mubr.f32.gmra.mrb[216].mxu0 %v4106_v56  ;;  %v4059_v31 = vadd.f32 %v9060_v9, %v4005_v36 }
 0x3b3   : > { %v3457_v32 = vpop.f32.mrb[200].mxu1 }
 0x3b4   : > { %v4006_v27 = vmul.f32 %v9054_v63, %v3952_v38  ;;  %v3763_v41 = vadd.f32 %v3762_v60, %v3457_v32  ;;  %v3459_v18 = vpop.f32.mrb[201].mxu1  ;;  %v4107_v52 = vmax.f32 %v4059_v31, 0.0 }
 0x3b5   : > { %v9110_v45 = vpop.f32.mrb[182].mxu0 }
 0x3b6   : > { %v9112_v37 = vpop.f32.mrb[183].mxu0  ;;  %v3953_v26 = vadd.f32 %v3763_v41, %v8899_v12  ;;  %5899 = vmatprep.mubr.f32.mxu0 %v4107_v52  ;;  %v4060_v33 = vadd.f32 %v9060_v9, %v4006_v27 }
 0x3b7   : > { %v3462_v48 = vpop.f32.mrb[202].mxu1 }
 0x3b8   : > { %v4007_v11 = vmul.f32 %v9054_v63, %v3953_v26  ;;  %v3768_v17 = vadd.f32 %v5800_v57, %v3462_v48  ;;  %v3464_v15 = vpop.f32.mrb[203].mxu1  ;;  %v4108_v36 = vmax.f32 %v4060_v33, 0.0 }
 0x3b9   : > { %v9117_v1 = vpop.f32.mrb[184].mxu0 }
 0x3ba   : > { %v9119_v60 = vpop.f32.mrb[185].mxu0  ;;  %v3954_v8 = vadd.f32 %v3768_v17, %v8892_v50  ;;  %5900 = vmatmul.mubr.f32.gmra.mrb[218].mxu0 %v4108_v36  ;;  %v4061_v20 = vadd.f32 %v9060_v9, %v4007_v11 }
 0x3bb   : > { %v3467_v56 = vpop.f32.mrb[204].mxu1 }
 0x3bc   : > { %v4008_v12 = vmul.f32 %v9054_v63, %v3954_v8  ;;  %v3773_v38 = vadd.f32 %v3772_v47, %v3467_v56  ;;  %v3469_v31 = vpop.f32.mrb[205].mxu1  ;;  %v4109_v27 = vmax.f32 %v4061_v20, 0.0 }
 0x3bd   : > { %v9124_v32 = vpop.f32.mrb[186].mxu0 }
 0x3be   : > { %v9126_v57 = vpop.f32.mrb[187].mxu0  ;;  %v3955_v41 = vadd.f32 %v3773_v38, %v8914_v2  ;;  %5902 = vmatprep.mubr.f32.mxu0 %v4109_v27  ;;  %v4062_v18 = vadd.f32 %v9060_v9, %v4008_v12 }
 0x3bf   : > { %v3472_v52 = vpop.f32.mrb[206].mxu1 }
 0x3c0   : > { %v4009_v50 = vmul.f32 %v9054_v63, %v3955_v41  ;;  %v3778_v26 = vadd.f32 %v9084_v62, %v3472_v52  ;;  %v3474_v33 = vpop.f32.mrb[207].mxu1  ;;  %v4110_v47 = vmax.f32 %v4062_v18, 0.0 }
 0x3c1   : > { %v9132_v48 = vpop.f32.mrb[188].mxu0 }
 0x3c2   : > { %v9134_v11 = vpop.f32.mrb[189].mxu0  ;;  %v3956_v17 = vadd.f32 %v3778_v26, %v8905_v43  ;;  %5903 = vmatmul.mubr.f32.gmra.mrb[220].mxu0 %v4110_v47  ;;  %v4063_v15 = vadd.f32 %v9060_v9, %v4009_v50 }
 0x3c3   : > { %v3477_v2 = vpop.f32.mrb[208].mxu1 }
 0x3c4   : > { %v4010_v36 = vmul.f32 %v9054_v63, %v3956_v17  ;;  %v3783_v8 = vadd.f32 %v9091_v58, %v3477_v2  ;;  %v3479_v20 = vpop.f32.mrb[209].mxu1  ;;  %v4111_v62 = vmax.f32 %v4063_v15, 0.0 }
 0x3c5   : > { %v9140_v56 = vpop.f32.mrb[190].mxu0 }
 0x3c6   : > { %v9142_v12 = vpop.f32.mrb[191].mxu0  ;;  %v3957_v38 = vadd.f32 %v3783_v8, %v8923_v21  ;;  %5905 = vmatprep.mubr.f32.mxu0 %v4111_v62  ;;  %v4064_v31 = vadd.f32 %v9060_v9, %v4010_v36 }
 0x3c7   : > { %v3482_v43 = vpop.f32.mrb[210].mxu1 }
 0x3c8   : > { %v4011_v27 = vmul.f32 %v9054_v63, %v3957_v38  ;;  %v3788_v41 = vadd.f32 %v9089_v30, %v3482_v43  ;;  %v3484_v18 = vpop.f32.mrb[211].mxu1  ;;  %v4112_v58 = vmax.f32 %v4064_v31, 0.0 }
 0x3c9   : > { %v9148_v52 = vpop.f32.mrb[192].mxu0 }
 0x3ca   : > { %v9150_v50 = vpop.f32.mrb[193].mxu0  ;;  %v3958_v26 = vadd.f32 %v3788_v41, %v8918_v24  ;;  %5906 = vmatmul.mubr.f32.gmra.mrb[222].mxu0 %v4112_v58  ;;  %v4065_v33 = vadd.f32 %v9060_v9, %v4011_v27 }
 0x3cb   : > { %v3487_v21 = vpop.f32.mrb[212].mxu1 }
 0x3cc   : > { %v4012_v47 = vmul.f32 %v9054_v63, %v3958_v26  ;;  %v3793_v17 = vadd.f32 %v9098_v55, %v3487_v21  ;;  %v3489_v15 = vpop.f32.mrb[213].mxu1  ;;  %v4113_v30 = vmax.f32 %v4065_v33, 0.0 }
 0x3cd   : > { %v9156_v2 = vpop.f32.mrb[194].mxu0 }
 0x3ce   : > { %v9158_v36 = vpop.f32.mrb[195].mxu0  ;;  %v3959_v8 = vadd.f32 %v3793_v17, %v8936_v10  ;;  %5908 = vmatprep.mubr.f32.mxu0 %v4113_v30  ;;  %v4066_v20 = vadd.f32 %v9060_v9, %v4012_v47 }
 0x3cf   : > { %v3492_v24 = vpop.f32.mrb[214].mxu1 }
 0x3d0   : > { %v4013_v62 = vmul.f32 %v9054_v63, %v3959_v8  ;;  %v3798_v38 = vadd.f32 %v9096_v46, %v3492_v24  ;;  %v3494_v31 = vpop.f32.mrb[215].mxu1  ;;  %v4114_v55 = vmax.f32 %v4066_v20, 0.0 }
 0x3d1   : > { %v9164_v43 = vpop.f32.mrb[196].mxu0 }
 0x3d2   : > { %v9166_v27 = vpop.f32.mrb[197].mxu0  ;;  %v3960_v41 = vadd.f32 %v3798_v38, %v8929_v13  ;;  %5909 = vmatmul.mubr.f32.gmra.mrb[224].mxu0 %v4114_v55  ;;  %v4067_v18 = vadd.f32 %v9060_v9, %v4013_v62 }
 0x3d3   : > { %v3497_v10 = vpop.f32.mrb[216].mxu1 }
 0x3d4   : > { %v4014_v58 = vmul.f32 %v9054_v63, %v3960_v41  ;;  %v3803_v26 = vadd.f32 %v9105_v16, %v3497_v10  ;;  %v3499_v33 = vpop.f32.mrb[217].mxu1  ;;  %v4115_v46 = vmax.f32 %v4067_v18, 0.0 }
 0x3d5   : > { %v9172_v21 = vpop.f32.mrb[198].mxu0 }
 0x3d6   : > { %v9174_v47 = vpop.f32.mrb[199].mxu0  ;;  %v3961_v17 = vadd.f32 %v3803_v26, %v8949_v61  ;;  %5911 = vmatprep.mubr.f32.mxu0 %v4115_v46  ;;  %v4068_v15 = vadd.f32 %v9060_v9, %v4014_v58 }
 0x3d7   : > { %v3502_v13 = vpop.f32.mrb[218].mxu1 }
 0x3d8   : > { %v4015_v30 = vmul.f32 %v9054_v63, %v3961_v17  ;;  %v3808_v8 = vadd.f32 %v9103_v49, %v3502_v13  ;;  %v3504_v20 = vpop.f32.mrb[219].mxu1  ;;  %v4116_v16 = vmax.f32 %v4068_v15, 0.0 }
 0x3d9   : > { %v9180_v24 = vpop.f32.mrb[200].mxu0 }
 0x3da   : > { %v9182_v62 = vpop.f32.mrb[201].mxu0  ;;  %v3962_v38 = vadd.f32 %v3808_v8, %v8942_v39  ;;  %5912 = vmatmul.mubr.f32.gmra.mrb[226].mxu0 %v4116_v16  ;;  %v4069_v31 = vadd.f32 %v9060_v9, %v4015_v30 }
 0x3db   : > { %v3507_v61 = vpop.f32.mrb[220].mxu1 }
 0x3dc   : > { %v4016_v55 = vmul.f32 %v9054_v63, %v3962_v38  ;;  %v3813_v41 = vadd.f32 %v9112_v37, %v3507_v61  ;;  %v3509_v18 = vpop.f32.mrb[221].mxu1  ;;  %v4117_v49 = vmax.f32 %v4069_v31, 0.0 }
 0x3dd   : > { %v9188_v10 = vpop.f32.mrb[202].mxu0 }
 0x3de   : > { %v9190_v58 = vpop.f32.mrb[203].mxu0  ;;  %v3963_v26 = vadd.f32 %v3813_v41, %v8958_v34  ;;  %5914 = vmatprep.mubr.f32.mxu0 %v4117_v49  ;;  %v4070_v33 = vadd.f32 %v9060_v9, %v4016_v55 }
 0x3df   : > { %v3512_v39 = vpop.f32.mrb[222].mxu1 }
 0x3e0   : > { %v4017_v46 = vmul.f32 %v9054_v63, %v3963_v26  ;;  %v3818_v17 = vadd.f32 %v9110_v45, %v3512_v39  ;;  %v3514_v15 = vpop.f32.mrb[223].mxu1  ;;  %v4118_v13 = vmax.f32 %v4070_v33, 0.0 }
 0x3e1   : > { %v9196_v30 = vpop.f32.mrb[204].mxu0 }
 0x3e2   : > { %v9198_v37 = vpop.f32.mrb[205].mxu0  ;;  %v3964_v8 = vadd.f32 %v3818_v17, %v8953_v35  ;;  %5915 = vmatmul.mubr.f32.gmra.mrb[228].mxu0 %v4118_v13  ;;  %v4071_v20 = vadd.f32 %v9060_v9, %v4017_v46 }
 0x3e3   : > { %v3517_v34 = vpop.f32.mrb[224].mxu1 }
 0x3e4   : > { %v4018_v16 = vmul.f32 %v9054_v63, %v3964_v8  ;;  %v3823_v38 = vadd.f32 %v9119_v60, %v3517_v34  ;;  %v3519_v31 = vpop.f32.mrb[225].mxu1  ;;  %v4119_v61 = vmax.f32 %v4071_v20, 0.0 }
 0x3e5   : > { %v9204_v55 = vpop.f32.mrb[206].mxu0 }
 0x3e6   : > { %v9206_v45 = vpop.f32.mrb[207].mxu0  ;;  %v3965_v41 = vadd.f32 %v3823_v38, %v8969_v23  ;;  %5917 = vmatprep.mubr.f32.mxu0 %v4119_v61  ;;  %v4072_v18 = vadd.f32 %v9060_v9, %v4018_v16 }
 0x3e7   : > { %v3522_v35 = vpop.f32.mrb[226].mxu1 }
 0x3e8   : > { %v4019_v49 = vmul.f32 %v9054_v63, %v3965_v41  ;;  %v3828_v26 = vadd.f32 %v9117_v1, %v3522_v35  ;;  %v3524_v33 = vpop.f32.mrb[227].mxu1  ;;  %v4120_v39 = vmax.f32 %v4072_v18, 0.0 }
 0x3ea   : > { %v3966_v60 = vadd.f32 %v3828_v26, %v8964_v40  ;;  %5918 = vmatmul.mubr.f32.gmra.mrb[230].mxu0 %v4120_v39  ;;  %v4073_v46 = vadd.f32 %v9060_v9, %v4019_v49 }
 0x3eb   : > { %v3527_v17 = vpop.f32.mrb[228].mxu1 }
 0x3ec   : > { %v4020_v15 = vmul.f32 %v9054_v63, %v3966_v60  ;;  %v3833_v23 = vadd.f32 %v9126_v57, %v3527_v17  ;;  %v3529_v13 = vpop.f32.mrb[229].mxu1  ;;  %v4121_v8 = vmax.f32 %v4073_v46, 0.0 }
 0x3ee   : > { %v3967_v20 = vadd.f32 %v3833_v23, %v8982_v14  ;;  %5920 = vmatprep.mubr.f32.mxu0 %v4121_v8  ;;  %v4074_v34 = vadd.f32 %v9060_v9, %v4020_v15 }
 0x3ef   : > { %v3532_v1 = vpop.f32.mrb[230].mxu1 }
 0x3f0   : > { %v4021_v16 = vmul.f32 %v9054_v63, %v3967_v20  ;;  %v3838_v40 = vadd.f32 %v9124_v32, %v3532_v1  ;;  %v3534_v38 = vpop.f32.mrb[231].mxu1  ;;  %v4122_v31 = vmax.f32 %v4074_v34, 0.0 }
 0x3f2   : > { %v3968_v61 = vadd.f32 %v3838_v40, %v8975_v53  ;;  %5921 = vmatmul.mubr.f32.gmra.mrb[232].mxu0 %v4122_v31  ;;  %v4075_v41 = vadd.f32 %v9060_v9, %v4021_v16 }
 0x3f3   : > { %v3537_v57 = vpop.f32.mrb[232].mxu1 }
 0x3f4   : > { %v4022_v18 = vmul.f32 %v9054_v63, %v3968_v61  ;;  %v3843_v14 = vadd.f32 %v9134_v11, %v3537_v57  ;;  %v3539_v35 = vpop.f32.mrb[233].mxu1  ;;  %v4123_v49 = vmax.f32 %v4075_v41, 0.0 }
 0x3f6   : > { %v3969_v26 = vadd.f32 %v3843_v14, %v8991_v54  ;;  %5923 = vmatprep.mubr.f32.mxu0 %v4123_v49  ;;  %v4076_v33 = vadd.f32 %v9060_v9, %v4022_v18 }
 0x3f7   : > { %v3542_v32 = vpop.f32.mrb[234].mxu1 }
 0x3f8   : > { %v4023_v39 = vmul.f32 %v9054_v63, %v3969_v26  ;;  %v3848_v53 = vadd.f32 %v9132_v48, %v3542_v32  ;;  %v3544_v60 = vpop.f32.mrb[235].mxu1  ;;  %v4124_v46 = vmax.f32 %v4076_v33, 0.0 }
 0x3fa   : > { %v3970_v17 = vadd.f32 %v3848_v53, %v8986_v19  ;;  %5924 = vmatmul.mubr.f32.gmra.mrb[234].mxu0 %v4124_v46  ;;  %v4077_v15 = vadd.f32 %v9060_v9, %v4023_v39 }
 0x3fb   : > { %v3547_v11 = vpop.f32.mrb[236].mxu1 }
 0x3fc   : > { %v4024_v23 = vmul.f32 %v9054_v63, %v3970_v17  ;;  %v3853_v54 = vadd.f32 %v9142_v12, %v3547_v11  ;;  %v3549_v13 = vpop.f32.mrb[237].mxu1  ;;  %v4125_v8 = vmax.f32 %v4077_v15, 0.0 }
 0x3fe   : > { %v3971_v20 = vadd.f32 %v3853_v54, %v9001_v29  ;;  %5926 = vmatprep.mubr.f32.mxu0 %v4125_v8  ;;  %v4078_v34 = vadd.f32 %v9060_v9, %v4024_v23 }
 0x3ff   : > { %v3552_v48 = vpop.f32.mrb[238].mxu1 }
 0x400   : > { %v4025_v1 = vmul.f32 %v9054_v63, %v3971_v20  ;;  %v3858_v19 = vadd.f32 %v9140_v56, %v3552_v48  ;;  %v3554_v16 = vpop.f32.mrb[239].mxu1  ;;  %v4126_v40 = vmax.f32 %v4078_v34, 0.0 }
 0x402   : > { %v3972_v38 = vadd.f32 %v3858_v19, %v8996_v51  ;;  %5927 = vmatmul.mubr.f32.gmra.mrb[236].mxu0 %v4126_v40  ;;  %v4079_v31 = vadd.f32 %v9060_v9, %v4025_v1 }
 0x403   : > { %v3557_v12 = vpop.f32.mrb[240].mxu1 }
 0x404   : > { %v4026_v61 = vmul.f32 %v9054_v63, %v3972_v38  ;;  %v3863_v29 = vadd.f32 %v9150_v50, %v3557_v12  ;;  %v3559_v41 = vpop.f32.mrb[241].mxu1  ;;  %v4127_v57 = vmax.f32 %v4079_v31, 0.0 }
 0x406   : > { %v3973_v18 = vadd.f32 %v3863_v29, %v9009_v7  ;;  %5929 = vmatprep.mubr.f32.mxu0 %v4127_v57  ;;  %v4080_v14 = vadd.f32 %v9060_v9, %v4026_v61 }
 0x407   : > { %v3562_v56 = vpop.f32.mrb[242].mxu1 }
 0x408   : > { %v4027_v35 = vmul.f32 %v9054_v63, %v3973_v18  ;;  %v3868_v51 = vadd.f32 %v9148_v52, %v3562_v56  ;;  %v3564_v49 = vpop.f32.mrb[243].mxu1  ;;  %v4128_v26 = vmax.f32 %v4080_v14, 0.0 }
 0x40a   : > { %v3974_v33 = vadd.f32 %v3868_v51, %v9004_v25  ;;  %5930 = vmatmul.mubr.f32.gmra.mrb[238].mxu0 %v4128_v26  ;;  %v4081_v32 = vadd.f32 %v9060_v9, %v4027_v35 }
 0x40b   : > { %v3567_v50 = vpop.f32.mrb[244].mxu1 }
 0x40c   : > { %v4028_v39 = vmul.f32 %v9054_v63, %v3974_v33  ;;  %v3873_v7 = vadd.f32 %v9158_v36, %v3567_v50  ;;  %v3569_v53 = vpop.f32.mrb[245].mxu1  ;;  %v4129_v60 = vmax.f32 %v4081_v32, 0.0 }
 0x40e   : > { %v3975_v46 = vadd.f32 %v3873_v7, %v9016_v4  ;;  %5932 = vmatprep.mubr.f32.mxu0 %v4129_v60  ;;  %v4082_v17 = vadd.f32 %v9060_v9, %v4028_v39 }
 0x40f   : > { %v3572_v52 = vpop.f32.mrb[246].mxu1 }
 0x410   : > { %v4029_v15 = vmul.f32 %v9054_v63, %v3975_v46  ;;  %v3878_v25 = vadd.f32 %v9156_v2, %v3572_v52  ;;  %v3574_v11 = vpop.f32.mrb[247].mxu1  ;;  %v4130_v23 = vmax.f32 %v4082_v17, 0.0 }
 0x412   : > { %v3976_v54 = vadd.f32 %v3878_v25, %v9012_v42  ;;  %5933 = vmatmul.mubr.f32.gmra.mrb[240].mxu0 %v4130_v23  ;;  %v4083_v13 = vadd.f32 %v9060_v9, %v4029_v15 }
 0x413   : > { %v3577_v36 = vpop.f32.mrb[248].mxu1 }
 0x414   : > { %v4030_v8 = vmul.f32 %v9054_v63, %v3976_v54  ;;  %v3883_v4 = vadd.f32 %v9166_v27, %v3577_v36  ;;  %v3579_v20 = vpop.f32.mrb[249].mxu1  ;;  %v4131_v34 = vmax.f32 %v4083_v13, 0.0  ;;  %v10224_v36 = vld [vmem:[#allocation71_spill] sm:$0xff] }
 0x416   : > { %v3977_v48 = vadd.f32 %v3883_v4, %v9023_v3  ;;  %5935 = vmatprep.mubr.f32.mxu0 %v4131_v34  ;;  %v4084_v1 = vadd.f32 %v9060_v9, %v4030_v8 }
 0x417   : > { %v3582_v2 = vpop.f32.mrb[250].mxu1 }
 0x418   : > { %v4031_v19 = vmul.f32 %v9054_v63, %v3977_v48  ;;  %v3888_v42 = vadd.f32 %v9164_v43, %v3582_v2  ;;  %v3584_v16 = vpop.f32.mrb[251].mxu1  ;;  %v4132_v40 = vmax.f32 %v4084_v1, 0.0 }
 0x41a   : > { %v3978_v38 = vadd.f32 %v3888_v42, %v9019_v0  ;;  %5936 = vmatmul.mubr.f32.gmra.mrb[242].mxu0 %v4132_v40  ;;  %v4085_v31 = vadd.f32 %v9060_v9, %v4031_v19 }
 0x41b   : > { %v3587_v27 = vpop.f32.mrb[252].mxu1 }
 0x41c   : > { %v4032_v12 = vmul.f32 %v9054_v63, %v3978_v38  ;;  %v3893_v3 = vadd.f32 %v9174_v47, %v3587_v27  ;;  %v3589_v61 = vpop.f32.mrb[253].mxu1  ;;  %v4133_v29 = vmax.f32 %v4085_v31, 0.0  ;;  %v10225_v38 = vld [vmem:[#allocation70_spill] sm:$0xff] }
 0x41e   : > { %v3979_v41 = vadd.f32 %v3893_v3, %v9028_v44  ;;  %5938 = vmatprep.mubr.f32.mxu0 %v4133_v29  ;;  %v4086_v57 = vadd.f32 %v9060_v9, %v4032_v12  ;;  %v10226_v29 = vld [vmem:[#allocation90_spill] sm:$0xff] }
 0x41f   : > { %v3592_v43 = vpop.f32.mrb[254].mxu1 }
 0x420   : > { %v4033_v18 = vmul.f32 %v9054_v63, %v3979_v41  ;;  %v3898_v0 = vadd.f32 %v9172_v21, %v3592_v43  ;;  %v3594_v14 = vpop.f32.mrb[255].mxu1  ;;  %v4134_v56 = vmax.f32 %v4086_v57, 0.0 }
 0x422   : > { %v3980_v35 = vadd.f32 %v3898_v0, %v9025_v28  ;;  %5939 = vmatmul.mubr.f32.gmra.mrb[244].mxu0 %v4134_v56  ;;  %v4087_v51 = vadd.f32 %v9060_v9, %v4033_v18  ;;  %v10227_v56 = vld [vmem:[#allocation85_spill] sm:$0xff] }
 0x423   : > { %v3597_v47 = vpop.f32.mrb[0].mxu1 }
 0x424   : > { %v4034_v49 = vmul.f32 %v9054_v63, %v3980_v35  ;;  %v3903_v44 = vadd.f32 %v9182_v62, %v3597_v47  ;;  %v3599_v26 = vpop.f32.mrb[1].mxu1  ;;  %v4135_v33 = vmax.f32 %v4087_v51, 0.0 }
 0x425   : > { %v9312_v26 = vld [vmem:[%s10228_s24] ss:$0 sm:$0xff] }
 0x426   : > { %v3981_v32 = vadd.f32 %v3903_v44, %v9033_v6  ;;  %5941 = vmatprep.mubr.f32.mxu0 %v4135_v33  ;;  %v4088_v50 = vadd.f32 %v9060_v9, %v4034_v49 }
 0x427   : > { %v3602_v21 = vpop.f32.mrb[2].mxu1 }
 0x428   : > { %v4035_v39 = vmul.f32 %v9054_v63, %v3981_v32  ;;  %v3908_v28 = vadd.f32 %v9180_v24, %v3602_v21  ;;  %v3604_v7 = vpop.f32.mrb[3].mxu1  ;;  %v4136_v53 = vmax.f32 %v4088_v50, 0.0  ;;  %v4451_v50 = vld [vmem:[%s6832_s25 + $0x8] sm:$0xff] }
 0x42a   : > { %v3982_v60 = vadd.f32 %v3908_v28, %v9030_v59  ;;  %5942 = vmatmul.mubr.f32.gmra.mrb[246].mxu0 %v4136_v53  ;;  %v4089_v46 = vadd.f32 %v9060_v9, %v4035_v39  ;;  %v4450_v39 = vld [vmem:[%s6832_s25] sm:$0xff] }
 0x42b   : > { %v3607_v62 = vpop.f32.mrb[4].mxu1 }
 0x42c   : > { %v4036_v17 = vmul.f32 %v9054_v63, %v3982_v60  ;;  %v3913_v6 = vadd.f32 %v9190_v58, %v3607_v62  ;;  %v3609_v52 = vpop.f32.mrb[5].mxu1  ;;  %v4137_v15 = vmax.f32 %v4089_v46, 0.0 }
 0x42e   : > { %v3983_v25 = vadd.f32 %v3913_v6, %v9038_v5  ;;  %5944 = vmatprep.mubr.f32.mxu0 %v4137_v15  ;;  %v4090_v11 = vadd.f32 %v9060_v9, %v4036_v17  ;;  %v4453_v6 = vld [vmem:[%s6832_s25 + $0x18] sm:$0xff] }
 0x42f   : > { %v3612_v24 = vpop.f32.mrb[6].mxu1 }
 0x430   : > { %v4037_v23 = vmul.f32 %v9054_v63, %v3983_v25  ;;  %v3918_v59 = vadd.f32 %v9188_v10, %v3612_v24  ;;  %v3614_v54 = vpop.f32.mrb[7].mxu1  ;;  %v4138_v13 = vmax.f32 %v4090_v11, 0.0  ;;  %v4452_v11 = vld [vmem:[%s6832_s25 + $0x10] sm:$0xff] }
 0x432   : > { %v3984_v8 = vadd.f32 %v3918_v59, %v10224_v36  ;;  %5945 = vmatmul.mubr.f32.gmra.mrb[248].mxu0 %v4138_v13  ;;  %v4091_v4 = vadd.f32 %v9060_v9, %v4037_v23 }
 0x433   : > { %v3617_v58 = vpop.f32.mrb[8].mxu1 }
 0x434   : > { %v4038_v20 = vmul.f32 %v9054_v63, %v3984_v8  ;;  %v3923_v5 = vadd.f32 %v9198_v37, %v3617_v58  ;;  %v3619_v34 = vpop.f32.mrb[9].mxu1  ;;  %v4139_v48 = vmax.f32 %v4091_v4, 0.0  ;;  %v4455_v58 = vld [vmem:[%s6832_s25 + $0x28] sm:$0xff] }
 0x435   : > { %v4454_v34 = vld [vmem:[%s6832_s25 + $0x20] sm:$0xff] }
 0x436   : > { %v3985_v1 = vadd.f32 %v3923_v5, %v9041_v22  ;;  %5947 = vmatprep.mubr.f32.mxu0 %v4139_v48  ;;  %v4092_v2 = vadd.f32 %v9060_v9, %v4038_v20 }
 0x437   : > { %v3622_v10 = vpop.f32.mrb[10].mxu1 }
 0x438   : > { %v4039_v19 = vmul.f32 %v9054_v63, %v3985_v1  ;;  %v3928_v42 = vadd.f32 %v9196_v30, %v3622_v10  ;;  %v3624_v16 = vpop.f32.mrb[11].mxu1  ;;  %v4140_v40 = vmax.f32 %v4092_v2, 0.0 }
 0x43a   : > { %v3986_v31 = vadd.f32 %v3928_v42, %v10225_v38  ;;  %5948 = vmatmul.mubr.f32.gmra.mrb[250].mxu0 %v4140_v40  ;;  %v4093_v27 = vadd.f32 %v9060_v9, %v4039_v19  ;;  %v4457_v38 = vld [vmem:[%s6832_s25 + $0x38] sm:$0xff] }
 0x43b   : > { %v3627_v37 = vpop.f32.mrb[12].mxu1 }
 0x43c   : > { %v4040_v12 = vmul.f32 %v9054_v63, %v3986_v31  ;;  %v3933_v22 = vadd.f32 %v9206_v45, %v3627_v37  ;;  %v3629_v3 = vpop.f32.mrb[13].mxu1  ;;  %v4141_v61 = vmax.f32 %v4093_v27, 0.0  ;;  %v4456_v37 = vld [vmem:[%s6832_s25 + $0x30] sm:$0xff] }
 0x43e   : > { %v3987_v41 = vadd.f32 %v3933_v22, %v10226_v29  ;;  %5950 = vmatprep.mubr.f32.mxu0 %v4141_v61  ;;  %v4094_v57 = vadd.f32 %v9060_v9, %v4040_v12 }
 0x43f   : > { %v3632_v30 = vpop.f32.mrb[14].mxu1 }
 0x440   : > { %v4041_v43 = vmul.f32 %v9054_v63, %v3987_v41  ;;  %v3938_v18 = vadd.f32 %v9204_v55, %v3632_v30  ;;  %v3634_v0 = vpop.f32.mrb[15].mxu1  ;;  %v4142_v14 = vmax.f32 %v4094_v57, 0.0  ;;  %v9307_v55 = vld [vmem:[%s9569_s8] ss:$0 sm:$0xff] }
 0x442   : > { %v3988_v35 = vadd.f32 %v3938_v18, %v10227_v56  ;;  %5951 = vmatmul.mubr.f32.gmra.mrb[252].mxu0 %v4142_v14  ;;  %v4095_v45 = vadd.f32 %v9060_v9, %v4041_v43  ;;  %v4459_v43 = vld [vmem:[%s6832_s25 + $0x48] sm:$0xff]  ;;  %v4458_v14 = vld [vmem:[%s6832_s25 + $0x40] sm:$0xff] }
 0x444   : > { %v4042_v51 = vmul.f32 %v9054_v63, %v3988_v35  ;;  %v4143_v47 = vmax.f32 %v4095_v45, 0.0 }
 0x446   : > { %5953 = vmatprep.mubr.f32.mxu0 %v4143_v47  ;;  %v4096_v49 = vadd.f32 %v9060_v9, %v4042_v51 }
 0x448   : > { %v4144_v44 = vmax.f32 %v4096_v49, 0.0 }
 0x44a   : > { %5954 = vmatmul.mubr.f32.gmra.mrb[254].mxu0 %v4144_v44 }
 0x469   : > { %v5886_v33 = vpop.f32.mrb[208].mxu0 }
 0x46a   : > { %v4505_v63 = vmul.f32 %v5886_v33, %v9307_v55  ;;  %v4211_v32 = vpop.f32.mrb[209].mxu0 }
 0x46b   : > { %v4504_v9 = vmul.f32 %v9307_v55, %v4211_v32 }
 0x46c   : > { %v4559_v21 = vadd.f32 %v9312_v26, %v4505_v63  ;;  %v4461_v63 = vld [vmem:[%s6832_s25 + $0x58] sm:$0xff] }
 0x46d   : > { %v4558_v28 = vadd.f32 %v9312_v26, %v4504_v9  ;;  %v5889_v53 = vpop.f32.mrb[210].mxu0  ;;  %v4460_v9 = vld [vmem:[%s6832_s25 + $0x50] sm:$0xff] }
 0x46e   : > { %v4607_v7 = vadd.f32 %v4559_v21, %v4451_v50  ;;  %v4507_v46 = vmul.f32 %v5889_v53, %v9307_v55  ;;  %v4221_v62 = vpop.f32.mrb[211].mxu0 }
 0x46f   : > { %v4606_v60 = vadd.f32 %v4558_v28, %v4450_v39  ;;  %v4506_v52 = vmul.f32 %v9307_v55, %v4221_v62 }
 0x470   : > { %v4655_v17 = vmax.f32 %v4607_v7, 0.0  ;;  %v4561_v25 = vadd.f32 %v9312_v26, %v4507_v46 }
 0x471   : > { %v4654_v15 = vmax.f32 %v4606_v60, 0.0  ;;  %v4560_v24 = vadd.f32 %v9312_v26, %v4506_v52 }
 0x472   : > { %4703 = vst [vmem:[%s9327_s12 + $0x8] sm:$0xff] %v4655_v17  ;;  %v4609_v23 = vadd.f32 %v4561_v25, %v4453_v6  ;;  %v4463_v17 = vld [vmem:[%s6832_s25 + $0x68] sm:$0xff] }
 0x473   : > { %4702 = vst [vmem:[%s9327_s12] sm:$0xff] %v4654_v15  ;;  %v4608_v59 = vadd.f32 %v4560_v24, %v4452_v11  ;;  %v4462_v15 = vld [vmem:[%s6832_s25 + $0x60] sm:$0xff] }
 0x474   : > { %v4657_v54 = vmax.f32 %v4609_v23, 0.0 }
 0x475   : > { %v4656_v13 = vmax.f32 %v4608_v59, 0.0  ;;  %v5892_v36 = vpop.f32.mrb[212].mxu0 }
 0x476   : > { %4705 = vst [vmem:[%s9327_s12 + $0x18] sm:$0xff] %v4657_v54  ;;  %v4509_v8 = vmul.f32 %v5892_v36, %v9307_v55  ;;  %v4231_v4 = vpop.f32.mrb[213].mxu0 }
 0x477   : > { %4704 = vst [vmem:[%s9327_s12 + $0x10] sm:$0xff] %v4656_v13  ;;  %v4508_v20 = vmul.f32 %v9307_v55, %v4231_v4 }
 0x478   : > { %v4563_v5 = vadd.f32 %v9312_v26, %v4509_v8  ;;  %v4465_v8 = vld [vmem:[%s6832_s25 + $0x78] sm:$0xff] }
 0x479   : > { %v4562_v48 = vadd.f32 %v9312_v26, %v4508_v20  ;;  %v4464_v20 = vld [vmem:[%s6832_s25 + $0x70] sm:$0xff] }
 0x47a   : > { %v4611_v1 = vadd.f32 %v4563_v5, %v4455_v58 }
 0x47b   : > { %v4610_v2 = vadd.f32 %v4562_v48, %v4454_v34 }
 0x47c   : > { %v4659_v10 = vmax.f32 %v4611_v1, 0.0 }
 0x47d   : > { %v4658_v19 = vmax.f32 %v4610_v2, 0.0  ;;  %v5895_v42 = vpop.f32.mrb[214].mxu0 }
 0x47e   : > { %4707 = vst [vmem:[%s9327_s12 + $0x28] sm:$0xff] %v4659_v10  ;;  %v4511_v16 = vmul.f32 %v5895_v42, %v9307_v55  ;;  %v4241_v40 = vpop.f32.mrb[215].mxu0 }
 0x47f   : > { %4706 = vst [vmem:[%s9327_s12 + $0x20] sm:$0xff] %v4658_v19  ;;  %v4510_v31 = vmul.f32 %v9307_v55, %v4241_v40 }
 0x480   : > { %v4565_v27 = vadd.f32 %v9312_v26, %v4511_v16  ;;  %v4467_v16 = vld [vmem:[%s6832_s25 + $0x88] sm:$0xff] }
 0x481   : > { %v4564_v12 = vadd.f32 %v9312_v26, %v4510_v31  ;;  %v4466_v31 = vld [vmem:[%s6832_s25 + $0x80] sm:$0xff] }
 0x482   : > { %v4613_v22 = vadd.f32 %v4565_v27, %v4457_v38 }
 0x483   : > { %v4612_v3 = vadd.f32 %v4564_v12, %v4456_v37 }
 0x484   : > { %v4661_v61 = vmax.f32 %v4613_v22, 0.0 }
 0x485   : > { %v4660_v29 = vmax.f32 %v4612_v3, 0.0  ;;  %v5898_v41 = vpop.f32.mrb[216].mxu0 }
 0x486   : > { %4709 = vst [vmem:[%s9327_s12 + $0x38] sm:$0xff] %v4661_v61  ;;  %v4513_v57 = vmul.f32 %v5898_v41, %v9307_v55  ;;  %v4251_v30 = vpop.f32.mrb[217].mxu0 }
 0x487   : > { %4708 = vst [vmem:[%s9327_s12 + $0x30] sm:$0xff] %v4660_v29  ;;  %v4512_v18 = vmul.f32 %v9307_v55, %v4251_v30 }
 0x488   : > { %v4567_v0 = vadd.f32 %v9312_v26, %v4513_v57  ;;  %v4469_v57 = vld [vmem:[%s6832_s25 + $0x98] sm:$0xff] }
 0x489   : > { %v4566_v56 = vadd.f32 %v9312_v26, %v4512_v18  ;;  %v4468_v18 = vld [vmem:[%s6832_s25 + $0x90] sm:$0xff] }
 0x48a   : > { %v4615_v35 = vadd.f32 %v4567_v0, %v4459_v43 }
 0x48b   : > { %v4614_v45 = vadd.f32 %v4566_v56, %v4458_v14 }
 0x48c   : > { %v4663_v51 = vmax.f32 %v4615_v35, 0.0 }
 0x48d   : > { %v4662_v47 = vmax.f32 %v4614_v45, 0.0  ;;  %v5901_v49 = vpop.f32.mrb[218].mxu0 }
 0x48e   : > { %4711 = vst [vmem:[%s9327_s12 + $0x48] sm:$0xff] %v4663_v51  ;;  %v4515_v44 = vmul.f32 %v5901_v49, %v9307_v55  ;;  %v4261_v33 = vpop.f32.mrb[219].mxu0 }
 0x48f   : > { %4710 = vst [vmem:[%s9327_s12 + $0x40] sm:$0xff] %v4662_v47  ;;  %v4514_v32 = vmul.f32 %v9307_v55, %v4261_v33 }
 0x490   : > { %v4569_v50 = vadd.f32 %v9312_v26, %v4515_v44  ;;  %v4471_v44 = vld [vmem:[%s6832_s25 + $0xa8] sm:$0xff] }
 0x491   : > { %v4568_v21 = vadd.f32 %v9312_v26, %v4514_v32  ;;  %v4470_v32 = vld [vmem:[%s6832_s25 + $0xa0] sm:$0xff] }
 0x492   : > { %v4617_v39 = vadd.f32 %v4569_v50, %v4461_v63 }
 0x493   : > { %v4616_v28 = vadd.f32 %v4568_v21, %v4460_v9 }
 0x494   : > { %v4665_v7 = vmax.f32 %v4617_v39, 0.0 }
 0x495   : > { %v4664_v53 = vmax.f32 %v4616_v28, 0.0  ;;  %v5904_v60 = vpop.f32.mrb[220].mxu0 }
 0x496   : > { %4713 = vst [vmem:[%s9327_s12 + $0x58] sm:$0xff] %v4665_v7  ;;  %v4517_v46 = vmul.f32 %v5904_v60, %v9307_v55  ;;  %v4271_v62 = vpop.f32.mrb[221].mxu0 }
 0x497   : > { %4712 = vst [vmem:[%s9327_s12 + $0x50] sm:$0xff] %v4664_v53  ;;  %v4516_v6 = vmul.f32 %v9307_v55, %v4271_v62 }
 0x498   : > { %v4571_v52 = vadd.f32 %v9312_v26, %v4517_v46  ;;  %v4473_v46 = vld [vmem:[%s6832_s25 + $0xb8] sm:$0xff] }
 0x499   : > { %v4570_v25 = vadd.f32 %v9312_v26, %v4516_v6  ;;  %v4472_v6 = vld [vmem:[%s6832_s25 + $0xb0] sm:$0xff] }
 0x49a   : > { %v4619_v11 = vadd.f32 %v4571_v52, %v4463_v17 }
 0x49b   : > { %v4618_v24 = vadd.f32 %v4570_v25, %v4462_v15 }
 0x49c   : > { %v4667_v23 = vmax.f32 %v4619_v11, 0.0 }
 0x49d   : > { %v4666_v59 = vmax.f32 %v4618_v24, 0.0  ;;  %v5907_v54 = vpop.f32.mrb[222].mxu0 }
 0x49e   : > { %4715 = vst [vmem:[%s9327_s12 + $0x68] sm:$0xff] %v4667_v23  ;;  %v4519_v13 = vmul.f32 %v5907_v54, %v9307_v55  ;;  %v4281_v36 = vpop.f32.mrb[223].mxu0 }
 0x49f   : > { %4714 = vst [vmem:[%s9327_s12 + $0x60] sm:$0xff] %v4666_v59  ;;  %v4518_v4 = vmul.f32 %v9307_v55, %v4281_v36 }
 0x4a0   : > { %v4573_v58 = vadd.f32 %v9312_v26, %v4519_v13  ;;  %v4475_v13 = vld [vmem:[%s6832_s25 + $0xc8] sm:$0xff] }
 0x4a1   : > { %v4572_v5 = vadd.f32 %v9312_v26, %v4518_v4  ;;  %v4474_v4 = vld [vmem:[%s6832_s25 + $0xc0] sm:$0xff] }
 0x4a2   : > { %v4621_v34 = vadd.f32 %v4573_v58, %v4465_v8 }
 0x4a3   : > { %v4620_v48 = vadd.f32 %v4572_v5, %v4464_v20 }
 0x4a4   : > { %v4669_v1 = vmax.f32 %v4621_v34, 0.0 }
 0x4a5   : > { %v4668_v2 = vmax.f32 %v4620_v48, 0.0  ;;  %v5910_v10 = vpop.f32.mrb[224].mxu0 }
 0x4a6   : > { %4717 = vst [vmem:[%s9327_s12 + $0x78] sm:$0xff] %v4669_v1  ;;  %v4521_v19 = vmul.f32 %v5910_v10, %v9307_v55  ;;  %v4291_v42 = vpop.f32.mrb[225].mxu0 }
 0x4a7   : > { %4716 = vst [vmem:[%s9327_s12 + $0x70] sm:$0xff] %v4668_v2  ;;  %v4520_v40 = vmul.f32 %v9307_v55, %v4291_v42 }
 0x4a8   : > { %v4575_v38 = vadd.f32 %v9312_v26, %v4521_v19  ;;  %v4477_v19 = vld [vmem:[%s6832_s25 + $0xd8] sm:$0xff] }
 0x4a9   : > { %v4574_v27 = vadd.f32 %v9312_v26, %v4520_v40  ;;  %v4476_v40 = vld [vmem:[%s6832_s25 + $0xd0] sm:$0xff] }
 0x4aa   : > { %v4623_v37 = vadd.f32 %v4575_v38, %v4467_v16 }
 0x4ab   : > { %v4622_v12 = vadd.f32 %v4574_v27, %v4466_v31 }
 0x4ac   : > { %v4671_v22 = vmax.f32 %v4623_v37, 0.0 }
 0x4ad   : > { %v4670_v3 = vmax.f32 %v4622_v12, 0.0  ;;  %v5913_v61 = vpop.f32.mrb[226].mxu0 }
 0x4ae   : > { %4719 = vst [vmem:[%s9327_s12 + $0x88] sm:$0xff] %v4671_v22  ;;  %v4523_v29 = vmul.f32 %v5913_v61, %v9307_v55  ;;  %v4301_v41 = vpop.f32.mrb[227].mxu0 }
 0x4af   : > { %4718 = vst [vmem:[%s9327_s12 + $0x80] sm:$0xff] %v4670_v3  ;;  %v4522_v30 = vmul.f32 %v9307_v55, %v4301_v41 }
 0x4b0   : > { %v4577_v43 = vadd.f32 %v9312_v26, %v4523_v29  ;;  %v4479_v29 = vld [vmem:[%s6832_s25 + $0xe8] sm:$0xff] }
 0x4b1   : > { %v4576_v0 = vadd.f32 %v9312_v26, %v4522_v30  ;;  %v4478_v30 = vld [vmem:[%s6832_s25 + $0xe0] sm:$0xff] }
 0x4b2   : > { %v4625_v14 = vadd.f32 %v4577_v43, %v4469_v57 }
 0x4b3   : > { %v4624_v56 = vadd.f32 %v4576_v0, %v4468_v18 }
 0x4b4   : > { %v4673_v35 = vmax.f32 %v4625_v14, 0.0 }
 0x4b5   : > { %v4672_v45 = vmax.f32 %v4624_v56, 0.0  ;;  %v5916_v51 = vpop.f32.mrb[228].mxu0 }
 0x4b6   : > { %4721 = vst [vmem:[%s9327_s12 + $0x98] sm:$0xff] %v4673_v35  ;;  %v4525_v47 = vmul.f32 %v5916_v51, %v9307_v55  ;;  %v4311_v49 = vpop.f32.mrb[229].mxu0 }
 0x4b7   : > { %4720 = vst [vmem:[%s9327_s12 + $0x90] sm:$0xff] %v4672_v45  ;;  %v4524_v33 = vmul.f32 %v9307_v55, %v4311_v49 }
 0x4b8   : > { %v4579_v63 = vadd.f32 %v9312_v26, %v4525_v47  ;;  %v4481_v47 = vld [vmem:[%s6832_s25 + $0xf8] sm:$0xff] }
 0x4b9   : > { %v4578_v50 = vadd.f32 %v9312_v26, %v4524_v33  ;;  %v4480_v33 = vld [vmem:[%s6832_s25 + $0xf0] sm:$0xff] }
 0x4ba   : > { %v4627_v9 = vadd.f32 %v4579_v63, %v4471_v44 }
 0x4bb   : > { %v4626_v21 = vadd.f32 %v4578_v50, %v4470_v32 }
 0x4bc   : > { %v4675_v39 = vmax.f32 %v4627_v9, 0.0 }
 0x4bd   : > { %v4674_v28 = vmax.f32 %v4626_v21, 0.0  ;;  %v5919_v7 = vpop.f32.mrb[230].mxu0 }
 0x4be   : > { %4723 = vst [vmem:[%s9327_s12 + $0xa8] sm:$0xff] %v4675_v39  ;;  %v4527_v53 = vmul.f32 %v5919_v7, %v9307_v55  ;;  %v4321_v60 = vpop.f32.mrb[231].mxu0 }
 0x4bf   : > { %4722 = vst [vmem:[%s9327_s12 + $0xa0] sm:$0xff] %v4674_v28  ;;  %v4526_v62 = vmul.f32 %v9307_v55, %v4321_v60 }
 0x4c0   : > { %v4581_v17 = vadd.f32 %v9312_v26, %v4527_v53  ;;  %v4483_v53 = vld [vmem:[%s6832_s25 + $0x108] sm:$0xff] }
 0x4c1   : > { %v4580_v52 = vadd.f32 %v9312_v26, %v4526_v62  ;;  %v4482_v62 = vld [vmem:[%s6832_s25 + $0x100] sm:$0xff] }
 0x4c2   : > { %v4629_v15 = vadd.f32 %v4581_v17, %v4473_v46 }
 0x4c3   : > { %v4628_v25 = vadd.f32 %v4580_v52, %v4472_v6 }
 0x4c4   : > { %v4677_v11 = vmax.f32 %v4629_v15, 0.0 }
 0x4c5   : > { %v4676_v24 = vmax.f32 %v4628_v25, 0.0  ;;  %v5922_v23 = vpop.f32.mrb[232].mxu0 }
 0x4c6   : > { %4725 = vst [vmem:[%s9327_s12 + $0xb8] sm:$0xff] %v4677_v11  ;;  %v4529_v59 = vmul.f32 %v5922_v23, %v9307_v55  ;;  %v4331_v54 = vpop.f32.mrb[233].mxu0 }
 0x4c7   : > { %4724 = vst [vmem:[%s9327_s12 + $0xb0] sm:$0xff] %v4676_v24  ;;  %v4528_v36 = vmul.f32 %v9307_v55, %v4331_v54 }
 0x4c8   : > { %v4583_v8 = vadd.f32 %v9312_v26, %v4529_v59  ;;  %v4485_v59 = vld [vmem:[%s6832_s25 + $0x118] sm:$0xff] }
 0x4c9   : > { %v4582_v58 = vadd.f32 %v9312_v26, %v4528_v36  ;;  %v4484_v36 = vld [vmem:[%s6832_s25 + $0x110] sm:$0xff] }
 0x4ca   : > { %v4631_v20 = vadd.f32 %v4583_v8, %v4475_v13 }
 0x4cb   : > { %v4630_v5 = vadd.f32 %v4582_v58, %v4474_v4 }
 0x4cc   : > { %v4679_v34 = vmax.f32 %v4631_v20, 0.0 }
 0x4cd   : > { %v4678_v48 = vmax.f32 %v4630_v5, 0.0  ;;  %v5925_v1 = vpop.f32.mrb[234].mxu0 }
 0x4ce   : > { %4727 = vst [vmem:[%s9327_s12 + $0xc8] sm:$0xff] %v4679_v34  ;;  %v4531_v2 = vmul.f32 %v5925_v1, %v9307_v55  ;;  %v4341_v10 = vpop.f32.mrb[235].mxu0 }
 0x4cf   : > { %4726 = vst [vmem:[%s9327_s12 + $0xc0] sm:$0xff] %v4678_v48  ;;  %v4530_v42 = vmul.f32 %v9307_v55, %v4341_v10 }
 0x4d0   : > { %v4585_v16 = vadd.f32 %v9312_v26, %v4531_v2  ;;  %v4487_v2 = vld [vmem:[%s6832_s25 + $0x128] sm:$0xff] }
 0x4d1   : > { %v4584_v38 = vadd.f32 %v9312_v26, %v4530_v42  ;;  %v4486_v42 = vld [vmem:[%s6832_s25 + $0x120] sm:$0xff] }
 0x4d2   : > { %v4633_v31 = vadd.f32 %v4585_v16, %v4477_v19 }
 0x4d3   : > { %v4632_v27 = vadd.f32 %v4584_v38, %v4476_v40 }
 0x4d4   : > { %v4681_v37 = vmax.f32 %v4633_v31, 0.0 }
 0x4d5   : > { %v4680_v12 = vmax.f32 %v4632_v27, 0.0  ;;  %v5928_v22 = vpop.f32.mrb[236].mxu0 }
 0x4d6   : > { %4729 = vst [vmem:[%s9327_s12 + $0xd8] sm:$0xff] %v4681_v37  ;;  %v4533_v3 = vmul.f32 %v5928_v22, %v9307_v55  ;;  %v4351_v61 = vpop.f32.mrb[237].mxu0 }
 0x4d7   : > { %4728 = vst [vmem:[%s9327_s12 + $0xd0] sm:$0xff] %v4680_v12  ;;  %v4532_v41 = vmul.f32 %v9307_v55, %v4351_v61 }
 0x4d8   : > { %v4587_v57 = vadd.f32 %v9312_v26, %v4533_v3  ;;  %v4489_v3 = vld [vmem:[%s6832_s25 + $0x138] sm:$0xff] }
 0x4d9   : > { %v4586_v43 = vadd.f32 %v9312_v26, %v4532_v41  ;;  %v4488_v41 = vld [vmem:[%s6832_s25 + $0x130] sm:$0xff] }
 0x4da   : > { %v4635_v18 = vadd.f32 %v4587_v57, %v4479_v29 }
 0x4db   : > { %v4634_v0 = vadd.f32 %v4586_v43, %v4478_v30 }
 0x4dc   : > { %v4683_v14 = vmax.f32 %v4635_v18, 0.0 }
 0x4dd   : > { %v4682_v56 = vmax.f32 %v4634_v0, 0.0  ;;  %v5931_v35 = vpop.f32.mrb[238].mxu0 }
 0x4de   : > { %4731 = vst [vmem:[%s9327_s12 + $0xe8] sm:$0xff] %v4683_v14  ;;  %v4535_v45 = vmul.f32 %v5931_v35, %v9307_v55  ;;  %v4361_v51 = vpop.f32.mrb[239].mxu0 }
 0x4df   : > { %4730 = vst [vmem:[%s9327_s12 + $0xe0] sm:$0xff] %v4682_v56  ;;  %v4534_v49 = vmul.f32 %v9307_v55, %v4361_v51 }
 0x4e0   : > { %v4589_v44 = vadd.f32 %v9312_v26, %v4535_v45  ;;  %v4491_v45 = vld [vmem:[%s6832_s25 + $0x148] sm:$0xff] }
 0x4e1   : > { %v4588_v63 = vadd.f32 %v9312_v26, %v4534_v49  ;;  %v4490_v49 = vld [vmem:[%s6832_s25 + $0x140] sm:$0xff] }
 0x4e2   : > { %v4637_v32 = vadd.f32 %v4589_v44, %v4481_v47 }
 0x4e3   : > { %v4636_v50 = vadd.f32 %v4588_v63, %v4480_v33 }
 0x4e4   : > { %v4685_v9 = vmax.f32 %v4637_v32, 0.0 }
 0x4e5   : > { %v4684_v21 = vmax.f32 %v4636_v50, 0.0  ;;  %v5934_v39 = vpop.f32.mrb[240].mxu0 }
 0x4e6   : > { %4733 = vst [vmem:[%s9327_s12 + $0xf8] sm:$0xff] %v4685_v9  ;;  %v4537_v28 = vmul.f32 %v5934_v39, %v9307_v55  ;;  %v4371_v7 = vpop.f32.mrb[241].mxu0 }
 0x4e7   : > { %4732 = vst [vmem:[%s9327_s12 + $0xf0] sm:$0xff] %v4684_v21  ;;  %v4536_v60 = vmul.f32 %v9307_v55, %v4371_v7 }
 0x4e8   : > { %v4591_v46 = vadd.f32 %v9312_v26, %v4537_v28  ;;  %v4493_v28 = vld [vmem:[%s6832_s25 + $0x158] sm:$0xff] }
 0x4e9   : > { %v4590_v17 = vadd.f32 %v9312_v26, %v4536_v60  ;;  %v4492_v60 = vld [vmem:[%s6832_s25 + $0x150] sm:$0xff] }
 0x4ea   : > { %v4639_v6 = vadd.f32 %v4591_v46, %v4483_v53 }
 0x4eb   : > { %v4638_v52 = vadd.f32 %v4590_v17, %v4482_v62 }
 0x4ec   : > { %v4687_v15 = vmax.f32 %v4639_v6, 0.0 }
 0x4ed   : > { %v4686_v25 = vmax.f32 %v4638_v52, 0.0  ;;  %v5937_v11 = vpop.f32.mrb[242].mxu0 }
 0x4ee   : > { %4735 = vst [vmem:[%s9327_s12 + $0x108] sm:$0xff] %v4687_v15  ;;  %v4539_v24 = vmul.f32 %v5937_v11, %v9307_v55  ;;  %v4381_v23 = vpop.f32.mrb[243].mxu0 }
 0x4ef   : > { %4734 = vst [vmem:[%s9327_s12 + $0x100] sm:$0xff] %v4686_v25  ;;  %v4538_v54 = vmul.f32 %v9307_v55, %v4381_v23 }
 0x4f0   : > { %v4593_v13 = vadd.f32 %v9312_v26, %v4539_v24  ;;  %v4495_v24 = vld [vmem:[%s6832_s25 + $0x168] sm:$0xff] }
 0x4f1   : > { %v4592_v8 = vadd.f32 %v9312_v26, %v4538_v54  ;;  %v4494_v54 = vld [vmem:[%s6832_s25 + $0x160] sm:$0xff] }
 0x4f2   : > { %v4641_v4 = vadd.f32 %v4593_v13, %v4485_v59 }
 0x4f3   : > { %v4640_v58 = vadd.f32 %v4592_v8, %v4484_v36 }
 0x4f4   : > { %v4689_v20 = vmax.f32 %v4641_v4, 0.0 }
 0x4f5   : > { %v4688_v5 = vmax.f32 %v4640_v58, 0.0  ;;  %v5940_v34 = vpop.f32.mrb[244].mxu0 }
 0x4f6   : > { %4737 = vst [vmem:[%s9327_s12 + $0x118] sm:$0xff] %v4689_v20  ;;  %v4541_v48 = vmul.f32 %v5940_v34, %v9307_v55  ;;  %v4391_v1 = vpop.f32.mrb[245].mxu0 }
 0x4f7   : > { %4736 = vst [vmem:[%s9327_s12 + $0x110] sm:$0xff] %v4688_v5  ;;  %v4540_v10 = vmul.f32 %v9307_v55, %v4391_v1 }
 0x4f8   : > { %v4595_v19 = vadd.f32 %v9312_v26, %v4541_v48  ;;  %v4497_v48 = vld [vmem:[%s6832_s25 + $0x178] sm:$0xff] }
 0x4f9   : > { %v4594_v16 = vadd.f32 %v9312_v26, %v4540_v10  ;;  %v4496_v10 = vld [vmem:[%s6832_s25 + $0x170] sm:$0xff]  ;;  %s6479_s25 = scalar_lea.vmem %s9515_s28, 6144 }
 0x4fa   : > { %v4643_v40 = vadd.f32 %v4595_v19, %v4487_v2  ;;  %p6480_p10 = scmp.ne.s32.totalorder %s9515_s28, %s6479_s25  ;;  %p6487_p1 = scmp.lt.s32.totalorder %s6485_s21, %s6479_s25 }
 0x4fb   : > { %v4642_v38 = vadd.f32 %v4594_v16, %v4486_v42 }
 0x4fc   : > { %v4691_v31 = vmax.f32 %v4643_v40, 0.0  ;;  %p6481_p3 = pnand %p6480_p10, %p6775_p5  ;;  %p6488_p2 = por %p6487_p1, %p6486_p12 }
 0x4fd   : > { %v4690_v27 = vmax.f32 %v4642_v38, 0.0  ;;  %v5943_v37 = vpop.f32.mrb[246].mxu0 }
 0x4fe   : > { %4739 = vst [vmem:[%s9327_s12 + $0x128] sm:$0xff] %v4691_v31  ;;  %v4543_v12 = vmul.f32 %v5943_v37, %v9307_v55  ;;  %v4401_v22 = vpop.f32.mrb[247].mxu0  ;;  %p6482_p7 = pneg %p6481_p3 }
 0x4ff   : > { %4738 = vst [vmem:[%s9327_s12 + $0x120] sm:$0xff] %v4690_v27  ;;  %v4542_v61 = vmul.f32 %v9307_v55, %v4401_v22 }
 0x500   : > { %v4597_v29 = vadd.f32 %v9312_v26, %v4543_v12  ;;  %p6489_p4 = pnand %p6488_p2, %p6482_p7 }
 0x501   : > { %v4596_v57 = vadd.f32 %v9312_v26, %v4542_v61 }
 0x502   : > { %v4645_v30 = vadd.f32 %v4597_v29, %v4489_v3 }
 0x503   : > { %v4644_v43 = vadd.f32 %v4596_v57, %v4488_v41 }
 0x504   : > { %v4693_v18 = vmax.f32 %v4645_v30, 0.0 }
 0x505   : > { %v4692_v0 = vmax.f32 %v4644_v43, 0.0  ;;  %v5946_v14 = vpop.f32.mrb[248].mxu0 }
 0x506   : > { %4741 = vst [vmem:[%s9327_s12 + $0x138] sm:$0xff] %v4693_v18  ;;  %v4545_v56 = vmul.f32 %v5946_v14, %v9307_v55  ;;  %v4411_v35 = vpop.f32.mrb[249].mxu0 }
 0x507   : > { %4740 = vst [vmem:[%s9327_s12 + $0x130] sm:$0xff] %v4692_v0  ;;  %v4544_v51 = vmul.f32 %v9307_v55, %v4411_v35 }
 0x508   : > { %v4599_v47 = vadd.f32 %v9312_v26, %v4545_v56 }
 0x509   : > { %v4598_v44 = vadd.f32 %v9312_v26, %v4544_v51 }
 0x50a   : > { %v4647_v33 = vadd.f32 %v4599_v47, %v4491_v45 }
 0x50b   : > { %v4646_v63 = vadd.f32 %v4598_v44, %v4490_v49 }
 0x50c   : > { %v4695_v32 = vmax.f32 %v4647_v33, 0.0 }
 0x50d   : > { %v4694_v50 = vmax.f32 %v4646_v63, 0.0  ;;  %v5949_v9 = vpop.f32.mrb[250].mxu0 }
 0x50e   : > { %4743 = vst [vmem:[%s9327_s12 + $0x148] sm:$0xff] %v4695_v32  ;;  %v4547_v21 = vmul.f32 %v5949_v9, %v9307_v55  ;;  %v4421_v39 = vpop.f32.mrb[251].mxu0 }
 0x50f   : > { %4742 = vst [vmem:[%s9327_s12 + $0x140] sm:$0xff] %v4694_v50  ;;  %v4546_v7 = vmul.f32 %v9307_v55, %v4421_v39 }
 0x510   : > { %v4601_v53 = vadd.f32 %v9312_v26, %v4547_v21 }
 0x511   : > { %v4600_v46 = vadd.f32 %v9312_v26, %v4546_v7 }
 0x512   : > { %v4649_v62 = vadd.f32 %v4601_v53, %v4493_v28 }
 0x513   : > { %v4648_v17 = vadd.f32 %v4600_v46, %v4492_v60 }
 0x514   : > { %v4697_v6 = vmax.f32 %v4649_v62, 0.0 }
 0x515   : > { %v4696_v52 = vmax.f32 %v4648_v17, 0.0  ;;  %v5952_v15 = vpop.f32.mrb[252].mxu0 }
 0x516   : > { %4745 = vst [vmem:[%s9327_s12 + $0x158] sm:$0xff] %v4697_v6  ;;  %v4549_v25 = vmul.f32 %v5952_v15, %v9307_v55  ;;  %v4431_v11 = vpop.f32.mrb[253].mxu0 }
 0x517   : > { %4744 = vst [vmem:[%s9327_s12 + $0x150] sm:$0xff] %v4696_v52  ;;  %v4548_v23 = vmul.f32 %v9307_v55, %v4431_v11 }
 0x518   : > { %v4603_v59 = vadd.f32 %v9312_v26, %v4549_v25 }
 0x519   : > { %v4602_v13 = vadd.f32 %v9312_v26, %v4548_v23 }
 0x51a   : > { %v4651_v36 = vadd.f32 %v4603_v59, %v4495_v24 }
 0x51b   : > { %v4650_v8 = vadd.f32 %v4602_v13, %v4494_v54 }
 0x51c   : > { %v4699_v4 = vmax.f32 %v4651_v36, 0.0 }
 0x51d   : > { %v4698_v58 = vmax.f32 %v4650_v8, 0.0  ;;  %v5955_v20 = vpop.f32.mrb[254].mxu0 }
 0x51e   : > { %4747 = vst [vmem:[%s9327_s12 + $0x168] sm:$0xff] %v4699_v4  ;;  %v4551_v5 = vmul.f32 %v5955_v20, %v9307_v55  ;;  %v4441_v34 = vpop.f32.mrb[255].mxu0 }
 0x51f   : > { %4746 = vst [vmem:[%s9327_s12 + $0x160] sm:$0xff] %v4698_v58  ;;  %v4550_v1 = vmul.f32 %v9307_v55, %v4441_v34 }
 0x520   : > { %v4605_v2 = vadd.f32 %v9312_v26, %v4551_v5 }
 0x521   : > { %v4604_v19 = vadd.f32 %v9312_v26, %v4550_v1 }
 0x522   : > { %v4653_v42 = vadd.f32 %v4605_v2, %v4497_v48 }
 0x523   : > { %v4652_v16 = vadd.f32 %v4604_v19, %v4496_v10 }
 0x524   : > { %v4701_v40 = vmax.f32 %v4653_v42, 0.0 }
 0x525   : > { %v4700_v55 = vmax.f32 %v4652_v16, 0.0 }
 0x526   : > { %4749 = vst [vmem:[%s9327_s12 + $0x178] sm:$0xff] %v4701_v40 }
 0x527   : > { %4748 = vst [vmem:[%s9327_s12 + $0x170] sm:$0xff] %v4700_v55 }
 0x528   : > { %6492 = shalt.err (!%p6489_p4)
}
 0x529   : > { %s6493_s23 = scalar_lea.hbm %s9513_s10, 6144  ;;  %s6497_s12 = scalar_lea.hbm %s10229_s11, 12288 }
 0x52a   : > { %p6494_p9 = scmp.ne.s32.totalorder %s9513_s10, %s6493_s23  ;;  %p6498_p8 = scmp.lt.u32.totalorder %s9513_s10, %s10229_s11 }
 0x52b   : > { %p6499_p13 = scmp.lt.u32.totalorder %s6497_s12, %s6493_s23  ;;  %p6501_p10 = scmp.lt.u32.totalorder %s6493_s23, %s9513_s10 }
 0x52c   : > { %p6495_p0 = pnand %p6494_p9, %p6775_p5 }
 0x52d   : > { %p6500_p6 = por %p6499_p13, %p6498_p8 }
 0x52e   : > { %p6496_p11 = pneg %p6495_p0 }
 0x52f   : > { %p6502_p3 = por %p6501_p10, %p6500_p6 }
 0x531   : > { %p6503_p7 = pnand %p6502_p3, %p6496_p11 }
 0x533   : > { %6506 = shalt.err (!%p6503_p7)
}
 0x534   : > { %s6564_s30 = smov 128   ;;  %s6565_s25 = smov 8  }
 0x535   : > { %6294 = dma.vmem_to_hbm [thread:$0]  (%p6775_p5), %s9515_s28, 6144, %s9513_s10, %s4751_s17, %s6564_s30, %s6564_s30, %s6565_s25  }
 0x536 PF: > { %s10230_s29 = sld [smem:[#allocation16_spill]]  ;;  %s10231_s19 = sld [smem:[#allocation17_spill]] }
 0x537   : > { %p10233_p1 = scmp.ge.s32.totalorder %s6553_s16, 2 }
 0x53c   : > { %s4779_s21 = sand.u32 1, %s10230_s29   ;;  %p10232_p12 = scmp.ne.s32.totalorder %s10231_s19, 0 }
 0x53d   : > { %s4780_s23 = scalar_lea.sflag [#allocation5], %s4779_s21 }
 0x53e   : > { %p6311_p2 = pnand %p10233_p1, %p10232_p12 }
 0x540   : > { %6536 = dma.done.wait (!%p6311_p2), %s4780_s23, 6144  }
 0x541   : > { %6538 = vsyncadd (!%p6311_p2), %s4780_s23, 4294961152  ;;  %s10234_s9 = smov %s6771_s13  ;;  %p25_p4 = scmp.ge.s32.totalorder %s6761_s22, 4  }
 0x542   : > { %s10235_s13 = smov %s6545_s14  ;;  %s10236_s14 = smov %s6549_s15 }
 0x543   : > { %s10237_s15 = smov %s10234_s9  ;;  %s10238_s16 = smov %s6761_s22 }
 0x544   :  { %27 = sbr.rel (!%p25_p4) target bundleno = 10 (0xa), region = 122 }
 0x54b   :  { %4785 = vsyncpa [#allocation4], 1 }
 0x54c   :  { %4787 = vsyncpa [#allocation4 + $0x1], 1 }
 0x54d   :  { %4788 = vsyncpa [#allocation7], 1 }
 0x54e   :  { %4789 = vsyncpa [#allocation10], 1 }
 0x54f   :  { %4790 = vsyncpa [#allocation5], 1 }
 0x550   :  { %4792 = vsyncpa [#allocation5 + $0x1], 1 }

</bundles_post_ra>
